<compile_context>
chip_gen: v6e
topology: v6e:2x2x1
jax: 0.10.0
libtpu: 0.0.40
codegen_flags: <defaults>
</compile_context>

<pallas_src>
import functools

import jax
import jax.numpy as jnp
from jax.experimental import pallas as pl
from jax.experimental.pallas import tpu as pltpu

LRELU_ALPHA = 0.2
BN_EPS = 1e-5
LANE = 128


def _round_up(x, m):
    return ((x + m - 1) // m) * m


def _round_down(x, m):
    return (x // m) * m


def _vmem_limit_bytes():
    """Generation-aware scoped-VMEM limit (~3/4 of physical, capped at 96 MiB).

    v5e/v6e (128 MiB physical) -> 96 MiB; v7x (64 MiB physical) -> 48 MiB."""
    try:
        cap = pltpu.get_tpu_info().vmem_capacity_bytes
    except Exception:  # non-TPU / older-jax fallback: assume the smaller part
        cap = 64 * 1024 * 1024
    return int(min(cap * 3 // 4, 96 * 1024 * 1024))


def _choose_tm(M, step_bytes_fn, vmem_limit):
    """Largest M-tile (multiple of 8) whose estimated per-step VMEM footprint
    fits in ~60% of the limit.  Callers pad M up to a multiple of the result,
    so there is no silent full-M fallback that could blow the VMEM limit."""
    target = 2048 if vmem_limit >= 64 * 1024 * 1024 else 1024
    tm = min(target, _round_up(M, 8))
    budget = int(vmem_limit * 0.6)
    while tm > 8 and step_bytes_fn(tm) > budget:
        tm = max(8, _round_down(tm // 2, 8))
    return tm


# --------------------------- Pallas kernels ----------------------------------

def _bias_lrelu_kernel(p_ref, w_ref, b_ref, o_ref):
    # [tm, K] @ [K, Cp] on the MXU (f32 accumulate); bias + LeakyReLU epilogue.
    y = jnp.dot(p_ref[...], w_ref[...], preferred_element_type=jnp.float32)
    y = y + b_ref[...]
    y = jnp.where(y >= 0, y, LRELU_ALPHA * y)
    o_ref[...] = y.astype(o_ref.dtype)


def _matmul_stats_kernel(p_ref, w_ref, y_ref, sum_ref, ssq_ref):
    # Pass 1 of a BN block: conv-as-matmul for one M tile, emitting the bf16
    # conv output plus this tile's per-channel sum / sum-of-squares.
    y = jnp.dot(p_ref[...], w_ref[...], preferred_element_type=jnp.float32)
    y_ref[...] = y.astype(y_ref.dtype)
    s = jnp.sum(y, axis=0, keepdims=True)          # (1, Cout_p) f32
    q = jnp.sum(y * y, axis=0, keepdims=True)
    # Broadcast across the 8-sublane stats block so the store stays
    # (8,128)-aligned; the wrapper reduces these tiny arrays with XLA.
    sum_ref[...] = jnp.broadcast_to(s, sum_ref.shape)
    ssq_ref[...] = jnp.broadcast_to(q, ssq_ref.shape)


def _scale_shift_lrelu_kernel(y_ref, sc_ref, sh_ref, o_ref):
    # Pass 2 of a BN block: per-channel scale/shift (folded BN) + LeakyReLU.
    y = y_ref[...].astype(jnp.float32)
    y = y * sc_ref[...] + sh_ref[...]
    y = jnp.where(y >= 0, y, LRELU_ALPHA * y)
    o_ref[...] = y.astype(o_ref.dtype)


# ------------------------------ XLA glue --------------------------------------

def _im2col(x_nhwc, kh, kw, stride, pad):
    N, H, W, C = x_nhwc.shape
    Ho = (H + 2 * pad - kh) // stride + 1
    Wo = (W + 2 * pad - kw) // stride + 1
    xp = jnp.pad(x_nhwc, ((0, 0), (pad, pad), (pad, pad), (0, 0)))
    cols = []
    for ki in range(kh):
        for kj in range(kw):
            cols.append(xp[:, ki:ki + stride * Ho:stride,
                           kj:kj + stride * Wo:stride, :])
    patches = jnp.stack(cols, axis=3)                 # [N, Ho, Wo, kh*kw, C]
    return patches.reshape(N * Ho * Wo, kh * kw * C), Ho, Wo


def _weight_to_mat(w_oihw, cout_pad):
    """[Cout, Cin, kh, kw] -> [kh*kw*Cin, cout_pad]; only Cout is zero padded."""
    cout, cin, kh, kw = w_oihw.shape
    w = jnp.pad(w_oihw, ((0, cout_pad - cout), (0, 0), (0, 0), (0, 0)))
    return jnp.transpose(w, (2, 3, 1, 0)).reshape(kh * kw * cin, cout_pad)


# ------------------------------ Layer wrappers --------------------------------

def _conv_bias_lrelu(x_nhwc, w_oihw, bias, *, stride, pad, vmem_limit):
    """Conv2d(+bias) + LeakyReLU(0.2): single fused M-tiled Pallas kernel."""
    N, H, W, Cin = x_nhwc.shape
    Cout, _, kh, kw = w_oihw.shape
    Cout_p = _round_up(Cout, LANE)

    patches, Ho, Wo = _im2col(x_nhwc.astype(jnp.bfloat16), kh, kw, stride, pad)
    M, K = patches.shape
    wmat = _weight_to_mat(w_oihw, Cout_p).astype(jnp.bfloat16)
    b = jnp.pad(bias, (0, Cout_p - Cout)).reshape(1, Cout_p).astype(jnp.float32)

    def step_bytes(t):
        return (2 * t * K * 2            # double-buffered bf16 patches block
                + K * Cout_p * 2         # resident bf16 weights
                + Cout_p * 4             # bias
                + 2 * t * Cout_p * 2)    # double-buffered bf16 output block
    tm = _choose_tm(M, step_bytes, vmem_limit)
    Mp = _round_up(M, tm)
    if Mp > M:
        patches = jnp.pad(patches, ((0, Mp - M), (0, 0)))

    out = pl.pallas_call(
        _bias_lrelu_kernel,
        out_shape=jax.ShapeDtypeStruct((Mp, Cout_p), jnp.bfloat16),
        grid=(Mp // tm,),
        in_specs=[
            pl.BlockSpec((tm, K), lambda i: (i, 0)),
            pl.BlockSpec((K, Cout_p), lambda i: (0, 0)),   # weights resident
            pl.BlockSpec((1, Cout_p), lambda i: (0, 0)),
        ],
        out_specs=pl.BlockSpec((tm, Cout_p), lambda i: (i, 0)),
        compiler_params=pltpu.CompilerParams(
            dimension_semantics=("parallel",),
            vmem_limit_bytes=vmem_limit,
        ),
    )(patches, wmat, b)
    return out[:M].reshape(N, Ho, Wo, Cout_p)


def _conv_bn_lrelu(x_nhwc, w_oihw, gamma, beta, *, stride, pad, vmem_limit):
    """Conv2d(no bias) + BatchNorm2d(train-mode stats) + LeakyReLU(0.2).

    Two M-tiled Pallas passes (matmul+stats, then folded BN apply); per-step
    VMEM is independent of M, and both passes are megacore-parallel over M."""
    N, H, W, Cin = x_nhwc.shape              # Cin == real channel count
    Cout, _, kh, kw = w_oihw.shape
    Cout_p = _round_up(Cout, LANE)

    patches, Ho, Wo = _im2col(x_nhwc.astype(jnp.bfloat16), kh, kw, stride, pad)
    M, K = patches.shape
    wmat = _weight_to_mat(w_oihw, Cout_p).astype(jnp.bfloat16)

    # ---- pass 1: matmul + per-tile channel sum / sumsq ----
    def step1_bytes(t):
        return (2 * t * K * 2                # patches (bf16, double-buffered)
                + K * Cout_p * 2             # weights resident
                + 2 * t * Cout_p * 2         # bf16 conv output (double-buffered)
                + 2 * 2 * 8 * Cout_p * 4)    # per-tile stats outputs
    tm = _choose_tm(M, step1_bytes, vmem_limit)
    Mp = _round_up(M, tm)
    if Mp > M:
        patches = jnp.pad(patches, ((0, Mp - M), (0, 0)))
    n_tiles = Mp // tm

    y, sums, ssqs = pl.pallas_call(
        _matmul_stats_kernel,
        out_shape=(jax.ShapeDtypeStruct((Mp, Cout_p), jnp.bfloat16),
                   jax.ShapeDtypeStruct((8 * n_tiles, Cout_p), jnp.float32),
                   jax.ShapeDtypeStruct((8 * n_tiles, Cout_p), jnp.float32)),
        grid=(n_tiles,),
        in_specs=[
            pl.BlockSpec((tm, K), lambda i: (i, 0)),
            pl.BlockSpec((K, Cout_p), lambda i: (0, 0)),   # weights resident
        ],
        out_specs=(pl.BlockSpec((tm, Cout_p), lambda i: (i, 0)),
                   pl.BlockSpec((8, Cout_p), lambda i: (i, 0)),
                   pl.BlockSpec((8, Cout_p), lambda i: (i, 0))),
        compiler_params=pltpu.CompilerParams(
            dimension_semantics=("parallel",),
            vmem_limit_bytes=vmem_limit,
        ),
    )(patches, wmat)

    # ---- XLA: reduce tiny per-tile stats, fold BN into scale/shift ----
    col_sum = jnp.sum(sums.reshape(n_tiles, 8, Cout_p)[:, 0, :], axis=0)
    col_ssq = jnp.sum(ssqs.reshape(n_tiles, 8, Cout_p)[:, 0, :], axis=0)
    mean = col_sum / M                                   # real M: zero-pad rows contribute 0
    var = jnp.maximum(col_ssq / M - mean * mean, 0.0)    # biased variance
    g = jnp.pad(gamma, (0, Cout_p - Cout), constant_values=1.0).astype(jnp.float32)
    b = jnp.pad(beta, (0, Cout_p - Cout)).astype(jnp.float32)
    scale = g * jax.lax.rsqrt(var + BN_EPS)
    shift = b - mean * scale
    scale = scale.reshape(1, Cout_p)
    shift = shift.reshape(1, Cout_p)

    # ---- pass 2: elementwise folded-BN + LeakyReLU ----
    def step2_bytes(t):
        return 2 * t * Cout_p * 2 * 2 + 2 * Cout_p * 4
    tm2 = tm
    for cand in (8192, 4096, 2048, 1024):
        if cand > tm and Mp % cand == 0 and step2_bytes(cand) <= int(vmem_limit * 0.6):
            tm2 = cand
            break

    out = pl.pallas_call(
        _scale_shift_lrelu_kernel,
        out_shape=jax.ShapeDtypeStruct((Mp, Cout_p), jnp.bfloat16),
        grid=(Mp // tm2,),
        in_specs=[
            pl.BlockSpec((tm2, Cout_p), lambda i: (i, 0)),
            pl.BlockSpec((1, Cout_p), lambda i: (0, 0)),
            pl.BlockSpec((1, Cout_p), lambda i: (0, 0)),
        ],
        out_specs=pl.BlockSpec((tm2, Cout_p), lambda i: (i, 0)),
        compiler_params=pltpu.CompilerParams(
            dimension_semantics=("parallel",),
            vmem_limit_bytes=vmem_limit,
        ),
    )(y, scale, shift)
    return out[:M].reshape(N, Ho, Wo, Cout_p)


def _final_conv_sigmoid(x_nhwc, w_oihw, bias, *, stride, pad):
    """Conv(8fd -> 1, k=4) + Sigmoid.  M = N rows, 1 output channel: a
    pallas_call here is pure fixed overhead (lane-width-1 masked store), so
    per the perf review it stays a plain jnp contraction."""
    N = x_nhwc.shape[0]
    Cout, Cin, kh, kw = w_oihw.shape
    x = x_nhwc[..., :Cin].astype(jnp.float32)          # drop lane padding
    patches, Ho, Wo = _im2col(x, kh, kw, stride, pad)
    wmat = jnp.transpose(w_oihw, (2, 3, 1, 0)).reshape(kh * kw * Cin, Cout)
    y = patches @ wmat + bias.reshape(1, Cout)
    return jax.nn.sigmoid(y).reshape(N, Ho, Wo, Cout)


# ------------------------------ Model ------------------------------------------

def init_discriminator_params(key, channels_img, features_d):
    """Deterministic DCGAN-style init (Normal(0, 0.02); BN gamma=1, beta=0)."""
    ks = jax.random.split(key, 8)
    fd = features_d
    p = {}
    p["w1"] = 0.02 * jax.random.normal(ks[0], (fd, channels_img, 4, 4), jnp.float32)
    p["b1"] = 0.02 * jax.random.normal(ks[1], (fd,), jnp.float32)
    p["w2"] = 0.02 * jax.random.normal(ks[2], (2 * fd, fd, 4, 4), jnp.float32)
    p["g2"], p["be2"] = jnp.ones((2 * fd,), jnp.float32), jnp.zeros((2 * fd,), jnp.float32)
    p["w3"] = 0.02 * jax.random.normal(ks[3], (4 * fd, 2 * fd, 4, 4), jnp.float32)
    p["g3"], p["be3"] = jnp.ones((4 * fd,), jnp.float32), jnp.zeros((4 * fd,), jnp.float32)
    p["w4"] = 0.02 * jax.random.normal(ks[4], (8 * fd, 4 * fd, 4, 4), jnp.float32)
    p["g4"], p["be4"] = jnp.ones((8 * fd,), jnp.float32), jnp.zeros((8 * fd,), jnp.float32)
    p["w5"] = 0.02 * jax.random.normal(ks[5], (1, 8 * fd, 4, 4), jnp.float32)
    p["b5"] = 0.02 * jax.random.normal(ks[6], (1,), jnp.float32)
    return p


@functools.partial(jax.jit, static_argnames=("vmem_limit",))
def _forward_impl(x_nchw, params, *, vmem_limit):
    fd = params["w1"].shape[0]
    x = jnp.transpose(x_nchw, (0, 2, 3, 1))                       # NCHW -> NHWC
    x = _conv_bias_lrelu(x, params["w1"], params["b1"], stride=2, pad=1,
                         vmem_limit=vmem_limit)
    # Slice lane padding back to the real channel count before every im2col so
    # the next contraction's K (= kh*kw*Cin_real) and patch bytes aren't inflated.
    x = _conv_bn_lrelu(x[..., :fd], params["w2"], params["g2"], params["be2"],
                       stride=2, pad=1, vmem_limit=vmem_limit)
    x = _conv_bn_lrelu(x[..., :2 * fd], params["w3"], params["g3"], params["be3"],
                       stride=2, pad=1, vmem_limit=vmem_limit)
    x = _conv_bn_lrelu(x[..., :4 * fd], params["w4"], params["g4"], params["be4"],
                       stride=2, pad=1, vmem_limit=vmem_limit)
    x = _final_conv_sigmoid(x, params["w5"], params["b5"], stride=2, pad=0)
    return jnp.transpose(x, (0, 3, 1, 2))                         # NHWC -> NCHW


def discriminator_forward(x_nchw, params):
    """x_nchw: [N, channels_img, 64, 64] -> [N, 1, 1, 1] (matches PyTorch)."""
    return _forward_impl(x_nchw, params, vmem_limit=_vmem_limit_bytes())


# --------------------------- Pure-JAX reference --------------------------------

@jax.jit
def _reference_forward(x, p):
    def conv(x, w, stride, pad):
        return jax.lax.conv_general_dilated(
            x, w, window_strides=(stride, stride),
            padding=((pad, pad), (pad, pad)),
            dimension_numbers=("NCHW", "OIHW", "NCHW"))

    def lrelu(x):
        return jnp.where(x >= 0, x, LRELU_ALPHA * x)

    def bn(x, g, b):
        mu = jnp.mean(x, axis=(0, 2, 3), keepdims=True)
        var = jnp.mean((x - mu) ** 2, axis=(0, 2, 3), keepdims=True)
        xn = (x - mu) * jax.lax.rsqrt(var + BN_EPS)
        return xn * g.reshape(1, -1, 1, 1) + b.reshape(1, -1, 1, 1)

    x = lrelu(conv(x, p["w1"], 2, 1) + p["b1"].reshape(1, -1, 1, 1))
    x = lrelu(bn(conv(x, p["w2"], 2, 1), p["g2"], p["be2"]))
    x = lrelu(bn(conv(x, p["w3"], 2, 1), p["g3"], p["be3"]))
    x = lrelu(bn(conv(x, p["w4"], 2, 1), p["g4"], p["be4"]))
    return jax.nn.sigmoid(conv(x, p["w5"], 2, 0) + p["b5"].reshape(1, -1, 1, 1))


if __name__ == "__main__":
    channels_img = 1
    features_d = 8          # compact synthetic model
    N = 2

    key = jax.random.PRNGKey(0)
    k_x, k_p = jax.random.split(key)
    # DCGAN discriminator expects 64x64 images so the final 4x4/s2/p0 conv -> 1x1
    x = jax.random.normal(k_x, (N, channels_img, 64, 64), jnp.float32)
    params = init_discriminator_params(k_p, channels_img, features_d)

    out = jax.block_until_ready(discriminator_forward(x, params))

    assert out.shape == (N, 1, 1, 1), out.shape
    assert bool(jnp.all(jnp.isfinite(out)))
    assert bool(jnp.all((out > 0.0) & (out < 1.0)))   # sigmoid range

    # bf16 MXU operands vs f32 reference: allow a loose tolerance.
    ref = jax.block_until_ready(_reference_forward(x, params))
    assert bool(jnp.max(jnp.abs(out - ref)) < 5e-2), float(jnp.max(jnp.abs(out - ref)))

    print("KERNEL_OK")
</pallas_src>

<mosaic_0001>
module attributes {stable_mosaic.version = 11 : i64} {
  func.func @_bias_lrelu_kernel(%arg0: i32, %arg1: memref<1024x16xbf16, #tpu.memory_space<vmem>>, %arg2: memref<16x128xbf16, #tpu.memory_space<vmem>>, %arg3: memref<1x128xf32, #tpu.memory_space<vmem>>, %arg4: memref<1024x128xbf16, #tpu.memory_space<vmem>>) attributes {dimension_semantics = [#tpu.dimension_semantics<parallel>], iteration_bounds = array<i64: 2>, scalar_prefetch = 0 : i64, scratch_operands = 0 : i64, tpu.core_type = #tpu.core_type<tc>, window_params = [{transform_indices = @transform_0, window_bounds = array<i64: 1024, 16>}, {pipeline_mode = #tpu.pipeline_mode<synchronous>, transform_indices = @transform_1, window_bounds = array<i64: 16, 128>}, {pipeline_mode = #tpu.pipeline_mode<synchronous>, transform_indices = @transform_2, window_bounds = array<i64: 1, 128>}, {transform_indices = @transform_3, window_bounds = array<i64: 1024, 128>}]} {
    %c0 = arith.constant 0 : index
    %c0_0 = arith.constant 0 : index
    %0 = vector.load %arg1[%c0, %c0_0] : memref<1024x16xbf16, #tpu.memory_space<vmem>>, vector<1024x16xbf16>
    %c0_1 = arith.constant 0 : index
    %c0_2 = arith.constant 0 : index
    %1 = vector.load %arg2[%c0_1, %c0_2] : memref<16x128xbf16, #tpu.memory_space<vmem>>, vector<16x128xbf16>
    %cst = arith.constant dense<0.000000e+00> : vector<1024x128xf32>
    %2 = tpu.matmul %0, %1, %cst {dimension_numbers = #tpu.dot_dimension_numbers<[1], [0], [0], [1], [0, 0, 1, 1], [], []>} : vector<1024x16xbf16>, vector<16x128xbf16>, vector<1024x128xf32> -> vector<1024x128xf32>
    %c0_3 = arith.constant 0 : index
    %c0_4 = arith.constant 0 : index
    %3 = vector.load %arg3[%c0_3, %c0_4] : memref<1x128xf32, #tpu.memory_space<vmem>>, vector<1x128xf32>
    %4 = vector.broadcast %3 : vector<1x128xf32> to vector<1024x128xf32>
    %5 = arith.addf %2, %4 : vector<1024x128xf32>
    %cst_5 = arith.constant 0.000000e+00 : f32
    %6 = vector.broadcast %cst_5 : f32 to vector<1024x128xf32>
    %7 = arith.cmpf oge, %5, %6 : vector<1024x128xf32>
    %cst_6 = arith.constant 2.000000e-01 : f32
    %8 = vector.broadcast %cst_6 : f32 to vector<1024x128xf32>
    %9 = arith.mulf %8, %5 : vector<1024x128xf32>
    %10 = arith.select %7, %5, %9 : vector<1024x128xi1>, vector<1024x128xf32>
    %11 = arith.truncf %10 : vector<1024x128xf32> to vector<1024x128xbf16>
    %c0_7 = arith.constant 0 : index
    %c0_8 = arith.constant 0 : index
    %12 = vector.load %arg4[%c0_7, %c0_8] : memref<1024x128xbf16, #tpu.memory_space<vmem>>, vector<1024x128xbf16>
    tpu.vector_store %arg4[%c0_7, %c0_8], %11 {strides = array<i32>} : memref<1024x128xbf16, #tpu.memory_space<vmem>>, vector<1024x128xbf16>,
    return
  }
  func.func @transform_0(%arg0: i32) -> (i32, i32) {
    %c0_i32 = arith.constant 0 : i32
    %c0_i32_0 = arith.constant 0 : i32
    return %arg0, %c0_i32 : i32, i32
  }
  func.func @transform_1(%arg0: i32) -> (i32, i32) {
    %c0_i32 = arith.constant 0 : i32
    %c0_i32_0 = arith.constant 0 : i32
    %c0_i32_1 = arith.constant 0 : i32
    return %c0_i32, %c0_i32_0 : i32, i32
  }
  func.func @transform_2(%arg0: i32) -> (i32, i32) {
    %c0_i32 = arith.constant 0 : i32
    %c0_i32_0 = arith.constant 0 : i32
    %c0_i32_1 = arith.constant 0 : i32
    return %c0_i32, %c0_i32_0 : i32, i32
  }
  func.func @transform_3(%arg0: i32) -> (i32, i32) {
    %c0_i32 = arith.constant 0 : i32
    %c0_i32_0 = arith.constant 0 : i32
    return %arg0, %c0_i32 : i32, i32
  }
}

module attributes {stable_mosaic.version = 11 : i64} {
  func.func @_matmul_stats_kernel(%arg0: i32, %arg1: memref<512x128xbf16, #tpu.memory_space<vmem>>, %arg2: memref<128x128xbf16, #tpu.memory_space<vmem>>, %arg3: memref<512x128xbf16, #tpu.memory_space<vmem>>, %arg4: memref<8x128xf32, #tpu.memory_space<vmem>>, %arg5: memref<8x128xf32, #tpu.memory_space<vmem>>) attributes {dimension_semantics = [#tpu.dimension_semantics<parallel>], iteration_bounds = array<i64: 1>, scalar_prefetch = 0 : i64, scratch_operands = 0 : i64, tpu.core_type = #tpu.core_type<tc>, window_params = [{transform_indices = @transform_0, window_bounds = array<i64: 512, 128>}, {pipeline_mode = #tpu.pipeline_mode<synchronous>, transform_indices = @transform_1, window_bounds = array<i64: 128, 128>}, {transform_indices = @transform_2, window_bounds = array<i64: 512, 128>}, {transform_indices = @transform_3, window_bounds = array<i64: 8, 128>}, {transform_indices = @transform_4, window_bounds = array<i64: 8, 128>}]} {
    %c0 = arith.constant 0 : index
    %c0_0 = arith.constant 0 : index
    %0 = vector.load %arg1[%c0, %c0_0] : memref<512x128xbf16, #tpu.memory_space<vmem>>, vector<512x128xbf16>
    %c0_1 = arith.constant 0 : index
    %c0_2 = arith.constant 0 : index
    %1 = vector.load %arg2[%c0_1, %c0_2] : memref<128x128xbf16, #tpu.memory_space<vmem>>, vector<128x128xbf16>
    %cst = arith.constant dense<0.000000e+00> : vector<512x128xf32>
    %2 = tpu.matmul %0, %1, %cst {dimension_numbers = #tpu.dot_dimension_numbers<[1], [0], [0], [1], [0, 0, 1, 1], [], []>} : vector<512x128xbf16>, vector<128x128xbf16>, vector<512x128xf32> -> vector<512x128xf32>
    %3 = arith.truncf %2 : vector<512x128xf32> to vector<512x128xbf16>
    %c0_3 = arith.constant 0 : index
    %c0_4 = arith.constant 0 : index
    %4 = vector.load %arg3[%c0_3, %c0_4] : memref<512x128xbf16, #tpu.memory_space<vmem>>, vector<512x128xbf16>
    tpu.vector_store %arg3[%c0_3, %c0_4], %3 {strides = array<i32>} : memref<512x128xbf16, #tpu.memory_space<vmem>>, vector<512x128xbf16>,
    %cst_5 = arith.constant dense<0.000000e+00> : vector<128xf32>
    %5 = vector.multi_reduction <add>, %2, %cst_5 [0] : vector<512x128xf32> to vector<128xf32>
    %6 = vector.shape_cast %5 : vector<128xf32> to vector<1x128xf32>
    %7 = arith.mulf %2, %2 : vector<512x128xf32>
    %cst_6 = arith.constant dense<0.000000e+00> : vector<128xf32>
    %8 = vector.multi_reduction <add>, %7, %cst_6 [0] : vector<512x128xf32> to vector<128xf32>
    %9 = vector.shape_cast %8 : vector<128xf32> to vector<1x128xf32>
    %10 = vector.shape_cast %6 : vector<1x128xf32> to vector<1x128xf32>
    %11 = vector.broadcast %10 : vector<1x128xf32> to vector<8x128xf32>
    %c0_7 = arith.constant 0 : index
    %c0_8 = arith.constant 0 : index
    %12 = vector.load %arg4[%c0_7, %c0_8] : memref<8x128xf32, #tpu.memory_space<vmem>>, vector<8x128xf32>
    tpu.vector_store %arg4[%c0_7, %c0_8], %11 {strides = array<i32>} : memref<8x128xf32, #tpu.memory_space<vmem>>, vector<8x128xf32>,
    %13 = vector.shape_cast %9 : vector<1x128xf32> to vector<1x128xf32>
    %14 = vector.broadcast %13 : vector<1x128xf32> to vector<8x128xf32>
    %c0_9 = arith.constant 0 : index
    %c0_10 = arith.constant 0 : index
    %15 = vector.load %arg5[%c0_9, %c0_10] : memref<8x128xf32, #tpu.memory_space<vmem>>, vector<8x128xf32>
    tpu.vector_store %arg5[%c0_9, %c0_10], %14 {strides = array<i32>} : memref<8x128xf32, #tpu.memory_space<vmem>>, vector<8x128xf32>,
    return
  }
  func.func @transform_0(%arg0: i32) -> (i32, i32) {
    %c0_i32 = arith.constant 0 : i32
    %c0_i32_0 = arith.constant 0 : i32
    return %arg0, %c0_i32 : i32, i32
  }
  func.func @transform_1(%arg0: i32) -> (i32, i32) {
    %c0_i32 = arith.constant 0 : i32
    %c0_i32_0 = arith.constant 0 : i32
    %c0_i32_1 = arith.constant 0 : i32
    return %c0_i32, %c0_i32_0 : i32, i32
  }
  func.func @transform_2(%arg0: i32) -> (i32, i32) {
    %c0_i32 = arith.constant 0 : i32
    %c0_i32_0 = arith.constant 0 : i32
    return %arg0, %c0_i32 : i32, i32
  }
  func.func @transform_3(%arg0: i32) -> (i32, i32) {
    %c0_i32 = arith.constant 0 : i32
    %c0_i32_0 = arith.constant 0 : i32
    return %arg0, %c0_i32 : i32, i32
  }
  func.func @transform_4(%arg0: i32) -> (i32, i32) {
    %c0_i32 = arith.constant 0 : i32
    %c0_i32_0 = arith.constant 0 : i32
    return %arg0, %c0_i32 : i32, i32
  }
}

module attributes {stable_mosaic.version = 11 : i64} {
  func.func @_scale_shift_lrelu_kernel(%arg0: i32, %arg1: memref<512x128xbf16, #tpu.memory_space<vmem>>, %arg2: memref<1x128xf32, #tpu.memory_space<vmem>>, %arg3: memref<1x128xf32, #tpu.memory_space<vmem>>, %arg4: memref<512x128xbf16, #tpu.memory_space<vmem>>) attributes {dimension_semantics = [#tpu.dimension_semantics<parallel>], iteration_bounds = array<i64: 1>, scalar_prefetch = 0 : i64, scratch_operands = 0 : i64, tpu.core_type = #tpu.core_type<tc>, window_params = [{transform_indices = @transform_0, window_bounds = array<i64: 512, 128>}, {pipeline_mode = #tpu.pipeline_mode<synchronous>, transform_indices = @transform_1, window_bounds = array<i64: 1, 128>}, {pipeline_mode = #tpu.pipeline_mode<synchronous>, transform_indices = @transform_2, window_bounds = array<i64: 1, 128>}, {transform_indices = @transform_3, window_bounds = array<i64: 512, 128>}]} {
    %c0 = arith.constant 0 : index
    %c0_0 = arith.constant 0 : index
    %0 = vector.load %arg1[%c0, %c0_0] : memref<512x128xbf16, #tpu.memory_space<vmem>>, vector<512x128xbf16>
    %1 = arith.extf %0 : vector<512x128xbf16> to vector<512x128xf32>
    %c0_1 = arith.constant 0 : index
    %c0_2 = arith.constant 0 : index
    %2 = vector.load %arg2[%c0_1, %c0_2] : memref<1x128xf32, #tpu.memory_space<vmem>>, vector<1x128xf32>
    %3 = vector.broadcast %2 : vector<1x128xf32> to vector<512x128xf32>
    %4 = arith.mulf %1, %3 : vector<512x128xf32>
    %c0_3 = arith.constant 0 : index
    %c0_4 = arith.constant 0 : index
    %5 = vector.load %arg3[%c0_3, %c0_4] : memref<1x128xf32, #tpu.memory_space<vmem>>, vector<1x128xf32>
    %6 = vector.broadcast %5 : vector<1x128xf32> to vector<512x128xf32>
    %7 = arith.addf %4, %6 : vector<512x128xf32>
    %cst = arith.constant 0.000000e+00 : f32
    %8 = vector.broadcast %cst : f32 to vector<512x128xf32>
    %9 = arith.cmpf oge, %7, %8 : vector<512x128xf32>
    %cst_5 = arith.constant 2.000000e-01 : f32
    %10 = vector.broadcast %cst_5 : f32 to vector<512x128xf32>
    %11 = arith.mulf %10, %7 : vector<512x128xf32>
    %12 = arith.select %9, %7, %11 : vector<512x128xi1>, vector<512x128xf32>
    %13 = arith.truncf %12 : vector<512x128xf32> to vector<512x128xbf16>
    %c0_6 = arith.constant 0 : index
    %c0_7 = arith.constant 0 : index
    %14 = vector.load %arg4[%c0_6, %c0_7] : memref<512x128xbf16, #tpu.memory_space<vmem>>, vector<512x128xbf16>
    tpu.vector_store %arg4[%c0_6, %c0_7], %13 {strides = array<i32>} : memref<512x128xbf16, #tpu.memory_space<vmem>>, vector<512x128xbf16>,
    return
  }
  func.func @transform_0(%arg0: i32) -> (i32, i32) {
    %c0_i32 = arith.constant 0 : i32
    %c0_i32_0 = arith.constant 0 : i32
    return %arg0, %c0_i32 : i32, i32
  }
  func.func @transform_1(%arg0: i32) -> (i32, i32) {
    %c0_i32 = arith.constant 0 : i32
    %c0_i32_0 = arith.constant 0 : i32
    %c0_i32_1 = arith.constant 0 : i32
    return %c0_i32, %c0_i32_0 : i32, i32
  }
  func.func @transform_2(%arg0: i32) -> (i32, i32) {
    %c0_i32 = arith.constant 0 : i32
    %c0_i32_0 = arith.constant 0 : i32
    %c0_i32_1 = arith.constant 0 : i32
    return %c0_i32, %c0_i32_0 : i32, i32
  }
  func.func @transform_3(%arg0: i32) -> (i32, i32) {
    %c0_i32 = arith.constant 0 : i32
    %c0_i32_0 = arith.constant 0 : i32
    return %arg0, %c0_i32 : i32, i32
  }
}

module attributes {stable_mosaic.version = 11 : i64} {
  func.func @_matmul_stats_kernel(%arg0: i32, %arg1: memref<128x256xbf16, #tpu.memory_space<vmem>>, %arg2: memref<256x128xbf16, #tpu.memory_space<vmem>>, %arg3: memref<128x128xbf16, #tpu.memory_space<vmem>>, %arg4: memref<8x128xf32, #tpu.memory_space<vmem>>, %arg5: memref<8x128xf32, #tpu.memory_space<vmem>>) attributes {dimension_semantics = [#tpu.dimension_semantics<parallel>], iteration_bounds = array<i64: 1>, scalar_prefetch = 0 : i64, scratch_operands = 0 : i64, tpu.core_type = #tpu.core_type<tc>, window_params = [{transform_indices = @transform_0, window_bounds = array<i64: 128, 256>}, {pipeline_mode = #tpu.pipeline_mode<synchronous>, transform_indices = @transform_1, window_bounds = array<i64: 256, 128>}, {transform_indices = @transform_2, window_bounds = array<i64: 128, 128>}, {transform_indices = @transform_3, window_bounds = array<i64: 8, 128>}, {transform_indices = @transform_4, window_bounds = array<i64: 8, 128>}]} {
    %c0 = arith.constant 0 : index
    %c0_0 = arith.constant 0 : index
    %0 = vector.load %arg1[%c0, %c0_0] : memref<128x256xbf16, #tpu.memory_space<vmem>>, vector<128x256xbf16>
    %c0_1 = arith.constant 0 : index
    %c0_2 = arith.constant 0 : index
    %1 = vector.load %arg2[%c0_1, %c0_2] : memref<256x128xbf16, #tpu.memory_space<vmem>>, vector<256x128xbf16>
    %cst = arith.constant dense<0.000000e+00> : vector<128x128xf32>
    %2 = tpu.matmul %0, %1, %cst {dimension_numbers = #tpu.dot_dimension_numbers<[1], [0], [0], [1], [0, 0, 1, 1], [], []>} : vector<128x256xbf16>, vector<256x128xbf16>, vector<128x128xf32> -> vector<128x128xf32>
    %3 = arith.truncf %2 : vector<128x128xf32> to vector<128x128xbf16>
    %c0_3 = arith.constant 0 : index
    %c0_4 = arith.constant 0 : index
    %4 = vector.load %arg3[%c0_3, %c0_4] : memref<128x128xbf16, #tpu.memory_space<vmem>>, vector<128x128xbf16>
    tpu.vector_store %arg3[%c0_3, %c0_4], %3 {strides = array<i32>} : memref<128x128xbf16, #tpu.memory_space<vmem>>, vector<128x128xbf16>,
    %cst_5 = arith.constant dense<0.000000e+00> : vector<128xf32>
    %5 = vector.multi_reduction <add>, %2, %cst_5 [0] : vector<128x128xf32> to vector<128xf32>
    %6 = vector.shape_cast %5 : vector<128xf32> to vector<1x128xf32>
    %7 = arith.mulf %2, %2 : vector<128x128xf32>
    %cst_6 = arith.constant dense<0.000000e+00> : vector<128xf32>
    %8 = vector.multi_reduction <add>, %7, %cst_6 [0] : vector<128x128xf32> to vector<128xf32>
    %9 = vector.shape_cast %8 : vector<128xf32> to vector<1x128xf32>
    %10 = vector.shape_cast %6 : vector<1x128xf32> to vector<1x128xf32>
    %11 = vector.broadcast %10 : vector<1x128xf32> to vector<8x128xf32>
    %c0_7 = arith.constant 0 : index
    %c0_8 = arith.constant 0 : index
    %12 = vector.load %arg4[%c0_7, %c0_8] : memref<8x128xf32, #tpu.memory_space<vmem>>, vector<8x128xf32>
    tpu.vector_store %arg4[%c0_7, %c0_8], %11 {strides = array<i32>} : memref<8x128xf32, #tpu.memory_space<vmem>>, vector<8x128xf32>,
    %13 = vector.shape_cast %9 : vector<1x128xf32> to vector<1x128xf32>
    %14 = vector.broadcast %13 : vector<1x128xf32> to vector<8x128xf32>
    %c0_9 = arith.constant 0 : index
    %c0_10 = arith.constant 0 : index
    %15 = vector.load %arg5[%c0_9, %c0_10] : memref<8x128xf32, #tpu.memory_space<vmem>>, vector<8x128xf32>
    tpu.vector_store %arg5[%c0_9, %c0_10], %14 {strides = array<i32>} : memref<8x128xf32, #tpu.memory_space<vmem>>, vector<8x128xf32>,
    return
  }
  func.func @transform_0(%arg0: i32) -> (i32, i32) {
    %c0_i32 = arith.constant 0 : i32
    %c0_i32_0 = arith.constant 0 : i32
    return %arg0, %c0_i32 : i32, i32
  }
  func.func @transform_1(%arg0: i32) -> (i32, i32) {
    %c0_i32 = arith.constant 0 : i32
    %c0_i32_0 = arith.constant 0 : i32
    %c0_i32_1 = arith.constant 0 : i32
    return %c0_i32, %c0_i32_0 : i32, i32
  }
  func.func @transform_2(%arg0: i32) -> (i32, i32) {
    %c0_i32 = arith.constant 0 : i32
    %c0_i32_0 = arith.constant 0 : i32
    return %arg0, %c0_i32 : i32, i32
  }
  func.func @transform_3(%arg0: i32) -> (i32, i32) {
    %c0_i32 = arith.constant 0 : i32
    %c0_i32_0 = arith.constant 0 : i32
    return %arg0, %c0_i32 : i32, i32
  }
  func.func @transform_4(%arg0: i32) -> (i32, i32) {
    %c0_i32 = arith.constant 0 : i32
    %c0_i32_0 = arith.constant 0 : i32
    return %arg0, %c0_i32 : i32, i32
  }
}

module attributes {stable_mosaic.version = 11 : i64} {
  func.func @_scale_shift_lrelu_kernel(%arg0: i32, %arg1: memref<128x128xbf16, #tpu.memory_space<vmem>>, %arg2: memref<1x128xf32, #tpu.memory_space<vmem>>, %arg3: memref<1x128xf32, #tpu.memory_space<vmem>>, %arg4: memref<128x128xbf16, #tpu.memory_space<vmem>>) attributes {dimension_semantics = [#tpu.dimension_semantics<parallel>], iteration_bounds = array<i64: 1>, scalar_prefetch = 0 : i64, scratch_operands = 0 : i64, tpu.core_type = #tpu.core_type<tc>, window_params = [{transform_indices = @transform_0, window_bounds = array<i64: 128, 128>}, {pipeline_mode = #tpu.pipeline_mode<synchronous>, transform_indices = @transform_1, window_bounds = array<i64: 1, 128>}, {pipeline_mode = #tpu.pipeline_mode<synchronous>, transform_indices = @transform_2, window_bounds = array<i64: 1, 128>}, {transform_indices = @transform_3, window_bounds = array<i64: 128, 128>}]} {
    %c0 = arith.constant 0 : index
    %c0_0 = arith.constant 0 : index
    %0 = vector.load %arg1[%c0, %c0_0] : memref<128x128xbf16, #tpu.memory_space<vmem>>, vector<128x128xbf16>
    %1 = arith.extf %0 : vector<128x128xbf16> to vector<128x128xf32>
    %c0_1 = arith.constant 0 : index
    %c0_2 = arith.constant 0 : index
    %2 = vector.load %arg2[%c0_1, %c0_2] : memref<1x128xf32, #tpu.memory_space<vmem>>, vector<1x128xf32>
    %3 = vector.broadcast %2 : vector<1x128xf32> to vector<128x128xf32>
    %4 = arith.mulf %1, %3 : vector<128x128xf32>
    %c0_3 = arith.constant 0 : index
    %c0_4 = arith.constant 0 : index
    %5 = vector.load %arg3[%c0_3, %c0_4] : memref<1x128xf32, #tpu.memory_space<vmem>>, vector<1x128xf32>
    %6 = vector.broadcast %5 : vector<1x128xf32> to vector<128x128xf32>
    %7 = arith.addf %4, %6 : vector<128x128xf32>
    %cst = arith.constant 0.000000e+00 : f32
    %8 = vector.broadcast %cst : f32 to vector<128x128xf32>
    %9 = arith.cmpf oge, %7, %8 : vector<128x128xf32>
    %cst_5 = arith.constant 2.000000e-01 : f32
    %10 = vector.broadcast %cst_5 : f32 to vector<128x128xf32>
    %11 = arith.mulf %10, %7 : vector<128x128xf32>
    %12 = arith.select %9, %7, %11 : vector<128x128xi1>, vector<128x128xf32>
    %13 = arith.truncf %12 : vector<128x128xf32> to vector<128x128xbf16>
    %c0_6 = arith.constant 0 : index
    %c0_7 = arith.constant 0 : index
    %14 = vector.load %arg4[%c0_6, %c0_7] : memref<128x128xbf16, #tpu.memory_space<vmem>>, vector<128x128xbf16>
    tpu.vector_store %arg4[%c0_6, %c0_7], %13 {strides = array<i32>} : memref<128x128xbf16, #tpu.memory_space<vmem>>, vector<128x128xbf16>,
    return
  }
  func.func @transform_0(%arg0: i32) -> (i32, i32) {
    %c0_i32 = arith.constant 0 : i32
    %c0_i32_0 = arith.constant 0 : i32
    return %arg0, %c0_i32 : i32, i32
  }
  func.func @transform_1(%arg0: i32) -> (i32, i32) {
    %c0_i32 = arith.constant 0 : i32
    %c0_i32_0 = arith.constant 0 : i32
    %c0_i32_1 = arith.constant 0 : i32
    return %c0_i32, %c0_i32_0 : i32, i32
  }
  func.func @transform_2(%arg0: i32) -> (i32, i32) {
    %c0_i32 = arith.constant 0 : i32
    %c0_i32_0 = arith.constant 0 : i32
    %c0_i32_1 = arith.constant 0 : i32
    return %c0_i32, %c0_i32_0 : i32, i32
  }
  func.func @transform_3(%arg0: i32) -> (i32, i32) {
    %c0_i32 = arith.constant 0 : i32
    %c0_i32_0 = arith.constant 0 : i32
    return %arg0, %c0_i32 : i32, i32
  }
}

module attributes {stable_mosaic.version = 11 : i64} {
  func.func @_matmul_stats_kernel(%arg0: i32, %arg1: memref<32x512xbf16, #tpu.memory_space<vmem>>, %arg2: memref<512x128xbf16, #tpu.memory_space<vmem>>, %arg3: memref<32x128xbf16, #tpu.memory_space<vmem>>, %arg4: memref<8x128xf32, #tpu.memory_space<vmem>>, %arg5: memref<8x128xf32, #tpu.memory_space<vmem>>) attributes {dimension_semantics = [#tpu.dimension_semantics<parallel>], iteration_bounds = array<i64: 1>, scalar_prefetch = 0 : i64, scratch_operands = 0 : i64, tpu.core_type = #tpu.core_type<tc>, window_params = [{transform_indices = @transform_0, window_bounds = array<i64: 32, 512>}, {pipeline_mode = #tpu.pipeline_mode<synchronous>, transform_indices = @transform_1, window_bounds = array<i64: 512, 128>}, {transform_indices = @transform_2, window_bounds = array<i64: 32, 128>}, {transform_indices = @transform_3, window_bounds = array<i64: 8, 128>}, {transform_indices = @transform_4, window_bounds = array<i64: 8, 128>}]} {
    %c0 = arith.constant 0 : index
    %c0_0 = arith.constant 0 : index
    %0 = vector.load %arg1[%c0, %c0_0] : memref<32x512xbf16, #tpu.memory_space<vmem>>, vector<32x512xbf16>
    %c0_1 = arith.constant 0 : index
    %c0_2 = arith.constant 0 : index
    %1 = vector.load %arg2[%c0_1, %c0_2] : memref<512x128xbf16, #tpu.memory_space<vmem>>, vector<512x128xbf16>
    %cst = arith.constant dense<0.000000e+00> : vector<32x128xf32>
    %2 = tpu.matmul %0, %1, %cst {dimension_numbers = #tpu.dot_dimension_numbers<[1], [0], [0], [1], [0, 0, 1, 1], [], []>} : vector<32x512xbf16>, vector<512x128xbf16>, vector<32x128xf32> -> vector<32x128xf32>
    %3 = arith.truncf %2 : vector<32x128xf32> to vector<32x128xbf16>
    %c0_3 = arith.constant 0 : index
    %c0_4 = arith.constant 0 : index
    %4 = vector.load %arg3[%c0_3, %c0_4] : memref<32x128xbf16, #tpu.memory_space<vmem>>, vector<32x128xbf16>
    tpu.vector_store %arg3[%c0_3, %c0_4], %3 {strides = array<i32>} : memref<32x128xbf16, #tpu.memory_space<vmem>>, vector<32x128xbf16>,
    %cst_5 = arith.constant dense<0.000000e+00> : vector<128xf32>
    %5 = vector.multi_reduction <add>, %2, %cst_5 [0] : vector<32x128xf32> to vector<128xf32>
    %6 = vector.shape_cast %5 : vector<128xf32> to vector<1x128xf32>
    %7 = arith.mulf %2, %2 : vector<32x128xf32>
    %cst_6 = arith.constant dense<0.000000e+00> : vector<128xf32>
    %8 = vector.multi_reduction <add>, %7, %cst_6 [0] : vector<32x128xf32> to vector<128xf32>
    %9 = vector.shape_cast %8 : vector<128xf32> to vector<1x128xf32>
    %10 = vector.shape_cast %6 : vector<1x128xf32> to vector<1x128xf32>
    %11 = vector.broadcast %10 : vector<1x128xf32> to vector<8x128xf32>
    %c0_7 = arith.constant 0 : index
    %c0_8 = arith.constant 0 : index
    %12 = vector.load %arg4[%c0_7, %c0_8] : memref<8x128xf32, #tpu.memory_space<vmem>>, vector<8x128xf32>
    tpu.vector_store %arg4[%c0_7, %c0_8], %11 {strides = array<i32>} : memref<8x128xf32, #tpu.memory_space<vmem>>, vector<8x128xf32>,
    %13 = vector.shape_cast %9 : vector<1x128xf32> to vector<1x128xf32>
    %14 = vector.broadcast %13 : vector<1x128xf32> to vector<8x128xf32>
    %c0_9 = arith.constant 0 : index
    %c0_10 = arith.constant 0 : index
    %15 = vector.load %arg5[%c0_9, %c0_10] : memref<8x128xf32, #tpu.memory_space<vmem>>, vector<8x128xf32>
    tpu.vector_store %arg5[%c0_9, %c0_10], %14 {strides = array<i32>} : memref<8x128xf32, #tpu.memory_space<vmem>>, vector<8x128xf32>,
    return
  }
  func.func @transform_0(%arg0: i32) -> (i32, i32) {
    %c0_i32 = arith.constant 0 : i32
    %c0_i32_0 = arith.constant 0 : i32
    return %arg0, %c0_i32 : i32, i32
  }
  func.func @transform_1(%arg0: i32) -> (i32, i32) {
    %c0_i32 = arith.constant 0 : i32
    %c0_i32_0 = arith.constant 0 : i32
    %c0_i32_1 = arith.constant 0 : i32
    return %c0_i32, %c0_i32_0 : i32, i32
  }
  func.func @transform_2(%arg0: i32) -> (i32, i32) {
    %c0_i32 = arith.constant 0 : i32
    %c0_i32_0 = arith.constant 0 : i32
    return %arg0, %c0_i32 : i32, i32
  }
  func.func @transform_3(%arg0: i32) -> (i32, i32) {
    %c0_i32 = arith.constant 0 : i32
    %c0_i32_0 = arith.constant 0 : i32
    return %arg0, %c0_i32 : i32, i32
  }
  func.func @transform_4(%arg0: i32) -> (i32, i32) {
    %c0_i32 = arith.constant 0 : i32
    %c0_i32_0 = arith.constant 0 : i32
    return %arg0, %c0_i32 : i32, i32
  }
}

module attributes {stable_mosaic.version = 11 : i64} {
  func.func @_scale_shift_lrelu_kernel(%arg0: i32, %arg1: memref<32x128xbf16, #tpu.memory_space<vmem>>, %arg2: memref<1x128xf32, #tpu.memory_space<vmem>>, %arg3: memref<1x128xf32, #tpu.memory_space<vmem>>, %arg4: memref<32x128xbf16, #tpu.memory_space<vmem>>) attributes {dimension_semantics = [#tpu.dimension_semantics<parallel>], iteration_bounds = array<i64: 1>, scalar_prefetch = 0 : i64, scratch_operands = 0 : i64, tpu.core_type = #tpu.core_type<tc>, window_params = [{transform_indices = @transform_0, window_bounds = array<i64: 32, 128>}, {pipeline_mode = #tpu.pipeline_mode<synchronous>, transform_indices = @transform_1, window_bounds = array<i64: 1, 128>}, {pipeline_mode = #tpu.pipeline_mode<synchronous>, transform_indices = @transform_2, window_bounds = array<i64: 1, 128>}, {transform_indices = @transform_3, window_bounds = array<i64: 32, 128>}]} {
    %c0 = arith.constant 0 : index
    %c0_0 = arith.constant 0 : index
    %0 = vector.load %arg1[%c0, %c0_0] : memref<32x128xbf16, #tpu.memory_space<vmem>>, vector<32x128xbf16>
    %1 = arith.extf %0 : vector<32x128xbf16> to vector<32x128xf32>
    %c0_1 = arith.constant 0 : index
    %c0_2 = arith.constant 0 : index
    %2 = vector.load %arg2[%c0_1, %c0_2] : memref<1x128xf32, #tpu.memory_space<vmem>>, vector<1x128xf32>
    %3 = vector.broadcast %2 : vector<1x128xf32> to vector<32x128xf32>
    %4 = arith.mulf %1, %3 : vector<32x128xf32>
    %c0_3 = arith.constant 0 : index
    %c0_4 = arith.constant 0 : index
    %5 = vector.load %arg3[%c0_3, %c0_4] : memref<1x128xf32, #tpu.memory_space<vmem>>, vector<1x128xf32>
    %6 = vector.broadcast %5 : vector<1x128xf32> to vector<32x128xf32>
    %7 = arith.addf %4, %6 : vector<32x128xf32>
    %cst = arith.constant 0.000000e+00 : f32
    %8 = vector.broadcast %cst : f32 to vector<32x128xf32>
    %9 = arith.cmpf oge, %7, %8 : vector<32x128xf32>
    %cst_5 = arith.constant 2.000000e-01 : f32
    %10 = vector.broadcast %cst_5 : f32 to vector<32x128xf32>
    %11 = arith.mulf %10, %7 : vector<32x128xf32>
    %12 = arith.select %9, %7, %11 : vector<32x128xi1>, vector<32x128xf32>
    %13 = arith.truncf %12 : vector<32x128xf32> to vector<32x128xbf16>
    %c0_6 = arith.constant 0 : index
    %c0_7 = arith.constant 0 : index
    %14 = vector.load %arg4[%c0_6, %c0_7] : memref<32x128xbf16, #tpu.memory_space<vmem>>, vector<32x128xbf16>
    tpu.vector_store %arg4[%c0_6, %c0_7], %13 {strides = array<i32>} : memref<32x128xbf16, #tpu.memory_space<vmem>>, vector<32x128xbf16>,
    return
  }
  func.func @transform_0(%arg0: i32) -> (i32, i32) {
    %c0_i32 = arith.constant 0 : i32
    %c0_i32_0 = arith.constant 0 : i32
    return %arg0, %c0_i32 : i32, i32
  }
  func.func @transform_1(%arg0: i32) -> (i32, i32) {
    %c0_i32 = arith.constant 0 : i32
    %c0_i32_0 = arith.constant 0 : i32
    %c0_i32_1 = arith.constant 0 : i32
    return %c0_i32, %c0_i32_0 : i32, i32
  }
  func.func @transform_2(%arg0: i32) -> (i32, i32) {
    %c0_i32 = arith.constant 0 : i32
    %c0_i32_0 = arith.constant 0 : i32
    %c0_i32_1 = arith.constant 0 : i32
    return %c0_i32, %c0_i32_0 : i32, i32
  }
  func.func @transform_3(%arg0: i32) -> (i32, i32) {
    %c0_i32 = arith.constant 0 : i32
    %c0_i32_0 = arith.constant 0 : i32
    return %arg0, %c0_i32 : i32, i32
  }
}

</mosaic_0001>

<bundles_post_ra>
// kernel: _forward_impl.7
= control target key start
LH: loop header
LB: loop body
LE: loop exit
PB: predicated region body
PF: predicated region fallthrough
CT: control target
= control target key end

     0   :  { %s3535_s12 = smov 0   ;;  %s3972_s0 = inlined_call_operand.vmem [shape: bf16[2048,16], index: 0, kind: input, shape index: {}]   ;;  %s3973_s1 = inlined_call_operand.vmem [shape: bf16[16,128], index: 1, kind: input, shape index: {}]   ;;  %s3974_s2 = inlined_call_operand.vmem [shape: f32[1,128], index: 2, kind: input, shape index: {}]   ;;  %s3975_s3 = inlined_call_operand.vmem [shape: bf16[2048,128], index: 3, kind: output, shape index: {}]  }
   0x1 LB: > { %s2456_s13 = sadd.s32 4294967295, %s3513_s12   ;;  %p2460_p0 = scmp.ge.s32.totalorder %s3513_s12, 1  ;;  %s3513_s12 = sphi %s3535_s12, %s13_s12  }
   0x2   : > { %p138_p1 = scmp.lt.s32.totalorder %s3513_s12, 3 }
   0x4   : > { %p139_p2 = pnand %p2460_p0, %p138_p1 }
   0x5   : > { %s2461_s16 = sshll.u32 (!%p139_p2), %s2456_s13, 7 }
   0x6   : > { %142 = sbr.rel (%p139_p2) target bundleno = 360 (0x168), region = 32  ;;  %p163_p3 = scmp.lt.s32.totalorder (!%p139_p2), %s2461_s16, 255 }
   0xb   : > { %v3441_v0 = vld [vmem:[%s3973_s1] sm:$0xff]   ;;  %s3977_s16 = smov (!%p163_p3, %s2461_s16), 255  ;;  %vm638_vm0 = vcmask 130048  }
   0xc   : > { %3301 = vmatprep.subr.bf16.mxu0 %v3441_v0  ;;  %3431 = vmatprep.subr.bf16.mxu1 %v3441_v0  ;;  %s2462_s17 = sshll.u32 %s3977_s16, 2 }
   0xd   : > { %3302 = vmatpush3.bf16.msra.mxu0 %v3441_v0  ;;  %3432 = vmatpush3.bf16.msra.mxu1 %v3441_v0  ;;  %s3554_s20 = scalar_lea.vmem %s3972_s0, %s2462_s17  ;;  %s3702_s25 = scalar_lea.vmem %s3975_s3, %s2462_s17 }
   0xe   : > { %v3442_v1 = vld [vmem:[%s3554_s20] sm:$0xff]   ;;  %v3444_v3 = vld [vmem:[%s3554_s20 + $0x8] sm:$0xff]   ;;  %v3446_v5 = vld [vmem:[%s3554_s20 + $0x10] sm:$0xff]  }
   0xf   : > { %v3443_v2 = vld [vmem:[%s3554_s20 + $0x100] sm:$0xff]   ;;  %3303 = vmatprep.mubr.msk.bf16.mxu0 %vm638_vm0, %v3442_v1  ;;  %v3445_v4 = vld [vmem:[%s3554_s20 + $0x108] sm:$0xff]   ;;  %v3447_v6 = vld [vmem:[%s3554_s20 + $0x110] sm:$0xff]  }
  0x10   : > { %3367 = vmatprep.mubr.msk.bf16.mxu1 %vm638_vm0, %v3443_v2  ;;  %3304 = vmatmul.mubr.msk.bf16.vlgmr.msra.gmra.mxu0 %vm638_vm0, %v3444_v3  ;;  %v3448_v7 = vld [vmem:[%s3554_s20 + $0x18] sm:$0xff]   ;;  %v3450_v9 = vld [vmem:[%s3554_s20 + $0x20] sm:$0xff]   ;;  %v3452_v11 = vld [vmem:[%s3554_s20 + $0x28] sm:$0xff]  }
  0x11   : > { %3368 = vmatmul.mubr.msk.bf16.vlgmr.msra.gmra.mxu1 %vm638_vm0, %v3445_v4  ;;  %3307 = vmatprep.mubr.msk.bf16.mxu0 %vm638_vm0, %v3446_v5  ;;  %v3449_v8 = vld [vmem:[%s3554_s20 + $0x118] sm:$0xff]   ;;  %v3451_v10 = vld [vmem:[%s3554_s20 + $0x120] sm:$0xff]   ;;  %v3453_v12 = vld [vmem:[%s3554_s20 + $0x128] sm:$0xff]  }
  0x12   : > { %3371 = vmatprep.mubr.msk.bf16.mxu1 %vm638_vm0, %v3447_v6  ;;  %v3454_v13 = vld [vmem:[%s3554_s20 + $0x30] sm:$0xff]   ;;  %v3456_v15 = vld [vmem:[%s3554_s20 + $0x38] sm:$0xff]   ;;  %v3458_v17 = vld [vmem:[%s3554_s20 + $0x40] sm:$0xff]  }
  0x13   : > { %v3455_v14 = vld [vmem:[%s3554_s20 + $0x130] sm:$0xff]   ;;  %v3457_v16 = vld [vmem:[%s3554_s20 + $0x138] sm:$0xff]   ;;  %v3459_v18 = vld [vmem:[%s3554_s20 + $0x140] sm:$0xff]  }
  0x14   : > { %v3460_v19 = vld [vmem:[%s3554_s20 + $0x48] sm:$0xff]   ;;  %v3462_v21 = vld [vmem:[%s3554_s20 + $0x50] sm:$0xff]   ;;  %v3464_v23 = vld [vmem:[%s3554_s20 + $0x58] sm:$0xff]  }
  0x15   : > { %v3461_v20 = vld [vmem:[%s3554_s20 + $0x148] sm:$0xff]   ;;  %v3463_v22 = vld [vmem:[%s3554_s20 + $0x150] sm:$0xff]   ;;  %v3465_v24 = vld [vmem:[%s3554_s20 + $0x158] sm:$0xff]  }
  0x16   : > { %v3466_v25 = vld [vmem:[%s3554_s20 + $0x60] sm:$0xff]   ;;  %v3468_v27 = vld [vmem:[%s3554_s20 + $0x68] sm:$0xff]   ;;  %v3470_v29 = vld [vmem:[%s3554_s20 + $0x70] sm:$0xff]  }
  0x17   : > { %v3467_v26 = vld [vmem:[%s3554_s20 + $0x160] sm:$0xff]   ;;  %v3469_v28 = vld [vmem:[%s3554_s20 + $0x168] sm:$0xff]   ;;  %v3471_v30 = vld [vmem:[%s3554_s20 + $0x170] sm:$0xff]  }
  0x18   : > { %3308 = vmatmul.mubr.msk.bf16.gmra.mxu0 %vm638_vm0, %v3448_v7  ;;  %v3472_v31 = vld [vmem:[%s3554_s20 + $0x78] sm:$0xff]   ;;  %v3474_v33 = vld [vmem:[%s3554_s20 + $0x80] sm:$0xff]   ;;  %v3476_v35 = vld [vmem:[%s3554_s20 + $0x88] sm:$0xff]  }
  0x19   : > { %3372 = vmatmul.mubr.msk.bf16.gmra.mxu1 %vm638_vm0, %v3449_v8  ;;  %3311 = vmatprep.mubr.msk.bf16.mxu0 %vm638_vm0, %v3450_v9  ;;  %v3473_v32 = vld [vmem:[%s3554_s20 + $0x178] sm:$0xff]   ;;  %v3475_v34 = vld [vmem:[%s3554_s20 + $0x180] sm:$0xff]   ;;  %v3477_v36 = vld [vmem:[%s3554_s20 + $0x188] sm:$0xff]  }
  0x1a   : > { %3375 = vmatprep.mubr.msk.bf16.mxu1 %vm638_vm0, %v3451_v10  ;;  %v3478_v37 = vld [vmem:[%s3554_s20 + $0x90] sm:$0xff]   ;;  %v3480_v39 = vld [vmem:[%s3554_s20 + $0x98] sm:$0xff]   ;;  %v3482_v41 = vld [vmem:[%s3554_s20 + $0xa0] sm:$0xff]  }
  0x1b   : > { %v3479_v38 = vld [vmem:[%s3554_s20 + $0x190] sm:$0xff]   ;;  %v3481_v40 = vld [vmem:[%s3554_s20 + $0x198] sm:$0xff]   ;;  %v3483_v42 = vld [vmem:[%s3554_s20 + $0x1a0] sm:$0xff]  }
  0x1c   : > { %v3484_v43 = vld [vmem:[%s3554_s20 + $0xa8] sm:$0xff]   ;;  %v3486_v45 = vld [vmem:[%s3554_s20 + $0xb0] sm:$0xff]   ;;  %v3488_v47 = vld [vmem:[%s3554_s20 + $0xb8] sm:$0xff]  }
  0x1d   : > { %v3485_v44 = vld [vmem:[%s3554_s20 + $0x1a8] sm:$0xff]   ;;  %v3487_v46 = vld [vmem:[%s3554_s20 + $0x1b0] sm:$0xff]   ;;  %v3489_v48 = vld [vmem:[%s3554_s20 + $0x1b8] sm:$0xff]  }
  0x1e   : > { %v3490_v49 = vld [vmem:[%s3554_s20 + $0xc0] sm:$0xff]   ;;  %v3492_v51 = vld [vmem:[%s3554_s20 + $0xc8] sm:$0xff]   ;;  %v3494_v53 = vld [vmem:[%s3554_s20 + $0xd0] sm:$0xff]  }
  0x1f   : > { %v3491_v50 = vld [vmem:[%s3554_s20 + $0x1c0] sm:$0xff]   ;;  %v3493_v52 = vld [vmem:[%s3554_s20 + $0x1c8] sm:$0xff]   ;;  %v3495_v54 = vld [vmem:[%s3554_s20 + $0x1d0] sm:$0xff]  }
  0x20   : > { %3312 = vmatmul.mubr.msk.bf16.gmra.mxu0 %vm638_vm0, %v3452_v11  ;;  %v3496_v55 = vld [vmem:[%s3554_s20 + $0xd8] sm:$0xff]   ;;  %v3498_v57 = vld [vmem:[%s3554_s20 + $0xe0] sm:$0xff]   ;;  %v3500_v59 = vld [vmem:[%s3554_s20 + $0xe8] sm:$0xff]  }
  0x21   : > { %3376 = vmatmul.mubr.msk.bf16.gmra.mxu1 %vm638_vm0, %v3453_v12  ;;  %3315 = vmatprep.mubr.msk.bf16.mxu0 %vm638_vm0, %v3454_v13  ;;  %v3497_v56 = vld [vmem:[%s3554_s20 + $0x1d8] sm:$0xff]   ;;  %v3499_v58 = vld [vmem:[%s3554_s20 + $0x1e0] sm:$0xff]   ;;  %v3501_v60 = vld [vmem:[%s3554_s20 + $0x1e8] sm:$0xff]  }
  0x22   : > { %3379 = vmatprep.mubr.msk.bf16.mxu1 %vm638_vm0, %v3455_v14  ;;  %v3502_v61 = vld [vmem:[%s3554_s20 + $0xf0] sm:$0xff]   ;;  %v3504_v63 = vld [vmem:[%s3554_s20 + $0xf8] sm:$0xff]   ;;  %v3687_v1 = vld [vmem:[%s3974_s2] ss:$0 sm:$0xff] }
  0x23   : > { %v3503_v62 = vld [vmem:[%s3554_s20 + $0x1f0] sm:$0xff]   ;;  %v3505_v0 = vld [vmem:[%s3554_s20 + $0x1f8] sm:$0xff]  }
  0x28   : > { %3316 = vmatmul.mubr.msk.bf16.gmra.mxu0 %vm638_vm0, %v3456_v15 }
  0x29   : > { %3380 = vmatmul.mubr.msk.bf16.gmra.mxu1 %vm638_vm0, %v3457_v16  ;;  %3319 = vmatprep.mubr.msk.bf16.mxu0 %vm638_vm0, %v3458_v17 }
  0x2a   : > { %3383 = vmatprep.mubr.msk.bf16.mxu1 %vm638_vm0, %v3459_v18 }
  0x30   : > { %3320 = vmatmul.mubr.msk.bf16.gmra.mxu0 %vm638_vm0, %v3460_v19 }
  0x31   : > { %3384 = vmatmul.mubr.msk.bf16.gmra.mxu1 %vm638_vm0, %v3461_v20  ;;  %3323 = vmatprep.mubr.msk.bf16.mxu0 %vm638_vm0, %v3462_v21 }
  0x32   : > { %3387 = vmatprep.mubr.msk.bf16.mxu1 %vm638_vm0, %v3463_v22 }
  0x38   : > { %3324 = vmatmul.mubr.msk.bf16.gmra.mxu0 %vm638_vm0, %v3464_v23 }
  0x39   : > { %3388 = vmatmul.mubr.msk.bf16.gmra.mxu1 %vm638_vm0, %v3465_v24  ;;  %3327 = vmatprep.mubr.msk.bf16.mxu0 %vm638_vm0, %v3466_v25 }
  0x3a   : > { %3391 = vmatprep.mubr.msk.bf16.mxu1 %vm638_vm0, %v3467_v26 }
  0x40   : > { %3328 = vmatmul.mubr.msk.bf16.gmra.mxu0 %vm638_vm0, %v3468_v27 }
  0x41   : > { %3392 = vmatmul.mubr.msk.bf16.gmra.mxu1 %vm638_vm0, %v3469_v28  ;;  %3331 = vmatprep.mubr.msk.bf16.mxu0 %vm638_vm0, %v3470_v29 }
  0x42   : > { %3395 = vmatprep.mubr.msk.bf16.mxu1 %vm638_vm0, %v3471_v30 }
  0x48   : > { %3332 = vmatmul.mubr.msk.bf16.gmra.mxu0 %vm638_vm0, %v3472_v31 }
  0x49   : > { %3396 = vmatmul.mubr.msk.bf16.gmra.mxu1 %vm638_vm0, %v3473_v32  ;;  %3335 = vmatprep.mubr.msk.bf16.mxu0 %vm638_vm0, %v3474_v33 }
  0x4a   : > { %3399 = vmatprep.mubr.msk.bf16.mxu1 %vm638_vm0, %v3475_v34 }
  0x50   : > { %3336 = vmatmul.mubr.msk.bf16.gmra.mxu0 %vm638_vm0, %v3476_v35 }
  0x51   : > { %3400 = vmatmul.mubr.msk.bf16.gmra.mxu1 %vm638_vm0, %v3477_v36  ;;  %3339 = vmatprep.mubr.msk.bf16.mxu0 %vm638_vm0, %v3478_v37 }
  0x52   : > { %3403 = vmatprep.mubr.msk.bf16.mxu1 %vm638_vm0, %v3479_v38 }
  0x58   : > { %3340 = vmatmul.mubr.msk.bf16.gmra.mxu0 %vm638_vm0, %v3480_v39 }
  0x59   : > { %3404 = vmatmul.mubr.msk.bf16.gmra.mxu1 %vm638_vm0, %v3481_v40  ;;  %3343 = vmatprep.mubr.msk.bf16.mxu0 %vm638_vm0, %v3482_v41 }
  0x5a   : > { %3407 = vmatprep.mubr.msk.bf16.mxu1 %vm638_vm0, %v3483_v42 }
  0x60   : > { %3344 = vmatmul.mubr.msk.bf16.gmra.mxu0 %vm638_vm0, %v3484_v43 }
  0x61   : > { %3408 = vmatmul.mubr.msk.bf16.gmra.mxu1 %vm638_vm0, %v3485_v44  ;;  %3347 = vmatprep.mubr.msk.bf16.mxu0 %vm638_vm0, %v3486_v45 }
  0x62   : > { %3411 = vmatprep.mubr.msk.bf16.mxu1 %vm638_vm0, %v3487_v46 }
  0x68   : > { %3348 = vmatmul.mubr.msk.bf16.gmra.mxu0 %vm638_vm0, %v3488_v47 }
  0x69   : > { %3412 = vmatmul.mubr.msk.bf16.gmra.mxu1 %vm638_vm0, %v3489_v48  ;;  %3351 = vmatprep.mubr.msk.bf16.mxu0 %vm638_vm0, %v3490_v49 }
  0x6a   : > { %3415 = vmatprep.mubr.msk.bf16.mxu1 %vm638_vm0, %v3491_v50 }
  0x70   : > { %3352 = vmatmul.mubr.msk.bf16.gmra.mxu0 %vm638_vm0, %v3492_v51 }
  0x71   : > { %3416 = vmatmul.mubr.msk.bf16.gmra.mxu1 %vm638_vm0, %v3493_v52  ;;  %3355 = vmatprep.mubr.msk.bf16.mxu0 %vm638_vm0, %v3494_v53 }
  0x72   : > { %3419 = vmatprep.mubr.msk.bf16.mxu1 %vm638_vm0, %v3495_v54 }
  0x78   : > { %3356 = vmatmul.mubr.msk.bf16.gmra.mxu0 %vm638_vm0, %v3496_v55 }
  0x79   : > { %3420 = vmatmul.mubr.msk.bf16.gmra.mxu1 %vm638_vm0, %v3497_v56  ;;  %3359 = vmatprep.mubr.msk.bf16.mxu0 %vm638_vm0, %v3498_v57 }
  0x7a   : > { %3423 = vmatprep.mubr.msk.bf16.mxu1 %vm638_vm0, %v3499_v58 }
  0x80   : > { %3360 = vmatmul.mubr.msk.bf16.gmra.mxu0 %vm638_vm0, %v3500_v59 }
  0x81   : > { %3424 = vmatmul.mubr.msk.bf16.gmra.mxu1 %vm638_vm0, %v3501_v60  ;;  %3363 = vmatprep.mubr.msk.bf16.mxu0 %vm638_vm0, %v3502_v61 }
  0x82   : > { %3427 = vmatprep.mubr.msk.bf16.mxu1 %vm638_vm0, %v3503_v62 }
  0x88   : > { %3364 = vmatmul.mubr.msk.bf16.gmra.mxu0 %vm638_vm0, %v3504_v63 }
  0x89   : > { %3428 = vmatmul.mubr.msk.bf16.gmra.mxu1 %vm638_vm0, %v3505_v0 }
  0xd0   : > { %v3305_v2 = vpop.f32.mrf.mxu0 }
  0xd1   : > { %v874_v3 = vadd.f32 %v3305_v2, %v3687_v1  ;;  %v3369_v4 = vpop.f32.mrf.mxu1 }
  0xd2   : > { %v1130_v5 = vadd.f32 %v3369_v4, %v3687_v1  ;;  %v865_v6 = vpop.f32.mrf.mxu0 }
  0xd3   : > { %vm1378_vm1 = vcmp.ge.f32.partialorder %v874_v3, 0.0  ;;  %v1506_v7 = vmul.f32 0.2, %v874_v3  ;;  %v866_v8 = vadd.f32 %v3687_v1, %v865_v6  ;;  %v1121_v9 = vpop.f32.mrf.mxu1 }
  0xd4   : > { %vm1442_vm2 = vcmp.ge.f32.partialorder %v1130_v5, 0.0  ;;  %v1570_v10 = vmul.f32 0.2, %v1130_v5  ;;  %v1122_v11 = vadd.f32 %v3687_v1, %v1121_v9  ;;  %v3306_v12 = vpop.f32.mrf.mxu0 }
  0xd5   : > { %v1634_v13 = vsel %vm1378_vm1, %v874_v3, %v1506_v7  ;;  %vm1376_vm3 = vcmp.ge.f32.partialorder %v866_v8, 0.0  ;;  %v1504_v14 = vmul.f32 0.2, %v866_v8  ;;  %v877_v15 = vadd.f32 %v3306_v12, %v3687_v1  ;;  %v3370_v16 = vpop.f32.mrf.mxu1 }
  0xd6   : > { %v1698_v17 = vsel %vm1442_vm2, %v1130_v5, %v1570_v10  ;;  %vm1440_vm4 = vcmp.ge.f32.partialorder %v1122_v11, 0.0  ;;  %v1568_v18 = vmul.f32 0.2, %v1122_v11  ;;  %v1133_v19 = vadd.f32 %v3370_v16, %v3687_v1  ;;  %v868_v20 = vpop.f32.mrf.mxu0 }
  0xd7   : > { %v1632_v21 = vsel %vm1376_vm3, %v866_v8, %v1504_v14  ;;  %vm1379_vm5 = vcmp.ge.f32.partialorder %v877_v15, 0.0  ;;  %v1507_v22 = vmul.f32 0.2, %v877_v15  ;;  %v869_v23 = vadd.f32 %v3687_v1, %v868_v20  ;;  %v1124_v24 = vpop.f32.mrf.mxu1 }
  0xd8   : > { %v1696_v25 = vsel %vm1440_vm4, %v1122_v11, %v1568_v18  ;;  %vm1443_vm6 = vcmp.ge.f32.partialorder %v1133_v19, 0.0  ;;  %v1571_v26 = vmul.f32 0.2, %v1133_v19  ;;  %v1125_v27 = vadd.f32 %v3687_v1, %v1124_v24  ;;  %v3309_v28 = vpop.f32.mrf.mxu0 }
  0xd9   : > { %v1635_v29 = vsel %vm1379_vm5, %v877_v15, %v1507_v22  ;;  %vm1377_vm7 = vcmp.ge.f32.partialorder %v869_v23, 0.0  ;;  %v1505_v30 = vmul.f32 0.2, %v869_v23  ;;  %v890_v31 = vadd.f32 %v3309_v28, %v3687_v1  ;;  %v3373_v32 = vpop.f32.mrf.mxu1 }
  0xda   : > { %v2861_v33 = vpack.c.bf16 %v1635_v29, %v1634_v13  ;;  %v1699_v34 = vsel %vm1443_vm6, %v1133_v19, %v1571_v26  ;;  %vm1441_vm8 = vcmp.ge.f32.partialorder %v1125_v27, 0.0  ;;  %v1569_v35 = vmul.f32 0.2, %v1125_v27  ;;  %v881_v36 = vpop.f32.mrf.mxu0 }
  0xdb   : > { %v3021_v37 = vpack.c.bf16 %v1699_v34, %v1698_v17  ;;  %v1633_v38 = vsel %vm1377_vm7, %v869_v23, %v1505_v30  ;;  %vm1382_vm9 = vcmp.ge.f32.partialorder %v890_v31, 0.0  ;;  %v1510_v39 = vmul.f32 0.2, %v890_v31  ;;  %v1137_v40 = vpop.f32.mrf.mxu1 }
  0xdc   : > { %3173 = vst [vmem:[%s3702_s25 + $0x8] sm:$0xff] %v2861_v33   ;;  %v2856_v41 = vpack.c.bf16 %v1633_v38, %v1632_v21  ;;  %v1697_v42 = vsel %vm1441_vm8, %v1125_v27, %v1569_v35  ;;  %v1146_v43 = vadd.f32 %v3373_v32, %v3687_v1  ;;  %v882_v44 = vadd.f32 %v3687_v1, %v881_v36  ;;  %v3310_v45 = vpop.f32.mrf.mxu0 }
  0xdd   : > { %3205 = vst [vmem:[%s3702_s25 + $0x108] sm:$0xff] %v3021_v37   ;;  %v3016_v46 = vpack.c.bf16 %v1697_v42, %v1696_v25  ;;  %v1638_v47 = vsel %vm1382_vm9, %v890_v31, %v1510_v39  ;;  %v1138_v48 = vadd.f32 %v3687_v1, %v1137_v40  ;;  %v893_v49 = vadd.f32 %v3310_v45, %v3687_v1  ;;  %v3374_v50 = vpop.f32.mrf.mxu1 }
  0xde   : > { %2857 = vst [vmem:[%s3702_s25] sm:$0xff] %v2856_v41   ;;  %vm1446_vm10 = vcmp.ge.f32.partialorder %v1146_v43, 0.0  ;;  %v1574_v51 = vmul.f32 0.2, %v1146_v43  ;;  %vm1380_vm11 = vcmp.ge.f32.partialorder %v882_v44, 0.0  ;;  %v1508_v52 = vmul.f32 0.2, %v882_v44  ;;  %v884_v53 = vpop.f32.mrf.mxu0 }
  0xdf   : > { %3204 = vst [vmem:[%s3702_s25 + $0x100] sm:$0xff] %v3016_v46   ;;  %vm1444_vm12 = vcmp.ge.f32.partialorder %v1138_v48, 0.0  ;;  %v1572_v54 = vmul.f32 0.2, %v1138_v48  ;;  %vm1383_vm13 = vcmp.ge.f32.partialorder %v893_v49, 0.0  ;;  %v1140_v56 = vpop.f32.mrf.mxu1  ;;  %v1149_v59 = vadd.f32 %v3374_v50, %v3687_v1 }
  0xe0   : > { %v1511_v55 = vmul.f32 0.2, %v893_v49  ;;  %v1702_v57 = vsel %vm1446_vm10, %v1146_v43, %v1574_v51  ;;  %v1636_v58 = vsel %vm1380_vm11, %v882_v44, %v1508_v52  ;;  %v885_v60 = vadd.f32 %v3687_v1, %v884_v53  ;;  %v3313_v61 = vpop.f32.mrf.mxu0 }
  0xe1   : > { %v1700_v62 = vsel %vm1444_vm12, %v1138_v48, %v1572_v54  ;;  %v1141_v0 = vadd.f32 %v3687_v1, %v1140_v56  ;;  %v906_v2 = vadd.f32 %v3313_v61, %v3687_v1  ;;  %v3377_v3 = vpop.f32.mrf.mxu1  ;;  %vm1447_vm14 = vcmp.ge.f32.partialorder %v1149_v59, 0.0 }
  0xe2   : > { %v1639_v63 = vsel %vm1383_vm13, %v893_v49, %v1511_v55  ;;  %v1575_v5 = vmul.f32 0.2, %v1149_v59  ;;  %vm1381_vm15 = vcmp.ge.f32.partialorder %v885_v60, 0.0  ;;  %v897_v6 = vpop.f32.mrf.mxu0  ;;  %v1509_v7 = vmul.f32 0.2, %v885_v60 }
  0xe3   : > { %v2871_v4 = vpack.c.bf16 %v1639_v63, %v1638_v47  ;;  %vm1445_vm0 = vcmp.ge.f32.partialorder %v1141_v0, 0.0  ;;  %v1573_v8 = vmul.f32 0.2, %v1141_v0  ;;  %vm1386_vm1 = vcmp.ge.f32.partialorder %v906_v2, 0.0  ;;  %v1153_v9 = vpop.f32.mrf.mxu1 }
  0xe4   : > { %v1703_v10 = vsel %vm1447_vm14, %v1149_v59, %v1575_v5  ;;  %v1514_v11 = vmul.f32 0.2, %v906_v2  ;;  %v1162_v12 = vadd.f32 %v3377_v3, %v3687_v1  ;;  %v898_v13 = vadd.f32 %v3687_v1, %v897_v6  ;;  %v3314_v14 = vpop.f32.mrf.mxu0 }
  0xe5   : > { %3175 = vst [vmem:[%s3702_s25 + $0x18] sm:$0xff] %v2871_v4   ;;  %v3031_v15 = vpack.c.bf16 %v1703_v10, %v1702_v57  ;;  %v1637_v16 = vsel %vm1381_vm15, %v885_v60, %v1509_v7  ;;  %v1701_v17 = vsel %vm1445_vm0, %v1141_v0, %v1573_v8  ;;  %v1154_v18 = vadd.f32 %v3687_v1, %v1153_v9  ;;  %v3378_v19 = vpop.f32.mrf.mxu1 }
  0xe6   : > { %v2866_v20 = vpack.c.bf16 %v1637_v16, %v1636_v58  ;;  %v3026_v21 = vpack.c.bf16 %v1701_v17, %v1700_v62  ;;  %v1642_v22 = vsel %vm1386_vm1, %v906_v2, %v1514_v11  ;;  %vm1450_vm2 = vcmp.ge.f32.partialorder %v1162_v12, 0.0  ;;  %v900_v23 = vpop.f32.mrf.mxu0 }
  0xe7   : > { %3207 = vst [vmem:[%s3702_s25 + $0x118] sm:$0xff] %v3031_v15   ;;  %v1578_v24 = vmul.f32 0.2, %v1162_v12  ;;  %vm1384_vm3 = vcmp.ge.f32.partialorder %v898_v13, 0.0  ;;  %v1512_v25 = vmul.f32 0.2, %v898_v13  ;;  %v1156_v26 = vpop.f32.mrf.mxu1  ;;  %v909_v28 = vadd.f32 %v3314_v14, %v3687_v1 }
  0xe8   : > { %vm1448_vm4 = vcmp.ge.f32.partialorder %v1154_v18, 0.0  ;;  %3174 = vst [vmem:[%s3702_s25 + $0x10] sm:$0xff] %v2866_v20   ;;  %3206 = vst [vmem:[%s3702_s25 + $0x110] sm:$0xff] %v3026_v21   ;;  %v1576_v27 = vmul.f32 0.2, %v1154_v18  ;;  %v1165_v29 = vadd.f32 %v3378_v19, %v3687_v1  ;;  %v901_v30 = vadd.f32 %v3687_v1, %v900_v23  ;;  %v3317_v31 = vpop.f32.mrf.mxu0 }
  0xe9   : > { %v1706_v32 = vsel %vm1450_vm2, %v1162_v12, %v1578_v24  ;;  %v1640_v33 = vsel %vm1384_vm3, %v898_v13, %v1512_v25  ;;  %v1157_v34 = vadd.f32 %v3687_v1, %v1156_v26  ;;  %v922_v35 = vadd.f32 %v3317_v31, %v3687_v1  ;;  %v3381_v36 = vpop.f32.mrf.mxu1 }
  0xea   : > { %v1704_v37 = vsel %vm1448_vm4, %v1154_v18, %v1576_v27  ;;  %vm1387_vm5 = vcmp.ge.f32.partialorder %v909_v28, 0.0  ;;  %v1515_v38 = vmul.f32 0.2, %v909_v28  ;;  %vm1451_vm6 = vcmp.ge.f32.partialorder %v1165_v29, 0.0  ;;  %v913_v39 = vpop.f32.mrf.mxu0 }
  0xeb   : > { %v1579_v40 = vmul.f32 0.2, %v1165_v29  ;;  %vm1385_vm7 = vcmp.ge.f32.partialorder %v901_v30, 0.0  ;;  %v1513_v41 = vmul.f32 0.2, %v901_v30  ;;  %vm1449_vm8 = vcmp.ge.f32.partialorder %v1157_v34, 0.0  ;;  %v1169_v42 = vpop.f32.mrf.mxu1 }
  0xec   : > { %v1643_v43 = vsel %vm1387_vm5, %v909_v28, %v1515_v38  ;;  %v1577_v44 = vmul.f32 0.2, %v1157_v34  ;;  %vm1390_vm9 = vcmp.ge.f32.partialorder %v922_v35, 0.0  ;;  %v1518_v45 = vmul.f32 0.2, %v922_v35  ;;  %v3318_v46 = vpop.f32.mrf.mxu0 }
  0xed   : > { %v2881_v47 = vpack.c.bf16 %v1643_v43, %v1642_v22  ;;  %v1707_v48 = vsel %vm1451_vm6, %v1165_v29, %v1579_v40  ;;  %v1641_v49 = vsel %vm1385_vm7, %v901_v30, %v1513_v41  ;;  %v1178_v50 = vadd.f32 %v3381_v36, %v3687_v1  ;;  %v3382_v51 = vpop.f32.mrf.mxu1 }
  0xee   : > { %v3041_v52 = vpack.c.bf16 %v1707_v48, %v1706_v32  ;;  %v2876_v53 = vpack.c.bf16 %v1641_v49, %v1640_v33  ;;  %v1705_v54 = vsel %vm1449_vm8, %v1157_v34, %v1577_v44  ;;  %v1646_v55 = vsel %vm1390_vm9, %v922_v35, %v1518_v45  ;;  %v916_v56 = vpop.f32.mrf.mxu0 }
  0xef   : > { %3177 = vst [vmem:[%s3702_s25 + $0x28] sm:$0xff] %v2881_v47   ;;  %v3036_v57 = vpack.c.bf16 %v1705_v54, %v1704_v37  ;;  %vm1454_vm10 = vcmp.ge.f32.partialorder %v1178_v50, 0.0  ;;  %v1582_v58 = vmul.f32 0.2, %v1178_v50  ;;  %v914_v59 = vadd.f32 %v3687_v1, %v913_v39  ;;  %v1172_v60 = vpop.f32.mrf.mxu1 }
  0xf0   : > { %3209 = vst [vmem:[%s3702_s25 + $0x128] sm:$0xff] %v3041_v52   ;;  %3176 = vst [vmem:[%s3702_s25 + $0x20] sm:$0xff] %v2876_v53   ;;  %v1170_v61 = vadd.f32 %v3687_v1, %v1169_v42  ;;  %v925_v62 = vadd.f32 %v3318_v46, %v3687_v1  ;;  %v1181_v63 = vadd.f32 %v3382_v51, %v3687_v1  ;;  %v3321_v2 = vpop.f32.mrf.mxu0 }
  0xf1   : > { %v917_v0 = vadd.f32 %v3687_v1, %v916_v56  ;;  %3208 = vst [vmem:[%s3702_s25 + $0x120] sm:$0xff] %v3036_v57   ;;  %v1710_v3 = vsel %vm1454_vm10, %v1178_v50, %v1582_v58  ;;  %vm1388_vm11 = vcmp.ge.f32.partialorder %v914_v59, 0.0  ;;  %v1516_v4 = vmul.f32 0.2, %v914_v59  ;;  %v3385_v6 = vpop.f32.mrf.mxu1 }
  0xf2   : > { %v1173_v5 = vadd.f32 %v3687_v1, %v1172_v60  ;;  %vm1452_vm12 = vcmp.ge.f32.partialorder %v1170_v61, 0.0  ;;  %v1580_v7 = vmul.f32 0.2, %v1170_v61  ;;  %vm1391_vm13 = vcmp.ge.f32.partialorder %v925_v62, 0.0  ;;  %v929_v9 = vpop.f32.mrf.mxu0 }
  0xf3   : > { %v1519_v8 = vmul.f32 0.2, %v925_v62  ;;  %v1644_v10 = vsel %vm1388_vm11, %v914_v59, %v1516_v4  ;;  %vm1455_vm14 = vcmp.ge.f32.partialorder %v1181_v63, 0.0  ;;  %v1583_v11 = vmul.f32 0.2, %v1181_v63  ;;  %v1185_v12 = vpop.f32.mrf.mxu1 }
  0xf4   : > { %vm1389_vm15 = vcmp.ge.f32.partialorder %v917_v0, 0.0  ;;  %v1708_v13 = vsel %vm1452_vm12, %v1170_v61, %v1580_v7  ;;  %v1517_v15 = vmul.f32 0.2, %v917_v0  ;;  %vm1453_vm0 = vcmp.ge.f32.partialorder %v1173_v5, 0.0  ;;  %v3322_v16 = vpop.f32.mrf.mxu0 }
  0xf5   : > { %v1647_v14 = vsel %vm1391_vm13, %v925_v62, %v1519_v8  ;;  %v1711_v18 = vsel %vm1455_vm14, %v1181_v63, %v1583_v11  ;;  %v1581_v19 = vmul.f32 0.2, %v1173_v5  ;;  %v938_v20 = vadd.f32 %v3321_v2, %v3687_v1  ;;  %v3386_v21 = vpop.f32.mrf.mxu1 }
  0xf6   : > { %v2891_v17 = vpack.c.bf16 %v1647_v14, %v1646_v55  ;;  %v3051_v22 = vpack.c.bf16 %v1711_v18, %v1710_v3  ;;  %v1645_v23 = vsel %vm1389_vm15, %v917_v0, %v1517_v15  ;;  %v1194_v24 = vadd.f32 %v3385_v6, %v3687_v1  ;;  %v932_v26 = vpop.f32.mrf.mxu0 }
  0xf7   : > { %v930_v25 = vadd.f32 %v3687_v1, %v929_v9  ;;  %v2886_v27 = vpack.c.bf16 %v1645_v23, %v1644_v10  ;;  %v1709_v28 = vsel %vm1453_vm0, %v1173_v5, %v1581_v19  ;;  %vm1394_vm1 = vcmp.ge.f32.partialorder %v938_v20, 0.0  ;;  %v1188_v30 = vpop.f32.mrf.mxu1 }
  0xf8   : > { %3179 = vst [vmem:[%s3702_s25 + $0x38] sm:$0xff] %v2891_v17   ;;  %v1522_v29 = vmul.f32 0.2, %v938_v20  ;;  %3211 = vst [vmem:[%s3702_s25 + $0x138] sm:$0xff] %v3051_v22   ;;  %v3046_v31 = vpack.c.bf16 %v1709_v28, %v1708_v13  ;;  %vm1458_vm2 = vcmp.ge.f32.partialorder %v1194_v24, 0.0  ;;  %v3325_v33 = vpop.f32.mrf.mxu0  ;;  %v1186_v36 = vadd.f32 %v3687_v1, %v1185_v12 }
  0xf9   : > { %v1586_v32 = vmul.f32 0.2, %v1194_v24  ;;  %vm1392_vm3 = vcmp.ge.f32.partialorder %v930_v25, 0.0  ;;  %3178 = vst [vmem:[%s3702_s25 + $0x30] sm:$0xff] %v2886_v27   ;;  %v1520_v35 = vmul.f32 0.2, %v930_v25  ;;  %v941_v37 = vadd.f32 %v3322_v16, %v3687_v1  ;;  %v3389_v38 = vpop.f32.mrf.mxu1 }
  0xfa   : > { %v1650_v34 = vsel %vm1394_vm1, %v938_v20, %v1522_v29  ;;  %3210 = vst [vmem:[%s3702_s25 + $0x130] sm:$0xff] %v3046_v31   ;;  %v1197_v40 = vadd.f32 %v3386_v21, %v3687_v1  ;;  %v933_v41 = vadd.f32 %v3687_v1, %v932_v26  ;;  %v1189_v42 = vadd.f32 %v3687_v1, %v1188_v30  ;;  %v945_v43 = vpop.f32.mrf.mxu0 }
  0xfb   : > { %v1714_v39 = vsel %vm1458_vm2, %v1194_v24, %v1586_v32  ;;  %v1648_v44 = vsel %vm1392_vm3, %v930_v25, %v1520_v35  ;;  %vm1456_vm4 = vcmp.ge.f32.partialorder %v1186_v36, 0.0  ;;  %v1584_v45 = vmul.f32 0.2, %v1186_v36  ;;  %v1201_v46 = vpop.f32.mrf.mxu1 }
  0xfc   : > { %vm1395_vm5 = vcmp.ge.f32.partialorder %v941_v37, 0.0  ;;  %v1523_v47 = vmul.f32 0.2, %v941_v37  ;;  %vm1459_vm6 = vcmp.ge.f32.partialorder %v1197_v40, 0.0  ;;  %v1587_v48 = vmul.f32 0.2, %v1197_v40  ;;  %v3326_v49 = vpop.f32.mrf.mxu0 }
  0xfd   : > { %vm1393_vm7 = vcmp.ge.f32.partialorder %v933_v41, 0.0  ;;  %v1712_v50 = vsel %vm1456_vm4, %v1186_v36, %v1584_v45  ;;  %v1521_v51 = vmul.f32 0.2, %v933_v41  ;;  %vm1457_vm8 = vcmp.ge.f32.partialorder %v1189_v42, 0.0  ;;  %v3390_v53 = vpop.f32.mrf.mxu1 }
  0xfe   : > { %v1585_v52 = vmul.f32 0.2, %v1189_v42  ;;  %v1651_v54 = vsel %vm1395_vm5, %v941_v37, %v1523_v47  ;;  %v1715_v55 = vsel %vm1459_vm6, %v1197_v40, %v1587_v48  ;;  %v954_v56 = vadd.f32 %v3325_v33, %v3687_v1  ;;  %v948_v58 = vpop.f32.mrf.mxu0 }
  0xff   : > { %v1210_v57 = vadd.f32 %v3389_v38, %v3687_v1  ;;  %v2901_v59 = vpack.c.bf16 %v1651_v54, %v1650_v34  ;;  %v3061_v60 = vpack.c.bf16 %v1715_v55, %v1714_v39  ;;  %v1649_v61 = vsel %vm1393_vm7, %v933_v41, %v1521_v51  ;;  %v1204_v63 = vpop.f32.mrf.mxu1 }
 0x100   : > { %v1713_v62 = vsel %vm1457_vm8, %v1189_v42, %v1585_v52  ;;  %v2896_v0 = vpack.c.bf16 %v1649_v61, %v1648_v44  ;;  %vm1398_vm9 = vcmp.ge.f32.partialorder %v954_v56, 0.0  ;;  %v1526_v3 = vmul.f32 0.2, %v954_v56  ;;  %v3329_v4 = vpop.f32.mrf.mxu0 }
 0x101   : > { %v3056_v2 = vpack.c.bf16 %v1713_v62, %v1712_v50  ;;  %3181 = vst [vmem:[%s3702_s25 + $0x48] sm:$0xff] %v2901_v59   ;;  %3213 = vst [vmem:[%s3702_s25 + $0x148] sm:$0xff] %v3061_v60   ;;  %vm1462_vm10 = vcmp.ge.f32.partialorder %v1210_v57, 0.0  ;;  %v1590_v5 = vmul.f32 0.2, %v1210_v57  ;;  %v946_v6 = vadd.f32 %v3687_v1, %v945_v43  ;;  %v3393_v8 = vpop.f32.mrf.mxu1 }
 0x102   : > { %v1202_v7 = vadd.f32 %v3687_v1, %v1201_v46  ;;  %3180 = vst [vmem:[%s3702_s25 + $0x40] sm:$0xff] %v2896_v0   ;;  %v1654_v9 = vsel %vm1398_vm9, %v954_v56, %v1526_v3  ;;  %v957_v10 = vadd.f32 %v3326_v49, %v3687_v1  ;;  %v1213_v11 = vadd.f32 %v3390_v53, %v3687_v1  ;;  %v961_v13 = vpop.f32.mrf.mxu0 }
 0x103   : > { %3212 = vst [vmem:[%s3702_s25 + $0x140] sm:$0xff] %v3056_v2   ;;  %v949_v12 = vadd.f32 %v3687_v1, %v948_v58  ;;  %v1718_v14 = vsel %vm1462_vm10, %v1210_v57, %v1590_v5  ;;  %vm1396_vm11 = vcmp.ge.f32.partialorder %v946_v6, 0.0  ;;  %v1524_v15 = vmul.f32 0.2, %v946_v6  ;;  %v1217_v16 = vpop.f32.mrf.mxu1 }
 0x104   : > { %vm1460_vm12 = vcmp.ge.f32.partialorder %v1202_v7, 0.0  ;;  %v1588_v17 = vmul.f32 0.2, %v1202_v7  ;;  %vm1399_vm13 = vcmp.ge.f32.partialorder %v957_v10, 0.0  ;;  %v1527_v18 = vmul.f32 0.2, %v957_v10  ;;  %v3330_v19 = vpop.f32.mrf.mxu0 }
 0x105   : > { %vm1463_vm14 = vcmp.ge.f32.partialorder %v1213_v11, 0.0  ;;  %v1652_v20 = vsel %vm1396_vm11, %v946_v6, %v1524_v15  ;;  %v1591_v21 = vmul.f32 0.2, %v1213_v11  ;;  %vm1397_vm15 = vcmp.ge.f32.partialorder %v949_v12, 0.0  ;;  %v3394_v23 = vpop.f32.mrf.mxu1 }
 0x106   : > { %v1525_v22 = vmul.f32 0.2, %v949_v12  ;;  %v1716_v24 = vsel %vm1460_vm12, %v1202_v7, %v1588_v17  ;;  %v1655_v25 = vsel %vm1399_vm13, %v957_v10, %v1527_v18  ;;  %v1205_v26 = vadd.f32 %v3687_v1, %v1204_v63  ;;  %v964_v28 = vpop.f32.mrf.mxu0 }
 0x107   : > { %v970_v27 = vadd.f32 %v3329_v4, %v3687_v1  ;;  %v2911_v29 = vpack.c.bf16 %v1655_v25, %v1654_v9  ;;  %v1719_v30 = vsel %vm1463_vm14, %v1213_v11, %v1591_v21  ;;  %v1226_v32 = vadd.f32 %v3393_v8, %v3687_v1  ;;  %v1220_v33 = vpop.f32.mrf.mxu1 }
 0x108   : > { %v1653_v31 = vsel %vm1397_vm15, %v949_v12, %v1525_v22  ;;  %v3071_v34 = vpack.c.bf16 %v1719_v30, %v1718_v14  ;;  %vm1461_vm0 = vcmp.ge.f32.partialorder %v1205_v26, 0.0  ;;  %v1589_v36 = vmul.f32 0.2, %v1205_v26  ;;  %v3333_v37 = vpop.f32.mrf.mxu0 }
 0x109   : > { %v2906_v35 = vpack.c.bf16 %v1653_v31, %v1652_v20  ;;  %3183 = vst [vmem:[%s3702_s25 + $0x58] sm:$0xff] %v2911_v29   ;;  %vm1402_vm1 = vcmp.ge.f32.partialorder %v970_v27, 0.0  ;;  %v1530_v38 = vmul.f32 0.2, %v970_v27  ;;  %vm1466_vm2 = vcmp.ge.f32.partialorder %v1226_v32, 0.0  ;;  %v3397_v40 = vpop.f32.mrf.mxu1 }
 0x10a   : > { %v1594_v39 = vmul.f32 0.2, %v1226_v32  ;;  %3215 = vst [vmem:[%s3702_s25 + $0x158] sm:$0xff] %v3071_v34   ;;  %v1717_v41 = vsel %vm1461_vm0, %v1205_v26, %v1589_v36  ;;  %v962_v42 = vadd.f32 %v3687_v1, %v961_v13  ;;  %v1218_v43 = vadd.f32 %v3687_v1, %v1217_v16  ;;  %v977_v45 = vpop.f32.mrf.mxu0 }
 0x10b   : > { %3182 = vst [vmem:[%s3702_s25 + $0x50] sm:$0xff] %v2906_v35   ;;  %v973_v44 = vadd.f32 %v3330_v19, %v3687_v1  ;;  %v3066_v46 = vpack.c.bf16 %v1717_v41, %v1716_v24  ;;  %v1658_v47 = vsel %vm1402_vm1, %v970_v27, %v1530_v38  ;;  %v1229_v49 = vadd.f32 %v3394_v23, %v3687_v1  ;;  %v1233_v50 = vpop.f32.mrf.mxu1 }
 0x10c   : > { %v1722_v48 = vsel %vm1466_vm2, %v1226_v32, %v1594_v39  ;;  %vm1400_vm3 = vcmp.ge.f32.partialorder %v962_v42, 0.0  ;;  %v1528_v51 = vmul.f32 0.2, %v962_v42  ;;  %vm1464_vm4 = vcmp.ge.f32.partialorder %v1218_v43, 0.0  ;;  %v3334_v53 = vpop.f32.mrf.mxu0 }
 0x10d   : > { %v1592_v52 = vmul.f32 0.2, %v1218_v43  ;;  %3214 = vst [vmem:[%s3702_s25 + $0x150] sm:$0xff] %v3066_v46   ;;  %vm1403_vm5 = vcmp.ge.f32.partialorder %v973_v44, 0.0  ;;  %v1531_v54 = vmul.f32 0.2, %v973_v44  ;;  %v3398_v56 = vpop.f32.mrf.mxu1  ;;  %v965_v59 = vadd.f32 %v3687_v1, %v964_v28 }
 0x10e   : > { %vm1467_vm6 = vcmp.ge.f32.partialorder %v1229_v49, 0.0  ;;  %v1595_v55 = vmul.f32 0.2, %v1229_v49  ;;  %v1656_v57 = vsel %vm1400_vm3, %v962_v42, %v1528_v51  ;;  %v1221_v60 = vadd.f32 %v3687_v1, %v1220_v33  ;;  %v980_v61 = vpop.f32.mrf.mxu0 }
 0x10f   : > { %v1720_v58 = vsel %vm1464_vm4, %v1218_v43, %v1592_v52  ;;  %v1659_v62 = vsel %vm1403_vm5, %v973_v44, %v1531_v54  ;;  %v986_v0 = vadd.f32 %v3333_v37, %v3687_v1  ;;  %v1242_v2 = vadd.f32 %v3397_v40, %v3687_v1  ;;  %v1236_v3 = vpop.f32.mrf.mxu1 }
 0x110   : > { %v1723_v63 = vsel %vm1467_vm6, %v1229_v49, %v1595_v55  ;;  %v2921_v4 = vpack.c.bf16 %v1659_v62, %v1658_v47  ;;  %vm1401_vm7 = vcmp.ge.f32.partialorder %v965_v59, 0.0  ;;  %v1529_v6 = vmul.f32 0.2, %v965_v59  ;;  %v3337_v7 = vpop.f32.mrf.mxu0 }
 0x111   : > { %v3081_v5 = vpack.c.bf16 %v1723_v63, %v1722_v48  ;;  %vm1465_vm8 = vcmp.ge.f32.partialorder %v1221_v60, 0.0  ;;  %v1593_v8 = vmul.f32 0.2, %v1221_v60  ;;  %vm1406_vm9 = vcmp.ge.f32.partialorder %v986_v0, 0.0  ;;  %v3401_v10 = vpop.f32.mrf.mxu1 }
 0x112   : > { %v1534_v9 = vmul.f32 0.2, %v986_v0  ;;  %3185 = vst [vmem:[%s3702_s25 + $0x68] sm:$0xff] %v2921_v4   ;;  %v1657_v11 = vsel %vm1401_vm7, %v965_v59, %v1529_v6  ;;  %vm1470_vm10 = vcmp.ge.f32.partialorder %v1242_v2, 0.0  ;;  %v1598_v12 = vmul.f32 0.2, %v1242_v2  ;;  %v993_v14 = vpop.f32.mrf.mxu0 }
 0x113   : > { %3217 = vst [vmem:[%s3702_s25 + $0x168] sm:$0xff] %v3081_v5   ;;  %v978_v13 = vadd.f32 %v3687_v1, %v977_v45  ;;  %v2916_v15 = vpack.c.bf16 %v1657_v11, %v1656_v57  ;;  %v1721_v16 = vsel %vm1465_vm8, %v1221_v60, %v1593_v8  ;;  %v1234_v18 = vadd.f32 %v3687_v1, %v1233_v50  ;;  %v1249_v19 = vpop.f32.mrf.mxu1 }
 0x114   : > { %v1662_v17 = vsel %vm1406_vm9, %v986_v0, %v1534_v9  ;;  %v3076_v20 = vpack.c.bf16 %v1721_v16, %v1720_v58  ;;  %v1726_v21 = vsel %vm1470_vm10, %v1242_v2, %v1598_v12  ;;  %v3338_v23 = vpop.f32.mrf.mxu0  ;;  %v989_v25 = vadd.f32 %v3334_v53, %v3687_v1 }
 0x115   : > { %vm1404_vm11 = vcmp.ge.f32.partialorder %v978_v13, 0.0  ;;  %v1532_v22 = vmul.f32 0.2, %v978_v13  ;;  %3184 = vst [vmem:[%s3702_s25 + $0x60] sm:$0xff] %v2916_v15   ;;  %vm1468_vm12 = vcmp.ge.f32.partialorder %v1234_v18, 0.0  ;;  %v1245_v26 = vadd.f32 %v3398_v56, %v3687_v1  ;;  %v3402_v27 = vpop.f32.mrf.mxu1 }
 0x116   : > { %v1596_v24 = vmul.f32 0.2, %v1234_v18  ;;  %3216 = vst [vmem:[%s3702_s25 + $0x160] sm:$0xff] %v3076_v20   ;;  %v981_v29 = vadd.f32 %v3687_v1, %v980_v61  ;;  %v1237_v30 = vadd.f32 %v3687_v1, %v1236_v3  ;;  %v1002_v31 = vadd.f32 %v3337_v7, %v3687_v1  ;;  %v996_v32 = vpop.f32.mrf.mxu0 }
 0x117   : > { %v1660_v28 = vsel %vm1404_vm11, %v978_v13, %v1532_v22  ;;  %vm1407_vm13 = vcmp.ge.f32.partialorder %v989_v25, 0.0  ;;  %v1535_v34 = vmul.f32 0.2, %v989_v25  ;;  %vm1471_vm14 = vcmp.ge.f32.partialorder %v1245_v26, 0.0  ;;  %v1252_v35 = vpop.f32.mrf.mxu1 }
 0x118   : > { %v1724_v33 = vsel %vm1468_vm12, %v1234_v18, %v1596_v24  ;;  %v1599_v36 = vmul.f32 0.2, %v1245_v26  ;;  %vm1405_vm15 = vcmp.ge.f32.partialorder %v981_v29, 0.0  ;;  %v1533_v37 = vmul.f32 0.2, %v981_v29  ;;  %v3341_v38 = vpop.f32.mrf.mxu0 }
 0x119   : > { %vm1469_vm0 = vcmp.ge.f32.partialorder %v1237_v30, 0.0  ;;  %v1663_v39 = vsel %vm1407_vm13, %v989_v25, %v1535_v34  ;;  %v1597_v40 = vmul.f32 0.2, %v1237_v30  ;;  %vm1410_vm1 = vcmp.ge.f32.partialorder %v1002_v31, 0.0  ;;  %v3405_v42 = vpop.f32.mrf.mxu1 }
 0x11a   : > { %v1538_v41 = vmul.f32 0.2, %v1002_v31  ;;  %v2931_v43 = vpack.c.bf16 %v1663_v39, %v1662_v17  ;;  %v1727_v44 = vsel %vm1471_vm14, %v1245_v26, %v1599_v36  ;;  %v1661_v45 = vsel %vm1405_vm15, %v981_v29, %v1533_v37  ;;  %v1009_v47 = vpop.f32.mrf.mxu0 }
 0x11b   : > { %v1258_v46 = vadd.f32 %v3401_v10, %v3687_v1  ;;  %v3091_v48 = vpack.c.bf16 %v1727_v44, %v1726_v21  ;;  %v2926_v49 = vpack.c.bf16 %v1661_v45, %v1660_v28  ;;  %v1725_v50 = vsel %vm1469_vm0, %v1237_v30, %v1597_v40  ;;  %v1265_v52 = vpop.f32.mrf.mxu1 }
 0x11c   : > { %v1666_v51 = vsel %vm1410_vm1, %v1002_v31, %v1538_v41  ;;  %3187 = vst [vmem:[%s3702_s25 + $0x78] sm:$0xff] %v2931_v43   ;;  %v3086_v53 = vpack.c.bf16 %v1725_v50, %v1724_v33  ;;  %v994_v55 = vadd.f32 %v3687_v1, %v993_v14  ;;  %v3342_v56 = vpop.f32.mrf.mxu0  ;;  %v1250_v57 = vadd.f32 %v3687_v1, %v1249_v19 }
 0x11d   : > { %vm1474_vm2 = vcmp.ge.f32.partialorder %v1258_v46, 0.0  ;;  %v1602_v54 = vmul.f32 0.2, %v1258_v46  ;;  %3219 = vst [vmem:[%s3702_s25 + $0x178] sm:$0xff] %v3091_v48   ;;  %3186 = vst [vmem:[%s3702_s25 + $0x70] sm:$0xff] %v2926_v49   ;;  %v1005_v58 = vadd.f32 %v3338_v23, %v3687_v1  ;;  %v1261_v59 = vadd.f32 %v3402_v27, %v3687_v1  ;;  %v3406_v61 = vpop.f32.mrf.mxu1 }
 0x11e   : > { %v997_v60 = vadd.f32 %v3687_v1, %v996_v32  ;;  %3218 = vst [vmem:[%s3702_s25 + $0x170] sm:$0xff] %v3086_v53   ;;  %vm1408_vm3 = vcmp.ge.f32.partialorder %v994_v55, 0.0  ;;  %v1536_v63 = vmul.f32 0.2, %v994_v55  ;;  %v1253_v0 = vadd.f32 %v3687_v1, %v1252_v35  ;;  %v1012_v2 = vpop.f32.mrf.mxu0 }
 0x11f   : > { %v1730_v62 = vsel %vm1474_vm2, %v1258_v46, %v1602_v54  ;;  %vm1472_vm4 = vcmp.ge.f32.partialorder %v1250_v57, 0.0  ;;  %v1600_v3 = vmul.f32 0.2, %v1250_v57  ;;  %vm1411_vm5 = vcmp.ge.f32.partialorder %v1005_v58, 0.0  ;;  %v1268_v5 = vpop.f32.mrf.mxu1 }
 0x120   : > { %v1539_v4 = vmul.f32 0.2, %v1005_v58  ;;  %v1664_v6 = vsel %vm1408_vm3, %v994_v55, %v1536_v63  ;;  %vm1475_vm6 = vcmp.ge.f32.partialorder %v1261_v59, 0.0  ;;  %v1603_v7 = vmul.f32 0.2, %v1261_v59  ;;  %v3345_v8 = vpop.f32.mrf.mxu0 }
 0x121   : > { %vm1409_vm7 = vcmp.ge.f32.partialorder %v997_v60, 0.0  ;;  %v1728_v9 = vsel %vm1472_vm4, %v1250_v57, %v1600_v3  ;;  %v1537_v11 = vmul.f32 0.2, %v997_v60  ;;  %vm1473_vm8 = vcmp.ge.f32.partialorder %v1253_v0, 0.0  ;;  %v3409_v12 = vpop.f32.mrf.mxu1 }
 0x122   : > { %v1667_v10 = vsel %vm1411_vm5, %v1005_v58, %v1539_v4  ;;  %v1731_v14 = vsel %vm1475_vm6, %v1261_v59, %v1603_v7  ;;  %v1601_v15 = vmul.f32 0.2, %v1253_v0  ;;  %v1018_v16 = vadd.f32 %v3341_v38, %v3687_v1  ;;  %v3801_v17 = vpop.f32.mrf.mxu0 }
 0x123   : > { %v2941_v13 = vpack.c.bf16 %v1667_v10, %v1666_v51  ;;  %v3101_v18 = vpack.c.bf16 %v1731_v14, %v1730_v62  ;;  %v1665_v19 = vsel %vm1409_vm7, %v997_v60, %v1537_v11  ;;  %v1274_v20 = vadd.f32 %v3405_v42, %v3687_v1  ;;  %v1281_v22 = vpop.f32.mrf.mxu1 }
 0x124   : > { %v1010_v21 = vadd.f32 %v3687_v1, %v1009_v47  ;;  %v2936_v23 = vpack.c.bf16 %v1665_v19, %v1664_v6  ;;  %v1729_v24 = vsel %vm1473_vm8, %v1253_v0, %v1601_v15  ;;  %vm1414_vm9 = vcmp.ge.f32.partialorder %v1018_v16, 0.0  ;;  %v3346_v26 = vpop.f32.mrf.mxu0 }
 0x125   : > { %3189 = vst [vmem:[%s3702_s25 + $0x88] sm:$0xff] %v2941_v13   ;;  %v1542_v25 = vmul.f32 0.2, %v1018_v16  ;;  %3221 = vst [vmem:[%s3702_s25 + $0x188] sm:$0xff] %v3101_v18   ;;  %v3096_v27 = vpack.c.bf16 %v1729_v24, %v1728_v9  ;;  %vm1478_vm10 = vcmp.ge.f32.partialorder %v1274_v20, 0.0  ;;  %v3410_v29 = vpop.f32.mrf.mxu1  ;;  %v1266_v32 = vadd.f32 %v3687_v1, %v1265_v52 }
 0x126   : > { %v1606_v28 = vmul.f32 0.2, %v1274_v20  ;;  %vm1412_vm11 = vcmp.ge.f32.partialorder %v1010_v21, 0.0  ;;  %3188 = vst [vmem:[%s3702_s25 + $0x80] sm:$0xff] %v2936_v23   ;;  %v1540_v31 = vmul.f32 0.2, %v1010_v21  ;;  %v1021_v33 = vadd.f32 %v3342_v56, %v3687_v1  ;;  %v1028_v34 = vpop.f32.mrf.mxu0 }
 0x127   : > { %v1670_v30 = vsel %vm1414_vm9, %v1018_v16, %v1542_v25  ;;  %3220 = vst [vmem:[%s3702_s25 + $0x180] sm:$0xff] %v3096_v27   ;;  %v1277_v36 = vadd.f32 %v3406_v61, %v3687_v1  ;;  %v1013_v37 = vadd.f32 %v3687_v1, %v1012_v2  ;;  %v1269_v38 = vadd.f32 %v3687_v1, %v1268_v5  ;;  %v3814_v39 = vpop.f32.mrf.mxu1 }
 0x128   : > { %v1734_v35 = vsel %vm1478_vm10, %v1274_v20, %v1606_v28  ;;  %v1668_v40 = vsel %vm1412_vm11, %v1010_v21, %v1540_v31  ;;  %vm1476_vm12 = vcmp.ge.f32.partialorder %v1266_v32, 0.0  ;;  %v1604_v41 = vmul.f32 0.2, %v1266_v32  ;;  %v3349_v42 = vpop.f32.mrf.mxu0  ;;  %v3845_v21 = vld [vmem:[%s3974_s2] ss:$0 sm:$0xff] }
 0x129   : > { %vm1415_vm13 = vcmp.ge.f32.partialorder %v1021_v33, 0.0  ;;  %v1543_v43 = vmul.f32 0.2, %v1021_v33  ;;  %vm1479_vm14 = vcmp.ge.f32.partialorder %v1277_v36, 0.0  ;;  %v1607_v44 = vmul.f32 0.2, %v1277_v36  ;;  %v3413_v45 = vpop.f32.mrf.mxu1 }
 0x12a   : > { %vm1413_vm15 = vcmp.ge.f32.partialorder %v1013_v37, 0.0  ;;  %v1732_v46 = vsel %vm1476_vm12, %v1266_v32, %v1604_v41  ;;  %v1541_v47 = vmul.f32 0.2, %v1013_v37  ;;  %vm1477_vm0 = vcmp.ge.f32.partialorder %v1269_v38, 0.0  ;;  %v3816_v49 = vpop.f32.mrf.mxu0 }
 0x12b   : > { %v1605_v48 = vmul.f32 0.2, %v1269_v38  ;;  %v1671_v50 = vsel %vm1415_vm13, %v1021_v33, %v1543_v43  ;;  %v1735_v51 = vsel %vm1479_vm14, %v1277_v36, %v1607_v44  ;;  %v1034_v52 = vadd.f32 %v3345_v8, %v3687_v1  ;;  %v3820_v54 = vpop.f32.mrf.mxu1 }
 0x12c   : > { %v1290_v53 = vadd.f32 %v3409_v12, %v3687_v1  ;;  %v2951_v55 = vpack.c.bf16 %v1671_v50, %v1670_v30  ;;  %v3111_v56 = vpack.c.bf16 %v1735_v51, %v1734_v35  ;;  %v1669_v57 = vsel %vm1413_vm15, %v1013_v37, %v1541_v47  ;;  %v3350_v59 = vpop.f32.mrf.mxu0 }
 0x12d   : > { %v1733_v58 = vsel %vm1477_vm0, %v1269_v38, %v1605_v48  ;;  %v2946_v60 = vpack.c.bf16 %v1669_v57, %v1668_v40  ;;  %vm1418_vm1 = vcmp.ge.f32.partialorder %v1034_v52, 0.0  ;;  %v1546_v62 = vmul.f32 0.2, %v1034_v52  ;;  %v3822_v63 = vpop.f32.mrf.mxu1 }
 0x12e   : > { %v3106_v61 = vpack.c.bf16 %v1733_v58, %v1732_v46  ;;  %3191 = vst [vmem:[%s3702_s25 + $0x98] sm:$0xff] %v2951_v55   ;;  %3223 = vst [vmem:[%s3702_s25 + $0x198] sm:$0xff] %v3111_v56   ;;  %vm1482_vm2 = vcmp.ge.f32.partialorder %v1290_v53, 0.0  ;;  %v1610_v0 = vmul.f32 0.2, %v1290_v53  ;;  %v1026_v2 = vadd.f32 %v3687_v1, %v3801_v17  ;;  %v3829_v4 = vpop.f32.mrf.mxu0 }
 0x12f   : > { %v1282_v3 = vadd.f32 %v3687_v1, %v1281_v22  ;;  %3190 = vst [vmem:[%s3702_s25 + $0x90] sm:$0xff] %v2946_v60   ;;  %v1674_v5 = vsel %vm1418_vm1, %v1034_v52, %v1546_v62  ;;  %v1037_v6 = vadd.f32 %v3346_v26, %v3687_v1  ;;  %v1293_v7 = vadd.f32 %v3410_v29, %v3687_v1  ;;  %v3836_v9 = vpop.f32.mrf.mxu1 }
 0x130   : > { %3222 = vst [vmem:[%s3702_s25 + $0x190] sm:$0xff] %v3106_v61   ;;  %v1029_v8 = vadd.f32 %v3687_v1, %v1028_v34  ;;  %v1738_v10 = vsel %vm1482_vm2, %v1290_v53, %v1610_v0  ;;  %vm1416_vm3 = vcmp.ge.f32.partialorder %v1026_v2, 0.0  ;;  %v1544_v11 = vmul.f32 0.2, %v1026_v2  ;;  %v3838_v12 = vpop.f32.mrf.mxu0 }
 0x131   : > { %vm1480_vm4 = vcmp.ge.f32.partialorder %v1282_v3, 0.0  ;;  %v1608_v13 = vmul.f32 0.2, %v1282_v3  ;;  %vm1419_vm5 = vcmp.ge.f32.partialorder %v1037_v6, 0.0  ;;  %v1547_v14 = vmul.f32 0.2, %v1037_v6  ;;  %v3417_v15 = vpop.f32.mrf.mxu1 }
 0x132   : > { %vm1483_vm6 = vcmp.ge.f32.partialorder %v1293_v7, 0.0  ;;  %v1672_v16 = vsel %vm1416_vm3, %v1026_v2, %v1544_v11  ;;  %v1611_v17 = vmul.f32 0.2, %v1293_v7  ;;  %vm1417_vm7 = vcmp.ge.f32.partialorder %v1029_v8, 0.0  ;;  %v3840_v19 = vpop.f32.mrf.mxu0 }
 0x133   : > { %v1545_v18 = vmul.f32 0.2, %v1029_v8  ;;  %v1736_v1 = vsel %vm1480_vm4, %v1282_v3, %v1608_v13  ;;  %v1675_v20 = vsel %vm1419_vm5, %v1037_v6, %v1547_v14  ;;  %v1285_v22 = vadd.f32 %v3845_v21, %v3814_v39  ;;  %v3850_v24 = vpop.f32.mrf.mxu1 }
 0x134   : > { %v1050_v23 = vadd.f32 %v3845_v21, %v3349_v42  ;;  %v2961_v25 = vpack.c.bf16 %v1675_v20, %v1674_v5  ;;  %v1739_v26 = vsel %vm1483_vm6, %v1293_v7, %v1611_v17  ;;  %v1306_v28 = vadd.f32 %v3845_v21, %v3413_v45  ;;  %v3853_v29 = vpop.f32.mrf.mxu0 }
 0x135   : > { %v1673_v27 = vsel %vm1417_vm7, %v1029_v8, %v1545_v18  ;;  %v3121_v30 = vpack.c.bf16 %v1739_v26, %v1738_v10  ;;  %vm1481_vm8 = vcmp.ge.f32.partialorder %v1285_v22, 0.0  ;;  %v1609_v32 = vmul.f32 0.2, %v1285_v22  ;;  %v3855_v33 = vpop.f32.mrf.mxu1 }
 0x136   : > { %v2956_v31 = vpack.c.bf16 %v1673_v27, %v1672_v16  ;;  %3193 = vst [vmem:[%s3702_s25 + $0xa8] sm:$0xff] %v2961_v25   ;;  %vm1422_vm9 = vcmp.ge.f32.partialorder %v1050_v23, 0.0  ;;  %v1550_v34 = vmul.f32 0.2, %v1050_v23  ;;  %vm1486_vm10 = vcmp.ge.f32.partialorder %v1306_v28, 0.0  ;;  %v3858_v36 = vpop.f32.mrf.mxu0 }
 0x137   : > { %v1614_v35 = vmul.f32 0.2, %v1306_v28  ;;  %3225 = vst [vmem:[%s3702_s25 + $0x1a8] sm:$0xff] %v3121_v30   ;;  %v1737_v37 = vsel %vm1481_vm8, %v1285_v22, %v1609_v32  ;;  %v1042_v38 = vadd.f32 %v3845_v21, %v3816_v49  ;;  %v1298_v39 = vadd.f32 %v3845_v21, %v3820_v54  ;;  %v3867_v41 = vpop.f32.mrf.mxu1 }
 0x138   : > { %3192 = vst [vmem:[%s3702_s25 + $0xa0] sm:$0xff] %v2956_v31   ;;  %v1053_v40 = vadd.f32 %v3845_v21, %v3350_v59  ;;  %v3116_v42 = vpack.c.bf16 %v1737_v37, %v1736_v1  ;;  %v1678_v43 = vsel %vm1422_vm9, %v1050_v23, %v1550_v34  ;;  %v1309_v45 = vadd.f32 %v3845_v21, %v3822_v63  ;;  %v3357_v46 = vpop.f32.mrf.mxu0 }
 0x139   : > { %v1742_v44 = vsel %vm1486_vm10, %v1306_v28, %v1614_v35  ;;  %vm1420_vm11 = vcmp.ge.f32.partialorder %v1042_v38, 0.0  ;;  %v1548_v47 = vmul.f32 0.2, %v1042_v38  ;;  %vm1484_vm12 = vcmp.ge.f32.partialorder %v1298_v39, 0.0  ;;  %v3871_v50 = vpop.f32.mrf.mxu1 }
 0x13a   : > { %v1612_v48 = vmul.f32 0.2, %v1298_v39  ;;  %3224 = vst [vmem:[%s3702_s25 + $0x1a0] sm:$0xff] %v3116_v42   ;;  %vm1423_vm13 = vcmp.ge.f32.partialorder %v1053_v40, 0.0  ;;  %v1551_v49 = vmul.f32 0.2, %v1053_v40  ;;  %v3874_v52 = vpop.f32.mrf.mxu0  ;;  %v1045_v55 = vadd.f32 %v3845_v21, %v3829_v4 }
 0x13b   : > { %vm1487_vm14 = vcmp.ge.f32.partialorder %v1309_v45, 0.0  ;;  %v1615_v51 = vmul.f32 0.2, %v1309_v45  ;;  %v1676_v53 = vsel %vm1420_vm11, %v1042_v38, %v1548_v47  ;;  %v1301_v56 = vadd.f32 %v3845_v21, %v3836_v9  ;;  %v3880_v57 = vpop.f32.mrf.mxu1 }
 0x13c   : > { %v1740_v54 = vsel %vm1484_vm12, %v1298_v39, %v1612_v48  ;;  %v1679_v58 = vsel %vm1423_vm13, %v1053_v40, %v1551_v49  ;;  %v1066_v60 = vadd.f32 %v3845_v21, %v3838_v12  ;;  %v1322_v61 = vadd.f32 %v3845_v21, %v3417_v15  ;;  %v3885_v62 = vpop.f32.mrf.mxu0 }
 0x13d   : > { %v1743_v59 = vsel %vm1487_vm14, %v1309_v45, %v1615_v51  ;;  %v2971_v63 = vpack.c.bf16 %v1679_v58, %v1678_v43  ;;  %vm1421_vm15 = vcmp.ge.f32.partialorder %v1045_v55, 0.0  ;;  %v1549_v2 = vmul.f32 0.2, %v1045_v55  ;;  %v3887_v3 = vpop.f32.mrf.mxu1 }
 0x13e   : > { %v3131_v0 = vpack.c.bf16 %v1743_v59, %v1742_v44  ;;  %vm1485_vm0 = vcmp.ge.f32.partialorder %v1301_v56, 0.0  ;;  %v1613_v4 = vmul.f32 0.2, %v1301_v56  ;;  %vm1426_vm1 = vcmp.ge.f32.partialorder %v1066_v60, 0.0  ;;  %v3889_v6 = vpop.f32.mrf.mxu0 }
 0x13f   : > { %v1554_v5 = vmul.f32 0.2, %v1066_v60  ;;  %3195 = vst [vmem:[%s3702_s25 + $0xb8] sm:$0xff] %v2971_v63   ;;  %v1677_v7 = vsel %vm1421_vm15, %v1045_v55, %v1549_v2  ;;  %vm1490_vm2 = vcmp.ge.f32.partialorder %v1322_v61, 0.0  ;;  %v1618_v8 = vmul.f32 0.2, %v1322_v61  ;;  %v1332_v10 = vpop.f32.mrf.mxu1 }
 0x140   : > { %3227 = vst [vmem:[%s3702_s25 + $0x1b8] sm:$0xff] %v3131_v0   ;;  %v1058_v9 = vadd.f32 %v3845_v21, %v3840_v19  ;;  %v2966_v11 = vpack.c.bf16 %v1677_v7, %v1676_v53  ;;  %v1741_v12 = vsel %vm1485_vm0, %v1301_v56, %v1613_v4  ;;  %v1314_v14 = vadd.f32 %v3845_v21, %v3850_v24  ;;  %v3897_v15 = vpop.f32.mrf.mxu0 }
 0x141   : > { %v1682_v13 = vsel %vm1426_vm1, %v1066_v60, %v1554_v5  ;;  %v3126_v16 = vpack.c.bf16 %v1741_v12, %v1740_v54  ;;  %v1746_v17 = vsel %vm1490_vm2, %v1322_v61, %v1618_v8  ;;  %v3899_v1 = vpop.f32.mrf.mxu1  ;;  %v1069_v19 = vadd.f32 %v3845_v21, %v3853_v29 }
 0x142   : > { %vm1424_vm3 = vcmp.ge.f32.partialorder %v1058_v9, 0.0  ;;  %v1552_v18 = vmul.f32 0.2, %v1058_v9  ;;  %3194 = vst [vmem:[%s3702_s25 + $0xb0] sm:$0xff] %v2966_v11   ;;  %vm1488_vm4 = vcmp.ge.f32.partialorder %v1314_v14, 0.0  ;;  %v1325_v22 = vadd.f32 %v3845_v21, %v3855_v33  ;;  %v3906_v23 = vpop.f32.mrf.mxu0 }
 0x143   : > { %v1616_v20 = vmul.f32 0.2, %v1314_v14  ;;  %3226 = vst [vmem:[%s3702_s25 + $0x1b0] sm:$0xff] %v3126_v16   ;;  %v1061_v25 = vadd.f32 %v3845_v21, %v3858_v36  ;;  %v1317_v26 = vadd.f32 %v3845_v21, %v3867_v41  ;;  %v1082_v27 = vadd.f32 %v3845_v21, %v3357_v46  ;;  %v3914_v32 = vpop.f32.mrf.mxu1 }
 0x144   : > { %v1680_v24 = vsel %vm1424_vm3, %v1058_v9, %v1552_v18  ;;  %vm1427_vm5 = vcmp.ge.f32.partialorder %v1069_v19, 0.0  ;;  %v1555_v30 = vmul.f32 0.2, %v1069_v19  ;;  %vm1491_vm6 = vcmp.ge.f32.partialorder %v1325_v22, 0.0  ;;  %v3916_v33 = vpop.f32.mrf.mxu0 }
 0x145   : > { %v1744_v28 = vsel %vm1488_vm4, %v1314_v14, %v1616_v20  ;;  %v1619_v29 = vmul.f32 0.2, %v1325_v22  ;;  %vm1425_vm7 = vcmp.ge.f32.partialorder %v1061_v25, 0.0  ;;  %v1553_v31 = vmul.f32 0.2, %v1061_v25  ;;  %v3426_v48 = vpop.f32.mrf.mxu1 }
 0x146   : > { %vm1489_vm8 = vcmp.ge.f32.partialorder %v1317_v26, 0.0  ;;  %v1683_v34 = vsel %vm1427_vm5, %v1069_v19, %v1555_v30  ;;  %v1617_v35 = vmul.f32 0.2, %v1317_v26  ;;  %vm1430_vm9 = vcmp.ge.f32.partialorder %v1082_v27, 0.0  ;;  %v1092_v49 = vpop.f32.mrf.mxu0 }
 0x147   : > { %v1558_v36 = vmul.f32 0.2, %v1082_v27  ;;  %v2981_v37 = vpack.c.bf16 %v1683_v34, %v1682_v13  ;;  %v1747_v38 = vsel %vm1491_vm6, %v1325_v22, %v1619_v29  ;;  %v1681_v39 = vsel %vm1425_vm7, %v1061_v25, %v1553_v31  ;;  %v1348_v61 = vpop.f32.mrf.mxu1 }
 0x148   : > { %v1338_v40 = vadd.f32 %v3845_v21, %v3871_v50  ;;  %v3141_v41 = vpack.c.bf16 %v1747_v38, %v1746_v17  ;;  %v2976_v42 = vpack.c.bf16 %v1681_v39, %v1680_v24  ;;  %v1745_v43 = vsel %vm1489_vm8, %v1317_v26, %v1617_v35 }
 0x149   : > { %v1686_v44 = vsel %vm1430_vm9, %v1082_v27, %v1558_v36  ;;  %3197 = vst [vmem:[%s3702_s25 + $0xc8] sm:$0xff] %v2981_v37   ;;  %v3136_v45 = vpack.c.bf16 %v1745_v43, %v1744_v28  ;;  %v1074_v47 = vadd.f32 %v3845_v21, %v3874_v52  ;;  %v1330_v51 = vadd.f32 %v3845_v21, %v3880_v57  ;;  %v3429_v14 = vpop.f32.mrf.mxu1 }
 0x14a   : > { %vm1494_vm10 = vcmp.ge.f32.partialorder %v1338_v40, 0.0  ;;  %v1622_v46 = vmul.f32 0.2, %v1338_v40  ;;  %3229 = vst [vmem:[%s3702_s25 + $0x1c8] sm:$0xff] %v3141_v41   ;;  %3196 = vst [vmem:[%s3702_s25 + $0xc0] sm:$0xff] %v2976_v42   ;;  %v1085_v50 = vadd.f32 %v3845_v21, %v3885_v62  ;;  %v1341_v53 = vadd.f32 %v3845_v21, %v3887_v3  ;;  %v3365_v62 = vpop.f32.mrf.mxu0 }
 0x14b   : > { %v1077_v54 = vadd.f32 %v3845_v21, %v3889_v6  ;;  %3228 = vst [vmem:[%s3702_s25 + $0x1c0] sm:$0xff] %v3136_v45   ;;  %vm1428_vm11 = vcmp.ge.f32.partialorder %v1074_v47, 0.0  ;;  %v1556_v52 = vmul.f32 0.2, %v1074_v47  ;;  %v1333_v56 = vadd.f32 %v3845_v21, %v1332_v10  ;;  %v1361_v28 = vpop.f32.mrf.mxu1 }
 0x14c   : > { %v1750_v55 = vsel %vm1494_vm10, %v1338_v40, %v1622_v46  ;;  %vm1492_vm12 = vcmp.ge.f32.partialorder %v1330_v51, 0.0  ;;  %v1620_v58 = vmul.f32 0.2, %v1330_v51  ;;  %vm1431_vm13 = vcmp.ge.f32.partialorder %v1085_v50, 0.0  ;;  %v1105_v16 = vpop.f32.mrf.mxu0 }
 0x14d   : > { %v1559_v59 = vmul.f32 0.2, %v1085_v50  ;;  %v1684_v57 = vsel %vm1428_vm11, %v1074_v47, %v1556_v52  ;;  %vm1495_vm14 = vcmp.ge.f32.partialorder %v1341_v53, 0.0  ;;  %v1623_v60 = vmul.f32 0.2, %v1341_v53  ;;  %v3430_v43 = vpop.f32.mrf.mxu1 }
 0x14e   : > { %vm1429_vm15 = vcmp.ge.f32.partialorder %v1077_v54, 0.0  ;;  %v1748_v63 = vsel %vm1492_vm12, %v1330_v51, %v1620_v58  ;;  %v1557_v2 = vmul.f32 0.2, %v1077_v54  ;;  %vm1493_vm0 = vcmp.ge.f32.partialorder %v1333_v56, 0.0  ;;  %v3366_v30 = vpop.f32.mrf.mxu0 }
 0x14f   : > { %v1687_v0 = vsel %vm1431_vm13, %v1085_v50, %v1559_v59  ;;  %v1751_v4 = vsel %vm1495_vm14, %v1341_v53, %v1623_v60  ;;  %v1621_v5 = vmul.f32 0.2, %v1333_v56  ;;  %v1098_v6 = vadd.f32 %v3845_v21, %v3897_v15 }
 0x150   : > { %v2991_v3 = vpack.c.bf16 %v1687_v0, %v1686_v44  ;;  %v3151_v7 = vpack.c.bf16 %v1751_v4, %v1750_v55  ;;  %v1685_v8 = vsel %vm1429_vm15, %v1077_v54, %v1557_v2  ;;  %v1354_v9 = vadd.f32 %v3845_v21, %v3899_v1  ;;  %v1108_v44 = vpop.f32.mrf.mxu0 }
 0x151   : > { %v1090_v10 = vadd.f32 %v3845_v21, %v3906_v23  ;;  %v2986_v11 = vpack.c.bf16 %v1685_v8, %v1684_v57  ;;  %v1749_v12 = vsel %vm1493_vm0, %v1333_v56, %v1621_v5  ;;  %vm1434_vm1 = vcmp.ge.f32.partialorder %v1098_v6, 0.0  ;;  %v1364_v56 = vpop.f32.mrf.mxu1 }
 0x152   : > { %3199 = vst [vmem:[%s3702_s25 + $0xd8] sm:$0xff] %v2991_v3   ;;  %v1562_v13 = vmul.f32 0.2, %v1098_v6  ;;  %3231 = vst [vmem:[%s3702_s25 + $0x1d8] sm:$0xff] %v3151_v7   ;;  %v3146_v17 = vpack.c.bf16 %v1749_v12, %v1748_v63  ;;  %vm1498_vm2 = vcmp.ge.f32.partialorder %v1354_v9, 0.0  ;;  %v1346_v1 = vadd.f32 %v3845_v21, %v3914_v32 }
 0x153   : > { %v1626_v15 = vmul.f32 0.2, %v1354_v9  ;;  %vm1432_vm3 = vcmp.ge.f32.partialorder %v1090_v10, 0.0  ;;  %3198 = vst [vmem:[%s3702_s25 + $0xd0] sm:$0xff] %v2986_v11   ;;  %v1560_v20 = vmul.f32 0.2, %v1090_v10  ;;  %v1101_v19 = vadd.f32 %v3845_v21, %v3916_v33 }
 0x154   : > { %v1690_v18 = vsel %vm1434_vm1, %v1098_v6, %v1562_v13  ;;  %3230 = vst [vmem:[%s3702_s25 + $0x1d0] sm:$0xff] %v3146_v17   ;;  %v1357_v23 = vadd.f32 %v3845_v21, %v3426_v48  ;;  %v1093_v24 = vadd.f32 %v3845_v21, %v1092_v49  ;;  %v1349_v25 = vadd.f32 %v3845_v21, %v1348_v61 }
 0x155   : > { %v1754_v22 = vsel %vm1498_vm2, %v1354_v9, %v1626_v15  ;;  %v1688_v26 = vsel %vm1432_vm3, %v1090_v10, %v1560_v20  ;;  %vm1496_vm4 = vcmp.ge.f32.partialorder %v1346_v1, 0.0  ;;  %v1624_v27 = vmul.f32 0.2, %v1346_v1 }
 0x156   : > { %vm1435_vm5 = vcmp.ge.f32.partialorder %v1101_v19, 0.0  ;;  %v1563_v29 = vmul.f32 0.2, %v1101_v19  ;;  %vm1499_vm6 = vcmp.ge.f32.partialorder %v1357_v23, 0.0  ;;  %v1627_v31 = vmul.f32 0.2, %v1357_v23 }
 0x157   : > { %vm1433_vm7 = vcmp.ge.f32.partialorder %v1093_v24, 0.0  ;;  %v1752_v32 = vsel %vm1496_vm4, %v1346_v1, %v1624_v27  ;;  %v1561_v33 = vmul.f32 0.2, %v1093_v24  ;;  %vm1497_vm8 = vcmp.ge.f32.partialorder %v1349_v25, 0.0 }
 0x158   : > { %v1625_v34 = vmul.f32 0.2, %v1349_v25  ;;  %v1691_v35 = vsel %vm1435_vm5, %v1101_v19, %v1563_v29  ;;  %v1755_v36 = vsel %vm1499_vm6, %v1357_v23, %v1627_v31  ;;  %v1114_v37 = vadd.f32 %v3845_v21, %v3365_v62 }
 0x159   : > { %v1370_v38 = vadd.f32 %v3845_v21, %v3429_v14  ;;  %v3001_v39 = vpack.c.bf16 %v1691_v35, %v1690_v18  ;;  %v3161_v40 = vpack.c.bf16 %v1755_v36, %v1754_v22  ;;  %v1689_v41 = vsel %vm1433_vm7, %v1093_v24, %v1561_v33 }
 0x15a   : > { %v1753_v42 = vsel %vm1497_vm8, %v1349_v25, %v1625_v34  ;;  %v2996_v45 = vpack.c.bf16 %v1689_v41, %v1688_v26  ;;  %vm1438_vm9 = vcmp.ge.f32.partialorder %v1114_v37, 0.0  ;;  %v1566_v47 = vmul.f32 0.2, %v1114_v37 }
 0x15b   : > { %v3156_v46 = vpack.c.bf16 %v1753_v42, %v1752_v32  ;;  %3201 = vst [vmem:[%s3702_s25 + $0xe8] sm:$0xff] %v3001_v39   ;;  %3233 = vst [vmem:[%s3702_s25 + $0x1e8] sm:$0xff] %v3161_v40   ;;  %vm1502_vm10 = vcmp.ge.f32.partialorder %v1370_v38, 0.0  ;;  %v1630_v48 = vmul.f32 0.2, %v1370_v38  ;;  %v1106_v49 = vadd.f32 %v3845_v21, %v1105_v16 }
 0x15c   : > { %3200 = vst [vmem:[%s3702_s25 + $0xe0] sm:$0xff] %v2996_v45   ;;  %v1362_v51 = vadd.f32 %v3845_v21, %v1361_v28  ;;  %v1117_v50 = vadd.f32 %v3845_v21, %v3366_v30  ;;  %v1373_v53 = vadd.f32 %v3845_v21, %v3430_v43  ;;  %v1109_v54 = vadd.f32 %v3845_v21, %v1108_v44 }
 0x15d   : > { %3232 = vst [vmem:[%s3702_s25 + $0x1e0] sm:$0xff] %v3156_v46   ;;  %v1694_v55 = vsel %vm1438_vm9, %v1114_v37, %v1566_v47  ;;  %v1564_v52 = vmul.f32 0.2, %v1106_v49  ;;  %vm1436_vm11 = vcmp.ge.f32.partialorder %v1106_v49, 0.0  ;;  %v1758_v59 = vsel %vm1502_vm10, %v1370_v38, %v1630_v48 }
 0x15e   : > { %vm1439_vm12 = vcmp.ge.f32.partialorder %v1117_v50, 0.0  ;;  %v1567_v58 = vmul.f32 0.2, %v1117_v50  ;;  %vm1503_vm13 = vcmp.ge.f32.partialorder %v1373_v53, 0.0  ;;  %v1631_v57 = vmul.f32 0.2, %v1373_v53 }
 0x15f   : > { %vm1437_vm14 = vcmp.ge.f32.partialorder %v1109_v54, 0.0  ;;  %v1565_v60 = vmul.f32 0.2, %v1109_v54  ;;  %vm1500_vm15 = vcmp.ge.f32.partialorder %v1362_v51, 0.0  ;;  %v1628_v61 = vmul.f32 0.2, %v1362_v51 }
 0x160   : > { %v1695_v62 = vsel %vm1439_vm12, %v1117_v50, %v1567_v58  ;;  %v1365_v63 = vadd.f32 %v3845_v21, %v1364_v56  ;;  %v1692_v0 = vsel %vm1436_vm11, %v1106_v49, %v1564_v52  ;;  %v1759_v3 = vsel %vm1503_vm13, %v1373_v53, %v1631_v57 }
 0x161   : > { %v3011_v2 = vpack.c.bf16 %v1695_v62, %v1694_v55  ;;  %v1693_v4 = vsel %vm1437_vm14, %v1109_v54, %v1565_v60  ;;  %v3171_v5 = vpack.c.bf16 %v1759_v3, %v1758_v59  ;;  %v1756_v8 = vsel %vm1500_vm15, %v1362_v51, %v1628_v61 }
 0x162   : > { %v3006_v6 = vpack.c.bf16 %v1693_v4, %v1692_v0  ;;  %vm1501_vm0 = vcmp.ge.f32.partialorder %v1365_v63, 0.0  ;;  %v1629_v7 = vmul.f32 0.2, %v1365_v63 }
 0x163   : > { %3203 = vst [vmem:[%s3702_s25 + $0xf8] sm:$0xff] %v3011_v2   ;;  %3235 = vst [vmem:[%s3702_s25 + $0x1f8] sm:$0xff] %v3171_v5  }
 0x164   : > { %3202 = vst [vmem:[%s3702_s25 + $0xf0] sm:$0xff] %v3006_v6   ;;  %v1757_v9 = vsel %vm1501_vm0, %v1365_v63, %v1629_v7 }
 0x165   : > { %v3166_v10 = vpack.c.bf16 %v1757_v9, %v1756_v8 }
 0x167   : > { %3234 = vst [vmem:[%s3702_s25 + $0x1f0] sm:$0xff] %v3166_v10  }
 0x168 PF: > { %s13_s12 = sadd.s32 1, %s3513_s12  }
 0x169   : > { %p10_p4 = scmp.ge.s32.totalorder %s13_s12, 4  }
 0x16b   :  { %12 = sbr.rel (!%p10_p4) target bundleno = 1 (0x1), region = 62 }

// kernel: _forward_impl.8
= control target key start
LH: loop header
LB: loop body
LE: loop exit
PB: predicated region body
PF: predicated region fallthrough
CT: control target
= control target key end

     0   :  { %s2134_s1 = inlined_call_operand.vmem [shape: bf16[128,128], index: 1, kind: input, shape index: {}]   ;;  %s2135_s0 = inlined_call_operand.vmem [shape: bf16[512,128], index: 0, kind: input, shape index: {}]   ;;  %s2136_s2 = inlined_call_operand.vmem [shape: bf16[512,128], index: 2, kind: output, shape index: {0}]   ;;  %s2137_s3 = inlined_call_operand.vmem [shape: f32[8,128], index: 3, kind: output, shape index: {1}]   ;;  %s2138_s4 = inlined_call_operand.vmem [shape: f32[8,128], index: 4, kind: output, shape index: {2}]  }
   0x1   :  { %v1655_v0 = vld [vmem:[%s2134_s1 + $0x38] sm:$0xff]   ;;  %v1656_v1 = vld [vmem:[%s2134_s1 + $0x30] sm:$0xff]   ;;  %v1657_v2 = vld [vmem:[%s2134_s1 + $0x28] sm:$0xff]  }
   0x2   :  { %1559 = vmatprep.subr.bf16.mxu0 %v1655_v0  ;;  %1639 = vmatprep.subr.bf16.mxu1 %v1655_v0  ;;  %v1658_v3 = vld [vmem:[%s2134_s1 + $0x20] sm:$0xff]   ;;  %v1659_v5 = vld [vmem:[%s2134_s1 + $0x18] sm:$0xff]   ;;  %v1660_v6 = vld [vmem:[%s2134_s1 + $0x10] sm:$0xff]  }
   0x3   :  { %1560 = vmatpush3.bf16.msra.mxu0 %v1655_v0  ;;  %1647 = vmatpush3.bf16.msra.mxu1 %v1655_v0  ;;  %v1663_v4 = vld [vmem:[%s2135_s0] sm:$0xff]   ;;  %v1661_v7 = vld [vmem:[%s2134_s1 + $0x8] sm:$0xff]   ;;  %v1665_v11 = vld [vmem:[%s2135_s0 + $0x10] sm:$0xff]  }
   0x4   :  { %1561 = vmatprep.subr.bf16.mxu0 %v1656_v1  ;;  %1640 = vmatprep.subr.bf16.mxu1 %v1656_v1  ;;  %v1662_v8 = vld [vmem:[%s2134_s1] sm:$0xff]   ;;  %v1664_v10 = vld [vmem:[%s2135_s0 + $0x8] sm:$0xff]   ;;  %v1681_v13 = vld [vmem:[%s2135_s0 + $0x90] sm:$0xff]  }
   0x5   :  { %1575 = vmatprep.mubr.bf16.mxu0 %v1663_v4  ;;  %v1679_v9 = vld [vmem:[%s2135_s0 + $0x80] sm:$0xff]   ;;  %v1680_v12 = vld [vmem:[%s2135_s0 + $0x88] sm:$0xff]   ;;  %v1666_v14 = vld [vmem:[%s2135_s0 + $0x18] sm:$0xff]  }
   0x6   :  { %1607 = vmatprep.mubr.bf16.mxu1 %v1679_v9  ;;  %v1667_v15 = vld [vmem:[%s2135_s0 + $0x20] sm:$0xff]   ;;  %v1682_v16 = vld [vmem:[%s2135_s0 + $0x98] sm:$0xff]   ;;  %v1668_v18 = vld [vmem:[%s2135_s0 + $0x28] sm:$0xff]  }
   0x7   :  { %1562 = vmatpush3.bf16.msra.mxu0 %v1656_v1  ;;  %1648 = vmatpush3.bf16.msra.mxu1 %v1656_v1  ;;  %v1683_v17 = vld [vmem:[%s2135_s0 + $0xa0] sm:$0xff]   ;;  %v1684_v19 = vld [vmem:[%s2135_s0 + $0xa8] sm:$0xff]   ;;  %v1669_v20 = vld [vmem:[%s2135_s0 + $0x30] sm:$0xff]  }
   0x8   :  { %1563 = vmatprep.subr.bf16.mxu0 %v1657_v2  ;;  %1641 = vmatprep.subr.bf16.mxu1 %v1657_v2  ;;  %v1685_v21 = vld [vmem:[%s2135_s0 + $0xb0] sm:$0xff]   ;;  %v1670_v22 = vld [vmem:[%s2135_s0 + $0x38] sm:$0xff]   ;;  %v1671_v24 = vld [vmem:[%s2135_s0 + $0x40] sm:$0xff]  }
   0x9   :  { %v1686_v23 = vld [vmem:[%s2135_s0 + $0xb8] sm:$0xff]   ;;  %v1687_v25 = vld [vmem:[%s2135_s0 + $0xc0] sm:$0xff]   ;;  %v1672_v26 = vld [vmem:[%s2135_s0 + $0x48] sm:$0xff]  }
   0xa   :  { %v1688_v27 = vld [vmem:[%s2135_s0 + $0xc8] sm:$0xff]   ;;  %v1673_v28 = vld [vmem:[%s2135_s0 + $0x50] sm:$0xff]   ;;  %v1674_v30 = vld [vmem:[%s2135_s0 + $0x58] sm:$0xff]  }
   0xb   :  { %1564 = vmatpush3.bf16.msra.mxu0 %v1657_v2  ;;  %1649 = vmatpush3.bf16.msra.mxu1 %v1657_v2  ;;  %v1689_v29 = vld [vmem:[%s2135_s0 + $0xd0] sm:$0xff]   ;;  %v1690_v31 = vld [vmem:[%s2135_s0 + $0xd8] sm:$0xff]   ;;  %v1675_v32 = vld [vmem:[%s2135_s0 + $0x60] sm:$0xff]  }
   0xc   :  { %1565 = vmatprep.subr.bf16.mxu0 %v1658_v3  ;;  %1642 = vmatprep.subr.bf16.mxu1 %v1658_v3  ;;  %v1691_v33 = vld [vmem:[%s2135_s0 + $0xe0] sm:$0xff]   ;;  %v1676_v34 = vld [vmem:[%s2135_s0 + $0x68] sm:$0xff]   ;;  %v1677_v36 = vld [vmem:[%s2135_s0 + $0x70] sm:$0xff]  }
   0xd   :  { %v1692_v35 = vld [vmem:[%s2135_s0 + $0xe8] sm:$0xff]   ;;  %v1693_v37 = vld [vmem:[%s2135_s0 + $0xf0] sm:$0xff]   ;;  %v1678_v38 = vld [vmem:[%s2135_s0 + $0x78] sm:$0xff]  }
   0xe   :  { %v1694_v39 = vld [vmem:[%s2135_s0 + $0xf8] sm:$0xff]  }
   0xf   :  { %1566 = vmatpush3.bf16.msra.mxu0 %v1658_v3  ;;  %1650 = vmatpush3.bf16.msra.mxu1 %v1658_v3 }
  0x10   :  { %1567 = vmatprep.subr.bf16.mxu0 %v1659_v5  ;;  %1643 = vmatprep.subr.bf16.mxu1 %v1659_v5 }
  0x13   :  { %1568 = vmatpush3.bf16.msra.mxu0 %v1659_v5  ;;  %1651 = vmatpush3.bf16.msra.mxu1 %v1659_v5 }
  0x14   :  { %1569 = vmatprep.subr.bf16.mxu0 %v1660_v6  ;;  %1644 = vmatprep.subr.bf16.mxu1 %v1660_v6 }
  0x17   :  { %1570 = vmatpush3.bf16.msra.mxu0 %v1660_v6  ;;  %1652 = vmatpush3.bf16.msra.mxu1 %v1660_v6 }
  0x18   :  { %1571 = vmatprep.subr.bf16.mxu0 %v1661_v7  ;;  %1645 = vmatprep.subr.bf16.mxu1 %v1661_v7 }
  0x1b   :  { %1572 = vmatpush3.bf16.msra.mxu0 %v1661_v7  ;;  %1653 = vmatpush3.bf16.msra.mxu1 %v1661_v7 }
  0x1c   :  { %1573 = vmatprep.subr.bf16.mxu0 %v1662_v8  ;;  %1646 = vmatprep.subr.bf16.mxu1 %v1662_v8 }
  0x1f   :  { %1574 = vmatpush3.bf16.msra.mxu0 %v1662_v8  ;;  %1654 = vmatpush3.bf16.msra.mxu1 %v1662_v8 }
  0x22   :  { %1576 = vmatmul.mubr.bf16.vlgmr.msra.gmra.mxu0 %v1664_v10  ;;  %1608 = vmatmul.mubr.bf16.vlgmr.msra.gmra.mxu1 %v1680_v12 }
  0x23   :  { %1579 = vmatprep.mubr.bf16.mxu0 %v1665_v11  ;;  %1611 = vmatprep.mubr.bf16.mxu1 %v1681_v13 }
  0x2a   :  { %1580 = vmatmul.mubr.bf16.gmra.mxu0 %v1666_v14  ;;  %1612 = vmatmul.mubr.bf16.gmra.mxu1 %v1682_v16 }
  0x2b   :  { %1583 = vmatprep.mubr.bf16.mxu0 %v1667_v15  ;;  %1615 = vmatprep.mubr.bf16.mxu1 %v1683_v17 }
  0x32   :  { %1584 = vmatmul.mubr.bf16.gmra.mxu0 %v1668_v18  ;;  %1616 = vmatmul.mubr.bf16.gmra.mxu1 %v1684_v19 }
  0x33   :  { %1587 = vmatprep.mubr.bf16.mxu0 %v1669_v20  ;;  %1619 = vmatprep.mubr.bf16.mxu1 %v1685_v21 }
  0x3a   :  { %1588 = vmatmul.mubr.bf16.gmra.mxu0 %v1670_v22  ;;  %1620 = vmatmul.mubr.bf16.gmra.mxu1 %v1686_v23 }
  0x3b   :  { %1591 = vmatprep.mubr.bf16.mxu0 %v1671_v24  ;;  %1623 = vmatprep.mubr.bf16.mxu1 %v1687_v25 }
  0x42   :  { %1592 = vmatmul.mubr.bf16.gmra.mxu0 %v1672_v26  ;;  %1624 = vmatmul.mubr.bf16.gmra.mxu1 %v1688_v27 }
  0x43   :  { %1595 = vmatprep.mubr.bf16.mxu0 %v1673_v28  ;;  %1627 = vmatprep.mubr.bf16.mxu1 %v1689_v29 }
  0x4a   :  { %1596 = vmatmul.mubr.bf16.gmra.mxu0 %v1674_v30  ;;  %1628 = vmatmul.mubr.bf16.gmra.mxu1 %v1690_v31 }
  0x4b   :  { %1599 = vmatprep.mubr.bf16.mxu0 %v1675_v32  ;;  %1631 = vmatprep.mubr.bf16.mxu1 %v1691_v33 }
  0x52   :  { %1600 = vmatmul.mubr.bf16.gmra.mxu0 %v1676_v34  ;;  %1632 = vmatmul.mubr.bf16.gmra.mxu1 %v1692_v35 }
  0x53   :  { %1603 = vmatprep.mubr.bf16.mxu0 %v1677_v36  ;;  %1635 = vmatprep.mubr.bf16.mxu1 %v1693_v37 }
  0x5a   :  { %1604 = vmatmul.mubr.bf16.gmra.mxu0 %v1678_v38  ;;  %1636 = vmatmul.mubr.bf16.gmra.mxu1 %v1694_v39 }
  0xe2   :  { %v1577_v40 = vpop.f32.mrf.mxu0  ;;  %v1840_v41 = vpop.f32.mrf.mxu1 }
  0xe3   :  { %v1015_v57 = vmul.f32 %v1577_v40, %v1577_v40 }
  0xe4   :  { %v369_v42 = vpop.f32.mrf.mxu0  ;;  %v1842_v43 = vpop.f32.mrf.mxu1 }
  0xe5   :  { %v1013_v48 = vmul.f32 %v369_v42, %v369_v42 }
  0xe6   :  { %v1578_v44 = vpop.f32.mrf.mxu0  ;;  %v1844_v45 = vpop.f32.mrf.mxu1 }
  0xe7   :  { %v1336_v46 = vpack.c.bf16 %v1578_v44, %v1577_v40  ;;  %v1416_v47 = vpack.c.bf16 %v1844_v45, %v1840_v41  ;;  %v1016_v62 = vmul.f32 %v1578_v44, %v1578_v44 }
  0xe8   :  { %v372_v49 = vpop.f32.mrf.mxu0  ;;  %v1848_v50 = vpop.f32.mrf.mxu1 }
  0xe9   :  { %1488 = vst [vmem:[%s2136_s2 + $0x8] sm:$0xff] %v1336_v46   ;;  %v1331_v51 = vpack.c.bf16 %v372_v49, %v369_v42  ;;  %v944_v52 = vadd.f32 %v372_v49, %v369_v42  ;;  %v1014_v53 = vmul.f32 %v372_v49, %v372_v49  ;;  %1504 = vst [vmem:[%s2136_s2 + $0x88] sm:$0xff] %v1416_v47  }
  0xea   :  { %v1411_v54 = vpack.c.bf16 %v1848_v50, %v1842_v43  ;;  %v1581_v55 = vpop.f32.mrf.mxu0  ;;  %v1858_v56 = vpop.f32.mrf.mxu1 }
  0xeb   :  { %1332 = vst [vmem:[%s2136_s2] sm:$0xff] %v1331_v51   ;;  %v945_v58 = vadd.f32 %v1577_v40, %v944_v52  ;;  %v1077_v59 = vadd.f32 %v1014_v53, %v1013_v48  ;;  %v1019_v17 = vmul.f32 %v1581_v55, %v1581_v55 }
  0xec   :  { %1503 = vst [vmem:[%s2136_s2 + $0x80] sm:$0xff] %v1411_v54   ;;  %v385_v60 = vpop.f32.mrf.mxu0  ;;  %v1866_v61 = vpop.f32.mrf.mxu1 }
  0xed   :  { %v1078_v63 = vadd.f32 %v1077_v59, %v1015_v57  ;;  %v946_v0 = vadd.f32 %v1578_v44, %v945_v58  ;;  %v1017_v4 = vmul.f32 %v385_v60, %v385_v60 }
  0xee   :  { %v1582_v1 = vpop.f32.mrf.mxu0  ;;  %v1868_v2 = vpop.f32.mrf.mxu1 }
  0xef   :  { %v947_v3 = vadd.f32 %v946_v0, %v385_v60  ;;  %v1079_v5 = vadd.f32 %v1078_v63, %v1016_v62  ;;  %v1346_v6 = vpack.c.bf16 %v1582_v1, %v1581_v55  ;;  %v1426_v8 = vpack.c.bf16 %v1868_v2, %v1858_v56 }
  0xf0   :  { %v388_v7 = vpop.f32.mrf.mxu0  ;;  %v1872_v9 = vpop.f32.mrf.mxu1  ;;  %v1020_v22 = vmul.f32 %v1582_v1, %v1582_v1 }
  0xf1   :  { %v1080_v10 = vadd.f32 %v1079_v5, %v1017_v4  ;;  %1490 = vst [vmem:[%s2136_s2 + $0x18] sm:$0xff] %v1346_v6   ;;  %v1341_v11 = vpack.c.bf16 %v388_v7, %v385_v60  ;;  %v948_v12 = vadd.f32 %v947_v3, %v388_v7  ;;  %v1018_v13 = vmul.f32 %v388_v7, %v388_v7 }
  0xf2   :  { %v1585_v14 = vpop.f32.mrf.mxu0  ;;  %1506 = vst [vmem:[%s2136_s2 + $0x98] sm:$0xff] %v1426_v8   ;;  %v1421_v15 = vpack.c.bf16 %v1872_v9, %v1866_v61  ;;  %v1882_v16 = vpop.f32.mrf.mxu1 }
  0xf3   :  { %1489 = vst [vmem:[%s2136_s2 + $0x10] sm:$0xff] %v1341_v11   ;;  %v949_v18 = vadd.f32 %v1581_v55, %v948_v12  ;;  %v1081_v19 = vadd.f32 %v1080_v10, %v1018_v13  ;;  %v1023_v42 = vmul.f32 %v1585_v14, %v1585_v14 }
  0xf4   :  { %v401_v20 = vpop.f32.mrf.mxu0  ;;  %1505 = vst [vmem:[%s2136_s2 + $0x90] sm:$0xff] %v1421_v15   ;;  %v1890_v21 = vpop.f32.mrf.mxu1 }
  0xf5   :  { %v1082_v23 = vadd.f32 %v1081_v19, %v1019_v17  ;;  %v950_v24 = vadd.f32 %v1582_v1, %v949_v18  ;;  %v1021_v28 = vmul.f32 %v401_v20, %v401_v20 }
  0xf6   :  { %v1586_v25 = vpop.f32.mrf.mxu0  ;;  %v1892_v26 = vpop.f32.mrf.mxu1 }
  0xf7   :  { %v951_v27 = vadd.f32 %v950_v24, %v401_v20  ;;  %v1083_v29 = vadd.f32 %v1082_v23, %v1020_v22  ;;  %v1356_v30 = vpack.c.bf16 %v1586_v25, %v1585_v14  ;;  %v1436_v32 = vpack.c.bf16 %v1892_v26, %v1882_v16 }
  0xf8   :  { %v404_v31 = vpop.f32.mrf.mxu0  ;;  %v1896_v33 = vpop.f32.mrf.mxu1  ;;  %v1024_v49 = vmul.f32 %v1586_v25, %v1586_v25 }
  0xf9   :  { %v1084_v34 = vadd.f32 %v1083_v29, %v1021_v28  ;;  %1492 = vst [vmem:[%s2136_s2 + $0x28] sm:$0xff] %v1356_v30   ;;  %v1351_v35 = vpack.c.bf16 %v404_v31, %v401_v20  ;;  %v952_v36 = vadd.f32 %v951_v27, %v404_v31  ;;  %v1022_v37 = vmul.f32 %v404_v31, %v404_v31 }
  0xfa   :  { %v1589_v38 = vpop.f32.mrf.mxu0  ;;  %1508 = vst [vmem:[%s2136_s2 + $0xa8] sm:$0xff] %v1436_v32   ;;  %v1431_v39 = vpack.c.bf16 %v1896_v33, %v1890_v21  ;;  %v1906_v40 = vpop.f32.mrf.mxu1 }
  0xfb   :  { %1491 = vst [vmem:[%s2136_s2 + $0x20] sm:$0xff] %v1351_v35   ;;  %v953_v44 = vadd.f32 %v1585_v14, %v952_v36  ;;  %v1085_v46 = vadd.f32 %v1084_v34, %v1022_v37  ;;  %v1027_v8 = vmul.f32 %v1589_v38, %v1589_v38 }
  0xfc   :  { %v417_v47 = vpop.f32.mrf.mxu0  ;;  %1507 = vst [vmem:[%s2136_s2 + $0xa0] sm:$0xff] %v1431_v39   ;;  %v1914_v48 = vpop.f32.mrf.mxu1 }
  0xfd   :  { %v1086_v51 = vadd.f32 %v1085_v46, %v1023_v42  ;;  %v954_v52 = vadd.f32 %v1586_v25, %v953_v44  ;;  %v1025_v57 = vmul.f32 %v417_v47, %v417_v47 }
  0xfe   :  { %v1590_v53 = vpop.f32.mrf.mxu0  ;;  %v1916_v54 = vpop.f32.mrf.mxu1 }
  0xff   :  { %v955_v55 = vadd.f32 %v954_v52, %v417_v47  ;;  %v1087_v58 = vadd.f32 %v1086_v51, %v1024_v49  ;;  %v1366_v59 = vpack.c.bf16 %v1590_v53, %v1589_v38  ;;  %v1446_v62 = vpack.c.bf16 %v1916_v54, %v1906_v40 }
 0x100   :  { %v420_v60 = vpop.f32.mrf.mxu0  ;;  %v1920_v63 = vpop.f32.mrf.mxu1  ;;  %v1028_v14 = vmul.f32 %v1590_v53, %v1590_v53 }
 0x101   :  { %v1088_v0 = vadd.f32 %v1087_v58, %v1025_v57  ;;  %1494 = vst [vmem:[%s2136_s2 + $0x38] sm:$0xff] %v1366_v59   ;;  %v1361_v1 = vpack.c.bf16 %v420_v60, %v417_v47  ;;  %v956_v3 = vadd.f32 %v955_v55, %v420_v60  ;;  %v1026_v4 = vmul.f32 %v420_v60, %v420_v60 }
 0x102   :  { %v1593_v5 = vpop.f32.mrf.mxu0  ;;  %1510 = vst [vmem:[%s2136_s2 + $0xb8] sm:$0xff] %v1446_v62   ;;  %v1441_v6 = vpack.c.bf16 %v1920_v63, %v1914_v48  ;;  %v1930_v7 = vpop.f32.mrf.mxu1 }
 0x103   :  { %1493 = vst [vmem:[%s2136_s2 + $0x30] sm:$0xff] %v1361_v1   ;;  %v957_v10 = vadd.f32 %v1589_v38, %v956_v3  ;;  %v1089_v11 = vadd.f32 %v1088_v0, %v1026_v4  ;;  %v1031_v37 = vmul.f32 %v1593_v5, %v1593_v5 }
 0x104   :  { %v433_v12 = vpop.f32.mrf.mxu0  ;;  %1509 = vst [vmem:[%s2136_s2 + $0xb0] sm:$0xff] %v1441_v6   ;;  %v1938_v13 = vpop.f32.mrf.mxu1 }
 0x105   :  { %v1090_v15 = vadd.f32 %v1089_v11, %v1027_v8  ;;  %v958_v17 = vadd.f32 %v1590_v53, %v957_v10  ;;  %v1029_v22 = vmul.f32 %v433_v12, %v433_v12 }
 0x106   :  { %v1594_v18 = vpop.f32.mrf.mxu0  ;;  %v1940_v19 = vpop.f32.mrf.mxu1 }
 0x107   :  { %v959_v20 = vadd.f32 %v958_v17, %v433_v12  ;;  %v1091_v23 = vadd.f32 %v1090_v15, %v1028_v14  ;;  %v1376_v24 = vpack.c.bf16 %v1594_v18, %v1593_v5  ;;  %v1456_v27 = vpack.c.bf16 %v1940_v19, %v1930_v7 }
 0x108   :  { %v436_v25 = vpop.f32.mrf.mxu0  ;;  %v1944_v28 = vpop.f32.mrf.mxu1  ;;  %v1032_v46 = vmul.f32 %v1594_v18, %v1594_v18 }
 0x109   :  { %v1092_v29 = vadd.f32 %v1091_v23, %v1029_v22  ;;  %1496 = vst [vmem:[%s2136_s2 + $0x48] sm:$0xff] %v1376_v24   ;;  %v1371_v30 = vpack.c.bf16 %v436_v25, %v433_v12  ;;  %v960_v31 = vadd.f32 %v959_v20, %v436_v25  ;;  %v1030_v32 = vmul.f32 %v436_v25, %v436_v25 }
 0x10a   :  { %v1597_v34 = vpop.f32.mrf.mxu0  ;;  %1512 = vst [vmem:[%s2136_s2 + $0xc8] sm:$0xff] %v1456_v27   ;;  %v1451_v35 = vpack.c.bf16 %v1944_v28, %v1938_v13  ;;  %v1954_v36 = vpop.f32.mrf.mxu1 }
 0x10b   :  { %1495 = vst [vmem:[%s2136_s2 + $0x40] sm:$0xff] %v1371_v30   ;;  %v961_v38 = vadd.f32 %v1593_v5, %v960_v31  ;;  %v1093_v39 = vadd.f32 %v1092_v29, %v1030_v32  ;;  %v1035_v10 = vmul.f32 %v1597_v34, %v1597_v34 }
 0x10c   :  { %v449_v42 = vpop.f32.mrf.mxu0  ;;  %1511 = vst [vmem:[%s2136_s2 + $0xc0] sm:$0xff] %v1451_v35   ;;  %v1962_v44 = vpop.f32.mrf.mxu1 }
 0x10d   :  { %v1094_v47 = vadd.f32 %v1093_v39, %v1031_v37  ;;  %v962_v49 = vadd.f32 %v1594_v18, %v961_v38  ;;  %v1033_v55 = vmul.f32 %v449_v42, %v449_v42 }
 0x10e   :  { %v1598_v51 = vpop.f32.mrf.mxu0  ;;  %v1964_v52 = vpop.f32.mrf.mxu1 }
 0x10f   :  { %v963_v53 = vadd.f32 %v962_v49, %v449_v42  ;;  %v1095_v57 = vadd.f32 %v1094_v47, %v1032_v46  ;;  %v1386_v58 = vpack.c.bf16 %v1598_v51, %v1597_v34  ;;  %v1466_v60 = vpack.c.bf16 %v1964_v52, %v1954_v36 }
 0x110   :  { %v452_v59 = vpop.f32.mrf.mxu0  ;;  %v1968_v62 = vpop.f32.mrf.mxu1  ;;  %v1036_v17 = vmul.f32 %v1598_v51, %v1598_v51 }
 0x111   :  { %v1096_v0 = vadd.f32 %v1095_v57, %v1033_v55  ;;  %1498 = vst [vmem:[%s2136_s2 + $0x58] sm:$0xff] %v1386_v58   ;;  %v1381_v1 = vpack.c.bf16 %v452_v59, %v449_v42  ;;  %v964_v3 = vadd.f32 %v963_v53, %v452_v59  ;;  %v1034_v4 = vmul.f32 %v452_v59, %v452_v59 }
 0x112   :  { %v1601_v5 = vpop.f32.mrf.mxu0  ;;  %1514 = vst [vmem:[%s2136_s2 + $0xd8] sm:$0xff] %v1466_v60   ;;  %v1461_v6 = vpack.c.bf16 %v1968_v62, %v1962_v44  ;;  %v1978_v8 = vpop.f32.mrf.mxu1 }
 0x113   :  { %1497 = vst [vmem:[%s2136_s2 + $0x50] sm:$0xff] %v1381_v1   ;;  %v965_v11 = vadd.f32 %v1597_v34, %v964_v3  ;;  %v1097_v12 = vadd.f32 %v1096_v0, %v1034_v4  ;;  %v1039_v47 = vmul.f32 %v1601_v5, %v1601_v5 }
 0x114   :  { %v465_v14 = vpop.f32.mrf.mxu0  ;;  %1513 = vst [vmem:[%s2136_s2 + $0xd0] sm:$0xff] %v1461_v6   ;;  %v1986_v15 = vpop.f32.mrf.mxu1 }
 0x115   :  { %v1098_v18 = vadd.f32 %v1097_v12, %v1035_v10  ;;  %v966_v20 = vadd.f32 %v1598_v51, %v965_v11  ;;  %v1037_v25 = vmul.f32 %v465_v14, %v465_v14 }
 0x116   :  { %v1602_v22 = vpop.f32.mrf.mxu0  ;;  %v1988_v23 = vpop.f32.mrf.mxu1 }
 0x117   :  { %v967_v24 = vadd.f32 %v966_v20, %v465_v14  ;;  %v1099_v27 = vadd.f32 %v1098_v18, %v1036_v17  ;;  %v1396_v29 = vpack.c.bf16 %v1602_v22, %v1601_v5  ;;  %v1476_v31 = vpack.c.bf16 %v1988_v23, %v1978_v8 }
 0x118   :  { %v468_v30 = vpop.f32.mrf.mxu0  ;;  %v1992_v32 = vpop.f32.mrf.mxu1  ;;  %v1040_v57 = vmul.f32 %v1602_v22, %v1602_v22 }
 0x119   :  { %v1100_v34 = vadd.f32 %v1099_v27, %v1037_v25  ;;  %1500 = vst [vmem:[%s2136_s2 + $0x68] sm:$0xff] %v1396_v29   ;;  %v1391_v35 = vpack.c.bf16 %v468_v30, %v465_v14  ;;  %v968_v37 = vadd.f32 %v967_v24, %v468_v30  ;;  %v1038_v38 = vmul.f32 %v468_v30, %v468_v30 }
 0x11a   :  { %v1605_v39 = vpop.f32.mrf.mxu0  ;;  %1516 = vst [vmem:[%s2136_s2 + $0xe8] sm:$0xff] %v1476_v31   ;;  %v1471_v42 = vpack.c.bf16 %v1992_v32, %v1986_v15  ;;  %v2002_v46 = vpop.f32.mrf.mxu1  ;;  %v1045_v31 = vmul.f32 %v1842_v43, %v1842_v43 }
 0x11b   :  { %1499 = vst [vmem:[%s2136_s2 + $0x60] sm:$0xff] %v1391_v35   ;;  %v969_v49 = vadd.f32 %v1601_v5, %v968_v37  ;;  %v1101_v51 = vadd.f32 %v1100_v34, %v1038_v38  ;;  %v1046_v38 = vmul.f32 %v1848_v50, %v1848_v50 }
 0x11c   :  { %v481_v53 = vpop.f32.mrf.mxu0  ;;  %1515 = vst [vmem:[%s2136_s2 + $0xe0] sm:$0xff] %v1471_v42   ;;  %v2010_v55 = vpop.f32.mrf.mxu1  ;;  %v1047_v42 = vmul.f32 %v1840_v41, %v1840_v41 }
 0x11d   :  { %v1102_v58 = vadd.f32 %v1101_v51, %v1039_v47  ;;  %v970_v59 = vadd.f32 %v1602_v22, %v969_v49  ;;  %v1041_v3 = vmul.f32 %v481_v53, %v481_v53  ;;  %v1043_v22 = vmul.f32 %v1605_v39, %v1605_v39 }
 0x11e   :  { %v1606_v60 = vpop.f32.mrf.mxu0  ;;  %v2012_v0 = vpop.f32.mrf.mxu1  ;;  %v1048_v51 = vmul.f32 %v1844_v45, %v1844_v45 }
 0x11f   :  { %v971_v1 = vadd.f32 %v970_v59, %v481_v53  ;;  %v1103_v4 = vadd.f32 %v1102_v58, %v1040_v57  ;;  %v1406_v6 = vpack.c.bf16 %v1606_v60, %v1605_v39  ;;  %v1486_v5 = vpack.c.bf16 %v2012_v0, %v2002_v46 }
 0x120   :  { %v484_v10 = vpop.f32.mrf.mxu0  ;;  %v2016_v11 = vpop.f32.mrf.mxu1  ;;  %v1044_v27 = vmul.f32 %v1606_v60, %v1606_v60  ;;  %v1049_v58 = vmul.f32 %v1866_v61, %v1866_v61 }
 0x121   :  { %v1104_v12 = vadd.f32 %v1103_v4, %v1041_v3  ;;  %1502 = vst [vmem:[%s2136_s2 + $0x78] sm:$0xff] %v1406_v6   ;;  %v1401_v14 = vpack.c.bf16 %v484_v10, %v481_v53  ;;  %v972_v17 = vadd.f32 %v971_v1, %v484_v10  ;;  %v1042_v18 = vmul.f32 %v484_v10, %v484_v10 }
 0x122   :  { %1518 = vst [vmem:[%s2136_s2 + $0xf8] sm:$0xff] %v1486_v5   ;;  %v1481_v20 = vpack.c.bf16 %v2016_v11, %v2010_v55  ;;  %v1050_v1 = vmul.f32 %v1872_v9, %v1872_v9  ;;  %v1053_v5 = vmul.f32 %v1890_v21, %v1890_v21 }
 0x123   :  { %1501 = vst [vmem:[%s2136_s2 + $0x70] sm:$0xff] %v1401_v14   ;;  %v973_v24 = vadd.f32 %v1605_v39, %v972_v17  ;;  %v1105_v25 = vadd.f32 %v1104_v12, %v1042_v18  ;;  %v1054_v17 = vmul.f32 %v1896_v33, %v1896_v33 }
 0x124   :  { %1517 = vst [vmem:[%s2136_s2 + $0xf0] sm:$0xff] %v1481_v20  }
 0x125   :  { %v974_v29 = vadd.f32 %v1606_v60, %v973_v24  ;;  %v1106_v30 = vadd.f32 %v1105_v25, %v1043_v22  ;;  %v1057_v25 = vmul.f32 %v1914_v48, %v1914_v48 }
 0x127   :  { %v1107_v34 = vadd.f32 %v1106_v30, %v1044_v27  ;;  %v975_v35 = vadd.f32 %v974_v29, %v1842_v43  ;;  %v1058_v30 = vmul.f32 %v1920_v63, %v1920_v63 }
 0x129   :  { %v976_v37 = vadd.f32 %v975_v35, %v1848_v50  ;;  %v1108_v39 = vadd.f32 %v1107_v34, %v1045_v31 }
 0x12b   :  { %v977_v47 = vadd.f32 %v1840_v41, %v976_v37  ;;  %v1109_v49 = vadd.f32 %v1108_v39, %v1046_v38  ;;  %v1051_v41 = vmul.f32 %v1858_v56, %v1858_v56  ;;  %v1061_v38 = vmul.f32 %v1938_v13, %v1938_v13 }
 0x12d   :  { %v1110_v53 = vadd.f32 %v1109_v49, %v1047_v42  ;;  %v978_v57 = vadd.f32 %v1844_v45, %v977_v47  ;;  %v1052_v45 = vmul.f32 %v1868_v2, %v1868_v2  ;;  %v1062_v47 = vmul.f32 %v1944_v28, %v1944_v28 }
 0x12f   :  { %v979_v43 = vadd.f32 %v978_v57, %v1866_v61  ;;  %v1111_v59 = vadd.f32 %v1110_v53, %v1048_v51 }
 0x131   :  { %v1112_v50 = vadd.f32 %v1111_v59, %v1049_v58  ;;  %v980_v60 = vadd.f32 %v979_v43, %v1872_v9  ;;  %v1065_v43 = vmul.f32 %v1962_v44, %v1962_v44 }
 0x133   :  { %v981_v3 = vadd.f32 %v1858_v56, %v980_v60  ;;  %v1113_v4 = vadd.f32 %v1112_v50, %v1050_v1  ;;  %v1055_v56 = vmul.f32 %v1882_v16, %v1882_v16  ;;  %v1066_v50 = vmul.f32 %v1968_v62, %v1968_v62 }
 0x135   :  { %v1114_v6 = vadd.f32 %v1113_v4, %v1051_v41  ;;  %v982_v10 = vadd.f32 %v1868_v2, %v981_v3  ;;  %v1056_v2 = vmul.f32 %v1892_v26, %v1892_v26  ;;  %v1069_v4 = vmul.f32 %v1986_v15, %v1986_v15 }
 0x137   :  { %v983_v61 = vadd.f32 %v982_v10, %v1890_v21  ;;  %v1115_v12 = vadd.f32 %v1114_v6, %v1052_v45  ;;  %v1070_v10 = vmul.f32 %v1992_v32, %v1992_v32 }
 0x139   :  { %v1116_v14 = vadd.f32 %v1115_v12, %v1053_v5  ;;  %v984_v9 = vadd.f32 %v983_v61, %v1896_v33 }
 0x13b   :  { %v985_v18 = vadd.f32 %v1882_v16, %v984_v9  ;;  %v1117_v20 = vadd.f32 %v1116_v14, %v1054_v17  ;;  %v1059_v16 = vmul.f32 %v1906_v40, %v1906_v40  ;;  %v1073_v9 = vmul.f32 %v2010_v55, %v2010_v55 }
 0x13d   :  { %v1118_v22 = vadd.f32 %v1117_v20, %v1055_v56  ;;  %v986_v24 = vadd.f32 %v1892_v26, %v985_v18  ;;  %v1060_v26 = vmul.f32 %v1916_v54, %v1916_v54  ;;  %v1074_v18 = vmul.f32 %v2016_v11, %v2016_v11 }
 0x13f   :  { %v987_v21 = vadd.f32 %v986_v24, %v1914_v48  ;;  %v1119_v27 = vadd.f32 %v1118_v22, %v1056_v2 }
 0x141   :  { %v1120_v29 = vadd.f32 %v1119_v27, %v1057_v25  ;;  %v988_v33 = vadd.f32 %v987_v21, %v1920_v63 }
 0x143   :  { %v989_v31 = vadd.f32 %v1906_v40, %v988_v33  ;;  %v1121_v34 = vadd.f32 %v1120_v29, %v1058_v30  ;;  %v1063_v40 = vmul.f32 %v1930_v7, %v1930_v7 }
 0x145   :  { %v1122_v35 = vadd.f32 %v1121_v34, %v1059_v16  ;;  %v990_v37 = vadd.f32 %v1916_v54, %v989_v31  ;;  %v1064_v54 = vmul.f32 %v1940_v19, %v1940_v19 }
 0x147   :  { %v991_v48 = vadd.f32 %v990_v37, %v1938_v13  ;;  %v1123_v39 = vadd.f32 %v1122_v35, %v1060_v26 }
 0x149   :  { %v1124_v42 = vadd.f32 %v1123_v39, %v1061_v38  ;;  %v992_v63 = vadd.f32 %v991_v48, %v1944_v28 }
 0x14b   :  { %v993_v49 = vadd.f32 %v1930_v7, %v992_v63  ;;  %v1125_v51 = vadd.f32 %v1124_v42, %v1062_v47  ;;  %v1067_v7 = vmul.f32 %v1954_v36, %v1954_v36 }
 0x14d   :  { %v1126_v53 = vadd.f32 %v1125_v51, %v1063_v40  ;;  %v994_v57 = vadd.f32 %v1940_v19, %v993_v49  ;;  %v1068_v19 = vmul.f32 %v1964_v52, %v1964_v52 }
 0x14f   :  { %v995_v13 = vadd.f32 %v994_v57, %v1962_v44  ;;  %v1127_v58 = vadd.f32 %v1126_v53, %v1064_v54 }
 0x151   :  { %v1128_v59 = vadd.f32 %v1127_v58, %v1065_v43  ;;  %v996_v28 = vadd.f32 %v995_v13, %v1968_v62 }
 0x153   :  { %v997_v60 = vadd.f32 %v1954_v36, %v996_v28  ;;  %v1129_v1 = vadd.f32 %v1128_v59, %v1066_v50  ;;  %v1071_v36 = vmul.f32 %v1978_v8, %v1978_v8 }
 0x155   :  { %v1130_v41 = vadd.f32 %v1129_v1, %v1067_v7  ;;  %v998_v3 = vadd.f32 %v1964_v52, %v997_v60  ;;  %v1072_v52 = vmul.f32 %v1988_v23, %v1988_v23 }
 0x157   :  { %v999_v44 = vadd.f32 %v998_v3, %v1986_v15  ;;  %v1131_v45 = vadd.f32 %v1130_v41, %v1068_v19 }
 0x159   :  { %v1132_v6 = vadd.f32 %v1131_v45, %v1069_v4  ;;  %v1000_v62 = vadd.f32 %v999_v44, %v1992_v32 }
 0x15b   :  { %v1001_v61 = vadd.f32 %v1978_v8, %v1000_v62  ;;  %v1133_v5 = vadd.f32 %v1132_v6, %v1070_v10  ;;  %v1075_v8 = vmul.f32 %v2002_v46, %v2002_v46 }
 0x15d   :  { %v1134_v12 = vadd.f32 %v1133_v5, %v1071_v36  ;;  %v1002_v14 = vadd.f32 %v1988_v23, %v1001_v61  ;;  %v1076_v23 = vmul.f32 %v2012_v0, %v2012_v0 }
 0x15f   :  { %v1003_v15 = vadd.f32 %v1002_v14, %v2010_v55  ;;  %v1135_v17 = vadd.f32 %v1134_v12, %v1072_v52 }
 0x161   :  { %v1136_v56 = vadd.f32 %v1135_v17, %v1073_v9  ;;  %v1004_v32 = vadd.f32 %v1003_v15, %v2016_v11 }
 0x163   :  { %v1005_v20 = vadd.f32 %v2002_v46, %v1004_v32  ;;  %v1137_v2 = vadd.f32 %v1136_v56, %v1074_v18 }
 0x165   :  { %v1006_v22 = vadd.f32 %v2012_v0, %v1005_v20  ;;  %v1138_v24 = vadd.f32 %v1137_v2, %v1075_v8 }
 0x167   :  { %v1007_v55 = vrot.slane %v1006_v22, 4  ;;  %v1139_v21 = vadd.f32 %v1138_v24, %v1076_v23 }
 0x169   :  { %v1008_v25 = vadd.f32 %v1007_v55, %v1006_v22  ;;  %v1140_v27 = vrot.slane %v1139_v21, 4 }
 0x16b   :  { %v1009_v29 = vrot.slane %v1008_v25, 2  ;;  %v1141_v33 = vadd.f32 %v1140_v27, %v1139_v21 }
 0x16d   :  { %v1010_v30 = vadd.f32 %v1009_v29, %v1008_v25  ;;  %v1142_v11 = vrot.slane %v1141_v33, 2 }
 0x16f   :  { %v1011_v16 = vrot.slane %v1010_v30, 1  ;;  %v1143_v31 = vadd.f32 %v1142_v11, %v1141_v33 }
 0x171   :  { %v1012_v34 = vadd.f32 %v1011_v16, %v1010_v30  ;;  %v1144_v26 = vrot.slane %v1143_v31, 1 }
 0x173   :  { %v1145_v46 = vadd.f32 %v1144_v26, %v1143_v31  ;;  %1146 = vst [vmem:[%s2137_s3] sm:$0xff] %v1012_v34 }
 0x175   :  { %1147 = vst [vmem:[%s2138_s4] sm:$0xff] %v1145_v46 }

// kernel: _forward_impl.9
= control target key start
LH: loop header
LB: loop body
LE: loop exit
PB: predicated region body
PF: predicated region fallthrough
CT: control target
= control target key end

     0   :  { %s1631_s0 = inlined_call_operand.vmem [shape: bf16[512,128], index: 0, kind: input, shape index: {}]   ;;  %s1632_s1 = inlined_call_operand.vmem [shape: f32[1,128], index: 1, kind: input, shape index: {}]   ;;  %s1633_s2 = inlined_call_operand.vmem [shape: f32[1,128], index: 2, kind: input, shape index: {}]   ;;  %s1634_s3 = inlined_call_operand.vmem [shape: bf16[512,128], index: 3, kind: output, shape index: {}]  }
   0x1   :  { %v931_v0 = vld [vmem:[%s1631_s0] sm:$0xff]   ;;  %v1218_v4 = vld [vmem:[%s1631_s0 + $0x8] sm:$0xff]   ;;  %v1219_v5 = vld [vmem:[%s1631_s0 + $0x10] sm:$0xff]  }
   0x2   :  { %v1306_v1 = vld [vmem:[%s1632_s1] ss:$0 sm:$0xff]  ;;  %v932_v2 = vunpack.c.l.bf16 %v931_v0  ;;  %v933_v3 = vunpack.c.h.bf16 %v931_v0  ;;  %v1220_v6 = vld [vmem:[%s1631_s0 + $0x18] sm:$0xff]   ;;  %v936_v8 = vunpack.c.l.bf16 %v1218_v4  ;;  %v937_v9 = vunpack.c.h.bf16 %v1218_v4  ;;  %v1222_v35 = vld [vmem:[%s1631_s0 + $0x28] sm:$0xff]  }
   0x3   :  { %v1320_v7 = vld [vmem:[%s1633_s2] ss:$0 sm:$0xff]  ;;  %v940_v10 = vunpack.c.l.bf16 %v1219_v5  ;;  %v941_v11 = vunpack.c.h.bf16 %v1219_v5  ;;  %v944_v14 = vunpack.c.l.bf16 %v1220_v6  ;;  %v945_v15 = vunpack.c.h.bf16 %v1220_v6  ;;  %v1223_v48 = vld [vmem:[%s1631_s0 + $0x30] sm:$0xff]   ;;  %v1224_v4 = vld [vmem:[%s1631_s0 + $0x38] sm:$0xff]  }
   0x4   :  { %v149_v12 = vmul.f32 %v932_v2, %v1306_v1  ;;  %v150_v13 = vmul.f32 %v933_v3, %v1306_v1  ;;  %v151_v16 = vmul.f32 %v936_v8, %v1306_v1  ;;  %v152_v17 = vmul.f32 %v937_v9, %v1306_v1  ;;  %v1221_v34 = vld [vmem:[%s1631_s0 + $0x20] sm:$0xff]  }
   0x5   :  { %v153_v18 = vmul.f32 %v940_v10, %v1306_v1  ;;  %v154_v19 = vmul.f32 %v941_v11, %v1306_v1  ;;  %v155_v22 = vmul.f32 %v944_v14, %v1306_v1  ;;  %v156_v23 = vmul.f32 %v945_v15, %v1306_v1  ;;  %v1225_v15 = vld [vmem:[%s1631_s0 + $0x40] sm:$0xff]  }
   0x6   :  { %v220_v20 = vadd.f32 %v1320_v7, %v149_v12  ;;  %v221_v21 = vadd.f32 %v1320_v7, %v150_v13  ;;  %v222_v24 = vadd.f32 %v1320_v7, %v151_v16  ;;  %v223_v25 = vadd.f32 %v1320_v7, %v152_v17 }
   0x7   :  { %v224_v26 = vadd.f32 %v1320_v7, %v153_v18  ;;  %v225_v27 = vadd.f32 %v1320_v7, %v154_v19  ;;  %v226_v42 = vadd.f32 %v1320_v7, %v155_v22  ;;  %v227_v43 = vadd.f32 %v1320_v7, %v156_v23 }
   0x8   :  { %vm284_vm0 = vcmp.ge.f32.partialorder %v220_v20, 0.0  ;;  %vm285_vm1 = vcmp.ge.f32.partialorder %v221_v21, 0.0  ;;  %v348_v28 = vmul.f32 0.2, %v220_v20  ;;  %v349_v29 = vmul.f32 0.2, %v221_v21 }
   0x9   :  { %vm286_vm2 = vcmp.ge.f32.partialorder %v222_v24, 0.0  ;;  %vm287_vm3 = vcmp.ge.f32.partialorder %v223_v25, 0.0  ;;  %v350_v30 = vmul.f32 0.2, %v222_v24  ;;  %v351_v31 = vmul.f32 0.2, %v223_v25 }
   0xa   :  { %v412_v32 = vsel %vm284_vm0, %v220_v20, %v348_v28  ;;  %v413_v33 = vsel %vm285_vm1, %v221_v21, %v349_v29  ;;  %vm288_vm4 = vcmp.ge.f32.partialorder %v224_v26, 0.0  ;;  %vm289_vm5 = vcmp.ge.f32.partialorder %v225_v27, 0.0 }
   0xb   :  { %v1061_v36 = vpack.c.bf16 %v413_v33, %v412_v32  ;;  %v414_v37 = vsel %vm286_vm2, %v222_v24, %v350_v30  ;;  %v415_v38 = vsel %vm287_vm3, %v223_v25, %v351_v31  ;;  %v352_v39 = vmul.f32 0.2, %v224_v26 }
   0xc   :  { %v1066_v40 = vpack.c.bf16 %v415_v38, %v414_v37  ;;  %v353_v41 = vmul.f32 0.2, %v225_v27  ;;  %v948_v45 = vunpack.c.l.bf16 %v1221_v34  ;;  %v949_v46 = vunpack.c.h.bf16 %v1221_v34 }
   0xd   :  { %1062 = vst [vmem:[%s1634_s3] sm:$0xff] %v1061_v36   ;;  %v416_v44 = vsel %vm288_vm4, %v224_v26, %v352_v39  ;;  %v952_v47 = vunpack.c.l.bf16 %v1222_v35  ;;  %vm290_vm6 = vcmp.ge.f32.partialorder %v226_v42, 0.0  ;;  %vm291_vm7 = vcmp.ge.f32.partialorder %v227_v43, 0.0  ;;  %v1226_v26 = vld [vmem:[%s1631_s0 + $0x48] sm:$0xff]  }
   0xe   :  { %1249 = vst [vmem:[%s1634_s3 + $0x8] sm:$0xff] %v1066_v40   ;;  %v417_v49 = vsel %vm289_vm5, %v225_v27, %v353_v41  ;;  %v354_v50 = vmul.f32 0.2, %v226_v42  ;;  %v355_v52 = vmul.f32 0.2, %v227_v43  ;;  %v157_v53 = vmul.f32 %v948_v45, %v1306_v1  ;;  %v1227_v27 = vld [vmem:[%s1631_s0 + $0x50] sm:$0xff]  }
   0xf   :  { %v1071_v51 = vpack.c.bf16 %v417_v49, %v416_v44  ;;  %v158_v54 = vmul.f32 %v949_v46, %v1306_v1  ;;  %v953_v56 = vunpack.c.h.bf16 %v1222_v35  ;;  %v159_v57 = vmul.f32 %v952_v47, %v1306_v1 }
  0x10   :  { %v418_v55 = vsel %vm290_vm6, %v226_v42, %v354_v50  ;;  %v956_v58 = vunpack.c.l.bf16 %v1223_v48  ;;  %v419_v59 = vsel %vm291_vm7, %v227_v43, %v355_v52  ;;  %v228_v60 = vadd.f32 %v1320_v7, %v157_v53 }
  0x11   :  { %1250 = vst [vmem:[%s1634_s3 + $0x10] sm:$0xff] %v1071_v51   ;;  %v229_v61 = vadd.f32 %v1320_v7, %v158_v54  ;;  %v957_v62 = vunpack.c.h.bf16 %v1223_v48  ;;  %v1076_v63 = vpack.c.bf16 %v419_v59, %v418_v55  ;;  %v160_v0 = vmul.f32 %v953_v56, %v1306_v1  ;;  %v1228_v55 = vld [vmem:[%s1631_s0 + $0x58] sm:$0xff]  }
  0x12   :  { %v230_v2 = vadd.f32 %v1320_v7, %v159_v57  ;;  %v161_v3 = vmul.f32 %v956_v58, %v1306_v1  ;;  %vm292_vm8 = vcmp.ge.f32.partialorder %v228_v60, 0.0  ;;  %v356_v5 = vmul.f32 0.2, %v228_v60 }
  0x13   :  { %vm293_vm9 = vcmp.ge.f32.partialorder %v229_v61, 0.0  ;;  %v357_v6 = vmul.f32 0.2, %v229_v61  ;;  %1251 = vst [vmem:[%s1634_s3 + $0x18] sm:$0xff] %v1076_v63   ;;  %v231_v8 = vadd.f32 %v1320_v7, %v160_v0  ;;  %v162_v10 = vmul.f32 %v957_v62, %v1306_v1 }
  0x14   :  { %vm294_vm10 = vcmp.ge.f32.partialorder %v230_v2, 0.0  ;;  %v358_v9 = vmul.f32 0.2, %v230_v2  ;;  %v420_v11 = vsel %vm292_vm8, %v228_v60, %v356_v5  ;;  %v232_v13 = vadd.f32 %v1320_v7, %v161_v3  ;;  %v1229_v60 = vld [vmem:[%s1631_s0 + $0x60] sm:$0xff]  }
  0x15   :  { %v421_v12 = vsel %vm293_vm9, %v229_v61, %v357_v6  ;;  %v960_v14 = vunpack.c.l.bf16 %v1224_v4  ;;  %vm295_vm11 = vcmp.ge.f32.partialorder %v231_v8, 0.0  ;;  %v359_v17 = vmul.f32 0.2, %v231_v8 }
  0x16   :  { %v1081_v16 = vpack.c.bf16 %v421_v12, %v420_v11  ;;  %v422_v18 = vsel %vm294_vm10, %v230_v2, %v358_v9  ;;  %v233_v19 = vadd.f32 %v1320_v7, %v162_v10  ;;  %vm296_vm12 = vcmp.ge.f32.partialorder %v232_v13, 0.0  ;;  %v1230_v9 = vld [vmem:[%s1631_s0 + $0x68] sm:$0xff]  }
  0x17   :  { %v360_v20 = vmul.f32 0.2, %v232_v13  ;;  %v961_v21 = vunpack.c.h.bf16 %v1224_v4  ;;  %v423_v22 = vsel %vm295_vm11, %v231_v8, %v359_v17  ;;  %v163_v23 = vmul.f32 %v960_v14, %v1306_v1 }
  0x18   :  { %1252 = vst [vmem:[%s1634_s3 + $0x20] sm:$0xff] %v1081_v16   ;;  %v964_v24 = vunpack.c.l.bf16 %v1225_v15  ;;  %v965_v25 = vunpack.c.h.bf16 %v1225_v15  ;;  %v1086_v28 = vpack.c.bf16 %v423_v22, %v422_v18  ;;  %vm297_vm13 = vcmp.ge.f32.partialorder %v233_v19, 0.0 }
  0x19   :  { %v361_v29 = vmul.f32 0.2, %v233_v19  ;;  %v424_v30 = vsel %vm296_vm12, %v232_v13, %v360_v20  ;;  %v164_v31 = vmul.f32 %v961_v21, %v1306_v1  ;;  %v234_v32 = vadd.f32 %v1320_v7, %v163_v23 }
  0x1a   :  { %v165_v33 = vmul.f32 %v964_v24, %v1306_v1  ;;  %v166_v34 = vmul.f32 %v965_v25, %v1306_v1  ;;  %1253 = vst [vmem:[%s1634_s3 + $0x28] sm:$0xff] %v1086_v28   ;;  %v968_v36 = vunpack.c.l.bf16 %v1226_v26  ;;  %v969_v37 = vunpack.c.h.bf16 %v1226_v26  ;;  %v1231_v28 = vld [vmem:[%s1631_s0 + $0x70] sm:$0xff]  }
  0x1b   :  { %v425_v35 = vsel %vm297_vm13, %v233_v19, %v361_v29  ;;  %v972_v38 = vunpack.c.l.bf16 %v1227_v27  ;;  %v235_v40 = vadd.f32 %v1320_v7, %v164_v31  ;;  %vm298_vm14 = vcmp.ge.f32.partialorder %v234_v32, 0.0 }
  0x1c   :  { %v1091_v39 = vpack.c.bf16 %v425_v35, %v424_v30  ;;  %v362_v41 = vmul.f32 0.2, %v234_v32  ;;  %v236_v42 = vadd.f32 %v1320_v7, %v165_v33  ;;  %v237_v43 = vadd.f32 %v1320_v7, %v166_v34 }
  0x1d   :  { %v167_v44 = vmul.f32 %v968_v36, %v1306_v1  ;;  %v168_v45 = vmul.f32 %v969_v37, %v1306_v1  ;;  %vm299_vm15 = vcmp.ge.f32.partialorder %v235_v40, 0.0  ;;  %v363_v46 = vmul.f32 0.2, %v235_v40  ;;  %v1232_v37 = vld [vmem:[%s1631_s0 + $0x78] sm:$0xff]  }
  0x1e   :  { %1254 = vst [vmem:[%s1634_s3 + $0x30] sm:$0xff] %v1091_v39   ;;  %v426_v47 = vsel %vm298_vm14, %v234_v32, %v362_v41  ;;  %v973_v48 = vunpack.c.h.bf16 %v1227_v27  ;;  %vm300_vm0 = vcmp.ge.f32.partialorder %v236_v42, 0.0  ;;  %vm301_vm1 = vcmp.ge.f32.partialorder %v237_v43, 0.0 }
  0x1f   :  { %v364_v49 = vmul.f32 0.2, %v236_v42  ;;  %v365_v50 = vmul.f32 0.2, %v237_v43  ;;  %v427_v51 = vsel %vm299_vm15, %v235_v40, %v363_v46  ;;  %v238_v52 = vadd.f32 %v1320_v7, %v167_v44 }
  0x20   :  { %v239_v53 = vadd.f32 %v1320_v7, %v168_v45  ;;  %v169_v54 = vmul.f32 %v972_v38, %v1306_v1  ;;  %v1096_v56 = vpack.c.bf16 %v427_v51, %v426_v47  ;;  %v170_v59 = vmul.f32 %v973_v48, %v1306_v1 }
  0x21   :  { %v428_v57 = vsel %vm300_vm0, %v236_v42, %v364_v49  ;;  %v429_v58 = vsel %vm301_vm1, %v237_v43, %v365_v50  ;;  %vm302_vm2 = vcmp.ge.f32.partialorder %v238_v52, 0.0  ;;  %v366_v62 = vmul.f32 0.2, %v238_v52  ;;  %v1233_v42 = vld [vmem:[%s1631_s0 + $0x80] sm:$0xff]   ;;  %v1234_v50 = vld [vmem:[%s1631_s0 + $0x88] sm:$0xff]  }
  0x22   :  { %v1101_v61 = vpack.c.bf16 %v429_v58, %v428_v57  ;;  %vm303_vm3 = vcmp.ge.f32.partialorder %v239_v53, 0.0  ;;  %1255 = vst [vmem:[%s1634_s3 + $0x38] sm:$0xff] %v1096_v56   ;;  %v367_v63 = vmul.f32 0.2, %v239_v53  ;;  %v240_v0 = vadd.f32 %v1320_v7, %v169_v54 }
  0x23   :  { %v241_v2 = vadd.f32 %v1320_v7, %v170_v59  ;;  %v976_v3 = vunpack.c.l.bf16 %v1228_v55  ;;  %v430_v4 = vsel %vm302_vm2, %v238_v52, %v366_v62  ;;  %v977_v5 = vunpack.c.h.bf16 %v1228_v55 }
  0x24   :  { %1256 = vst [vmem:[%s1634_s3 + $0x40] sm:$0xff] %v1101_v61   ;;  %v980_v6 = vunpack.c.l.bf16 %v1229_v60  ;;  %v981_v8 = vunpack.c.h.bf16 %v1229_v60  ;;  %v431_v10 = vsel %vm303_vm3, %v239_v53, %v367_v63  ;;  %vm304_vm4 = vcmp.ge.f32.partialorder %v240_v0, 0.0 }
  0x25   :  { %vm305_vm5 = vcmp.ge.f32.partialorder %v241_v2, 0.0  ;;  %v368_v11 = vmul.f32 0.2, %v240_v0  ;;  %v1106_v12 = vpack.c.bf16 %v431_v10, %v430_v4  ;;  %v369_v13 = vmul.f32 0.2, %v241_v2 }
  0x26   :  { %v171_v14 = vmul.f32 %v976_v3, %v1306_v1  ;;  %v172_v15 = vmul.f32 %v977_v5, %v1306_v1  ;;  %v173_v17 = vmul.f32 %v980_v6, %v1306_v1  ;;  %v174_v18 = vmul.f32 %v981_v8, %v1306_v1 }
  0x27   :  { %v432_v16 = vsel %vm304_vm4, %v240_v0, %v368_v11  ;;  %v984_v19 = vunpack.c.l.bf16 %v1230_v9  ;;  %1257 = vst [vmem:[%s1634_s3 + $0x48] sm:$0xff] %v1106_v12   ;;  %v433_v20 = vsel %vm305_vm5, %v241_v2, %v369_v13  ;;  %v985_v23 = vunpack.c.h.bf16 %v1230_v9 }
  0x28   :  { %v242_v21 = vadd.f32 %v1320_v7, %v171_v14  ;;  %v243_v22 = vadd.f32 %v1320_v7, %v172_v15  ;;  %v1111_v24 = vpack.c.bf16 %v433_v20, %v432_v16  ;;  %v244_v25 = vadd.f32 %v1320_v7, %v173_v17  ;;  %v1235_v15 = vld [vmem:[%s1631_s0 + $0x90] sm:$0xff]   ;;  %v1236_v20 = vld [vmem:[%s1631_s0 + $0x98] sm:$0xff]  }
  0x29   :  { %v245_v26 = vadd.f32 %v1320_v7, %v174_v18  ;;  %v175_v27 = vmul.f32 %v984_v19, %v1306_v1  ;;  %v176_v35 = vmul.f32 %v985_v23, %v1306_v1  ;;  %v988_v41 = vunpack.c.l.bf16 %v1231_v28 }
  0x2a   :  { %vm306_vm6 = vcmp.ge.f32.partialorder %v242_v21, 0.0  ;;  %vm307_vm7 = vcmp.ge.f32.partialorder %v243_v22, 0.0  ;;  %v370_v29 = vmul.f32 0.2, %v242_v21  ;;  %v371_v30 = vmul.f32 0.2, %v243_v22 }
  0x2b   :  { %1258 = vst [vmem:[%s1634_s3 + $0x50] sm:$0xff] %v1111_v24   ;;  %vm308_vm8 = vcmp.ge.f32.partialorder %v244_v25, 0.0  ;;  %vm309_vm9 = vcmp.ge.f32.partialorder %v245_v26, 0.0  ;;  %v372_v31 = vmul.f32 0.2, %v244_v25  ;;  %v246_v36 = vadd.f32 %v1320_v7, %v175_v27 }
  0x2c   :  { %v373_v32 = vmul.f32 0.2, %v245_v26  ;;  %v434_v33 = vsel %vm306_vm6, %v242_v21, %v370_v29  ;;  %v435_v34 = vsel %vm307_vm7, %v243_v22, %v371_v30  ;;  %v247_v44 = vadd.f32 %v1320_v7, %v176_v35  ;;  %v1237_v21 = vld [vmem:[%s1631_s0 + $0xa0] sm:$0xff]  }
  0x2d   :  { %v1116_v38 = vpack.c.bf16 %v435_v34, %v434_v33  ;;  %v436_v39 = vsel %vm308_vm8, %v244_v25, %v372_v31  ;;  %vm310_vm10 = vcmp.ge.f32.partialorder %v246_v36, 0.0  ;;  %v374_v45 = vmul.f32 0.2, %v246_v36 }
  0x2e   :  { %v437_v40 = vsel %vm309_vm9, %v245_v26, %v373_v32  ;;  %v989_v46 = vunpack.c.h.bf16 %v1231_v28  ;;  %v177_v47 = vmul.f32 %v988_v41, %v1306_v1  ;;  %v992_v48 = vunpack.c.l.bf16 %v1232_v37 }
  0x2f   :  { %v1121_v43 = vpack.c.bf16 %v437_v40, %v436_v39  ;;  %1259 = vst [vmem:[%s1634_s3 + $0x58] sm:$0xff] %v1116_v38   ;;  %v993_v49 = vunpack.c.h.bf16 %v1232_v37  ;;  %vm311_vm11 = vcmp.ge.f32.partialorder %v247_v44, 0.0  ;;  %v375_v51 = vmul.f32 0.2, %v247_v44  ;;  %v1238_v40 = vld [vmem:[%s1631_s0 + $0xa8] sm:$0xff]  }
  0x30   :  { %v438_v52 = vsel %vm310_vm10, %v246_v36, %v374_v45  ;;  %v996_v53 = vunpack.c.l.bf16 %v1233_v42  ;;  %v178_v54 = vmul.f32 %v989_v46, %v1306_v1  ;;  %v248_v55 = vadd.f32 %v1320_v7, %v177_v47 }
  0x31   :  { %1260 = vst [vmem:[%s1634_s3 + $0x60] sm:$0xff] %v1121_v43   ;;  %v179_v56 = vmul.f32 %v992_v48, %v1306_v1  ;;  %v180_v57 = vmul.f32 %v993_v49, %v1306_v1  ;;  %v439_v58 = vsel %vm311_vm11, %v247_v44, %v375_v51  ;;  %v997_v59 = vunpack.c.h.bf16 %v1233_v42 }
  0x32   :  { %v181_v60 = vmul.f32 %v996_v53, %v1306_v1  ;;  %v1000_v61 = vunpack.c.l.bf16 %v1234_v50  ;;  %v1126_v62 = vpack.c.bf16 %v439_v58, %v438_v52  ;;  %v249_v63 = vadd.f32 %v1320_v7, %v178_v54 }
  0x33   :  { %vm312_vm12 = vcmp.ge.f32.partialorder %v248_v55, 0.0  ;;  %v376_v0 = vmul.f32 0.2, %v248_v55  ;;  %v250_v2 = vadd.f32 %v1320_v7, %v179_v56  ;;  %v251_v3 = vadd.f32 %v1320_v7, %v180_v57 }
  0x34   :  { %v182_v4 = vmul.f32 %v997_v59, %v1306_v1  ;;  %v252_v5 = vadd.f32 %v1320_v7, %v181_v60  ;;  %1261 = vst [vmem:[%s1634_s3 + $0x68] sm:$0xff] %v1126_v62   ;;  %vm313_vm13 = vcmp.ge.f32.partialorder %v249_v63, 0.0  ;;  %v377_v6 = vmul.f32 0.2, %v249_v63 }
  0x35   :  { %v440_v8 = vsel %vm312_vm12, %v248_v55, %v376_v0  ;;  %v1001_v9 = vunpack.c.h.bf16 %v1234_v50  ;;  %vm314_vm14 = vcmp.ge.f32.partialorder %v250_v2, 0.0  ;;  %vm315_vm15 = vcmp.ge.f32.partialorder %v251_v3, 0.0  ;;  %v1239_v0 = vld [vmem:[%s1631_s0 + $0xb0] sm:$0xff]  }
  0x36   :  { %v378_v10 = vmul.f32 0.2, %v250_v2  ;;  %v379_v11 = vmul.f32 0.2, %v251_v3  ;;  %v441_v12 = vsel %vm313_vm13, %v249_v63, %v377_v6  ;;  %v253_v13 = vadd.f32 %v1320_v7, %v182_v4 }
  0x37   :  { %vm316_vm0 = vcmp.ge.f32.partialorder %v252_v5, 0.0  ;;  %v380_v14 = vmul.f32 0.2, %v252_v5  ;;  %v1131_v16 = vpack.c.bf16 %v441_v12, %v440_v8  ;;  %v183_v19 = vmul.f32 %v1000_v61, %v1306_v1 }
  0x38   :  { %v442_v17 = vsel %vm314_vm14, %v250_v2, %v378_v10  ;;  %v443_v18 = vsel %vm315_vm15, %v251_v3, %v379_v11  ;;  %vm317_vm1 = vcmp.ge.f32.partialorder %v253_v13, 0.0  ;;  %v381_v23 = vmul.f32 0.2, %v253_v13  ;;  %v1240_v2 = vld [vmem:[%s1631_s0 + $0xb8] sm:$0xff]  }
  0x39   :  { %v1136_v22 = vpack.c.bf16 %v443_v18, %v442_v17  ;;  %v444_v24 = vsel %vm316_vm0, %v252_v5, %v380_v14  ;;  %1262 = vst [vmem:[%s1634_s3 + $0x70] sm:$0xff] %v1131_v16   ;;  %v184_v25 = vmul.f32 %v1001_v9, %v1306_v1  ;;  %v254_v26 = vadd.f32 %v1320_v7, %v183_v19  ;;  %v1241_v18 = vld [vmem:[%s1631_s0 + $0xc0] sm:$0xff]  }
  0x3a   :  { %v1004_v27 = vunpack.c.l.bf16 %v1235_v15  ;;  %v1005_v28 = vunpack.c.h.bf16 %v1235_v15  ;;  %v445_v29 = vsel %vm317_vm1, %v253_v13, %v381_v23  ;;  %v1008_v30 = vunpack.c.l.bf16 %v1236_v20 }
  0x3b   :  { %1263 = vst [vmem:[%s1634_s3 + $0x78] sm:$0xff] %v1136_v22   ;;  %v1009_v31 = vunpack.c.h.bf16 %v1236_v20  ;;  %v1012_v32 = vunpack.c.l.bf16 %v1237_v21  ;;  %v1141_v33 = vpack.c.bf16 %v445_v29, %v444_v24  ;;  %v255_v34 = vadd.f32 %v1320_v7, %v184_v25 }
  0x3c   :  { %vm318_vm2 = vcmp.ge.f32.partialorder %v254_v26, 0.0  ;;  %v382_v35 = vmul.f32 0.2, %v254_v26  ;;  %v185_v36 = vmul.f32 %v1004_v27, %v1306_v1  ;;  %v186_v37 = vmul.f32 %v1005_v28, %v1306_v1 }
  0x3d   :  { %v187_v38 = vmul.f32 %v1008_v30, %v1306_v1  ;;  %v188_v39 = vmul.f32 %v1009_v31, %v1306_v1  ;;  %1264 = vst [vmem:[%s1634_s3 + $0x80] sm:$0xff] %v1141_v33   ;;  %vm319_vm3 = vcmp.ge.f32.partialorder %v255_v34, 0.0  ;;  %v383_v41 = vmul.f32 0.2, %v255_v34 }
  0x3e   :  { %v446_v42 = vsel %vm318_vm2, %v254_v26, %v382_v35  ;;  %v1013_v43 = vunpack.c.h.bf16 %v1237_v21  ;;  %v256_v44 = vadd.f32 %v1320_v7, %v185_v36  ;;  %v257_v45 = vadd.f32 %v1320_v7, %v186_v37  ;;  %v1242_v36 = vld [vmem:[%s1631_s0 + $0xc8] sm:$0xff]  }
  0x3f   :  { %v258_v46 = vadd.f32 %v1320_v7, %v187_v38  ;;  %v259_v47 = vadd.f32 %v1320_v7, %v188_v39  ;;  %v447_v48 = vsel %vm319_vm3, %v255_v34, %v383_v41  ;;  %v189_v49 = vmul.f32 %v1012_v32, %v1306_v1 }
  0x40   :  { %v190_v50 = vmul.f32 %v1013_v43, %v1306_v1  ;;  %v1016_v51 = vunpack.c.l.bf16 %v1238_v40  ;;  %v1146_v52 = vpack.c.bf16 %v447_v48, %v446_v42  ;;  %vm320_vm4 = vcmp.ge.f32.partialorder %v256_v44, 0.0  ;;  %v1243_v42 = vld [vmem:[%s1631_s0 + $0xd0] sm:$0xff]  }
  0x41   :  { %vm321_vm5 = vcmp.ge.f32.partialorder %v257_v45, 0.0  ;;  %v384_v53 = vmul.f32 0.2, %v256_v44  ;;  %v385_v54 = vmul.f32 0.2, %v257_v45  ;;  %vm322_vm6 = vcmp.ge.f32.partialorder %v258_v46, 0.0 }
  0x42   :  { %vm323_vm7 = vcmp.ge.f32.partialorder %v259_v47, 0.0  ;;  %v386_v55 = vmul.f32 0.2, %v258_v46  ;;  %1265 = vst [vmem:[%s1634_s3 + $0x88] sm:$0xff] %v1146_v52   ;;  %v387_v57 = vmul.f32 0.2, %v259_v47  ;;  %v260_v58 = vadd.f32 %v1320_v7, %v189_v49 }
  0x43   :  { %v448_v56 = vsel %vm320_vm4, %v256_v44, %v384_v53  ;;  %v261_v59 = vadd.f32 %v1320_v7, %v190_v50  ;;  %v449_v60 = vsel %vm321_vm5, %v257_v45, %v385_v54  ;;  %v1017_v62 = vunpack.c.h.bf16 %v1238_v40 }
  0x44   :  { %v450_v61 = vsel %vm322_vm6, %v258_v46, %v386_v55  ;;  %v191_v63 = vmul.f32 %v1016_v51, %v1306_v1  ;;  %v1151_v3 = vpack.c.bf16 %v449_v60, %v448_v56  ;;  %v451_v4 = vsel %vm323_vm7, %v259_v47, %v387_v57  ;;  %v1244_v55 = vld [vmem:[%s1631_s0 + $0xd8] sm:$0xff]  }
  0x45   :  { %vm324_vm8 = vcmp.ge.f32.partialorder %v260_v58, 0.0  ;;  %vm325_vm9 = vcmp.ge.f32.partialorder %v261_v59, 0.0  ;;  %v1156_v5 = vpack.c.bf16 %v451_v4, %v450_v61  ;;  %v388_v6 = vmul.f32 0.2, %v260_v58 }
  0x46   :  { %v389_v8 = vmul.f32 0.2, %v261_v59  ;;  %v192_v9 = vmul.f32 %v1017_v62, %v1306_v1  ;;  %1266 = vst [vmem:[%s1634_s3 + $0x90] sm:$0xff] %v1151_v3   ;;  %v262_v10 = vadd.f32 %v1320_v7, %v191_v63  ;;  %v1020_v11 = vunpack.c.l.bf16 %v1239_v0 }
  0x47   :  { %v1021_v12 = vunpack.c.h.bf16 %v1239_v0  ;;  %v1024_v13 = vunpack.c.l.bf16 %v1240_v2  ;;  %1267 = vst [vmem:[%s1634_s3 + $0x98] sm:$0xff] %v1156_v5   ;;  %v452_v14 = vsel %vm324_vm8, %v260_v58, %v388_v6  ;;  %v1025_v17 = vunpack.c.h.bf16 %v1240_v2 }
  0x48   :  { %v453_v15 = vsel %vm325_vm9, %v261_v59, %v389_v8  ;;  %v263_v16 = vadd.f32 %v1320_v7, %v192_v9  ;;  %vm326_vm10 = vcmp.ge.f32.partialorder %v262_v10, 0.0  ;;  %v390_v20 = vmul.f32 0.2, %v262_v10 }
  0x49   :  { %v1161_v19 = vpack.c.bf16 %v453_v15, %v452_v14  ;;  %v193_v21 = vmul.f32 %v1020_v11, %v1306_v1  ;;  %v194_v23 = vmul.f32 %v1021_v12, %v1306_v1  ;;  %v195_v24 = vmul.f32 %v1024_v13, %v1306_v1  ;;  %v1246_v14 = vld [vmem:[%s1631_s0 + $0xe8] sm:$0xff]  }
  0x4a   :  { %vm327_vm11 = vcmp.ge.f32.partialorder %v263_v16, 0.0  ;;  %v391_v22 = vmul.f32 0.2, %v263_v16  ;;  %v454_v25 = vsel %vm326_vm10, %v262_v10, %v390_v20  ;;  %v196_v27 = vmul.f32 %v1025_v17, %v1306_v1  ;;  %v1245_v10 = vld [vmem:[%s1631_s0 + $0xe0] sm:$0xff]  }
  0x4b   :  { %1268 = vst [vmem:[%s1634_s3 + $0xa0] sm:$0xff] %v1161_v19   ;;  %v264_v26 = vadd.f32 %v1320_v7, %v193_v21  ;;  %v1028_v28 = vunpack.c.l.bf16 %v1241_v18  ;;  %v265_v30 = vadd.f32 %v1320_v7, %v194_v23  ;;  %v266_v31 = vadd.f32 %v1320_v7, %v195_v24 }
  0x4c   :  { %v455_v29 = vsel %vm327_vm11, %v263_v16, %v391_v22  ;;  %v1029_v32 = vunpack.c.h.bf16 %v1241_v18  ;;  %v267_v35 = vadd.f32 %v1320_v7, %v196_v27  ;;  %v1032_v46 = vunpack.c.l.bf16 %v1242_v36 }
  0x4d   :  { %v1166_v33 = vpack.c.bf16 %v455_v29, %v454_v25  ;;  %vm328_vm12 = vcmp.ge.f32.partialorder %v264_v26, 0.0  ;;  %v392_v34 = vmul.f32 0.2, %v264_v26  ;;  %vm329_vm13 = vcmp.ge.f32.partialorder %v265_v30, 0.0 }
  0x4e   :  { %v393_v37 = vmul.f32 0.2, %v265_v30  ;;  %vm330_vm14 = vcmp.ge.f32.partialorder %v266_v31, 0.0  ;;  %v394_v38 = vmul.f32 0.2, %v266_v31  ;;  %vm331_vm15 = vcmp.ge.f32.partialorder %v267_v35, 0.0 }
  0x4f   :  { %1269 = vst [vmem:[%s1634_s3 + $0xa8] sm:$0xff] %v1166_v33   ;;  %v456_v39 = vsel %vm328_vm12, %v264_v26, %v392_v34  ;;  %v395_v40 = vmul.f32 0.2, %v267_v35  ;;  %v197_v41 = vmul.f32 %v1028_v28, %v1306_v1  ;;  %v198_v45 = vmul.f32 %v1029_v32, %v1306_v1 }
  0x50   :  { %v457_v43 = vsel %vm329_vm13, %v265_v30, %v393_v37  ;;  %v458_v44 = vsel %vm330_vm14, %v266_v31, %v394_v38  ;;  %v1033_v50 = vunpack.c.h.bf16 %v1242_v36  ;;  %v199_v53 = vmul.f32 %v1032_v46, %v1306_v1  ;;  %v1247_v30 = vld [vmem:[%s1631_s0 + $0xf0] sm:$0xff]  }
  0x51   :  { %v1171_v47 = vpack.c.bf16 %v457_v43, %v456_v39  ;;  %v459_v48 = vsel %vm331_vm15, %v267_v35, %v395_v40  ;;  %v268_v49 = vadd.f32 %v1320_v7, %v197_v41  ;;  %v269_v52 = vadd.f32 %v1320_v7, %v198_v45 }
  0x52   :  { %v1176_v51 = vpack.c.bf16 %v459_v48, %v458_v44  ;;  %v1036_v54 = vunpack.c.l.bf16 %v1243_v42  ;;  %v200_v57 = vmul.f32 %v1033_v50, %v1306_v1  ;;  %v1037_v58 = vunpack.c.h.bf16 %v1243_v42  ;;  %v1248_v44 = vld [vmem:[%s1631_s0 + $0xf8] sm:$0xff]  }
  0x53   :  { %1270 = vst [vmem:[%s1634_s3 + $0xb0] sm:$0xff] %v1171_v47   ;;  %vm332_vm0 = vcmp.ge.f32.partialorder %v268_v49, 0.0  ;;  %v396_v56 = vmul.f32 0.2, %v268_v49  ;;  %vm333_vm1 = vcmp.ge.f32.partialorder %v269_v52, 0.0  ;;  %v270_v60 = vadd.f32 %v1320_v7, %v199_v53 }
  0x54   :  { %1271 = vst [vmem:[%s1634_s3 + $0xb8] sm:$0xff] %v1176_v51   ;;  %v397_v59 = vmul.f32 0.2, %v269_v52  ;;  %v201_v61 = vmul.f32 %v1036_v54, %v1306_v1  ;;  %v271_v63 = vadd.f32 %v1320_v7, %v200_v57  ;;  %v202_v0 = vmul.f32 %v1037_v58, %v1306_v1 }
  0x55   :  { %v460_v62 = vsel %vm332_vm0, %v268_v49, %v396_v56  ;;  %v1040_v2 = vunpack.c.l.bf16 %v1244_v55  ;;  %vm334_vm2 = vcmp.ge.f32.partialorder %v270_v60, 0.0  ;;  %v398_v4 = vmul.f32 0.2, %v270_v60 }
  0x56   :  { %v461_v3 = vsel %vm333_vm1, %v269_v52, %v397_v59  ;;  %v272_v5 = vadd.f32 %v1320_v7, %v201_v61  ;;  %vm335_vm3 = vcmp.ge.f32.partialorder %v271_v63, 0.0  ;;  %v399_v8 = vmul.f32 0.2, %v271_v63 }
  0x57   :  { %v1181_v6 = vpack.c.bf16 %v461_v3, %v460_v62  ;;  %v273_v9 = vadd.f32 %v1320_v7, %v202_v0  ;;  %v462_v11 = vsel %vm334_vm2, %v270_v60, %v398_v4  ;;  %v1041_v13 = vunpack.c.h.bf16 %v1244_v55 }
  0x58   :  { %vm336_vm4 = vcmp.ge.f32.partialorder %v272_v5, 0.0  ;;  %v400_v12 = vmul.f32 0.2, %v272_v5  ;;  %v463_v15 = vsel %vm335_vm3, %v271_v63, %v399_v8  ;;  %v203_v17 = vmul.f32 %v1040_v2, %v1306_v1 }
  0x59   :  { %1272 = vst [vmem:[%s1634_s3 + $0xc0] sm:$0xff] %v1181_v6   ;;  %vm337_vm5 = vcmp.ge.f32.partialorder %v273_v9, 0.0  ;;  %v401_v16 = vmul.f32 0.2, %v273_v9  ;;  %v1186_v18 = vpack.c.bf16 %v463_v15, %v462_v11  ;;  %v204_v20 = vmul.f32 %v1041_v13, %v1306_v1 }
  0x5a   :  { %v464_v19 = vsel %vm336_vm4, %v272_v5, %v400_v12  ;;  %v1044_v21 = vunpack.c.l.bf16 %v1245_v10  ;;  %v274_v23 = vadd.f32 %v1320_v7, %v203_v17  ;;  %v1045_v24 = vunpack.c.h.bf16 %v1245_v10 }
  0x5b   :  { %v465_v22 = vsel %vm337_vm5, %v273_v9, %v401_v16  ;;  %v1048_v25 = vunpack.c.l.bf16 %v1246_v14  ;;  %1273 = vst [vmem:[%s1634_s3 + $0xc8] sm:$0xff] %v1186_v18   ;;  %v275_v27 = vadd.f32 %v1320_v7, %v204_v20  ;;  %v1049_v29 = vunpack.c.h.bf16 %v1246_v14 }
  0x5c   :  { %v1191_v26 = vpack.c.bf16 %v465_v22, %v464_v19  ;;  %v205_v28 = vmul.f32 %v1044_v21, %v1306_v1  ;;  %vm338_vm6 = vcmp.ge.f32.partialorder %v274_v23, 0.0  ;;  %v402_v31 = vmul.f32 0.2, %v274_v23 }
  0x5d   :  { %v206_v32 = vmul.f32 %v1045_v24, %v1306_v1  ;;  %v207_v33 = vmul.f32 %v1048_v25, %v1306_v1  ;;  %vm339_vm7 = vcmp.ge.f32.partialorder %v275_v27, 0.0  ;;  %v403_v34 = vmul.f32 0.2, %v275_v27 }
  0x5e   :  { %1274 = vst [vmem:[%s1634_s3 + $0xd0] sm:$0xff] %v1191_v26   ;;  %v276_v35 = vadd.f32 %v1320_v7, %v205_v28  ;;  %v208_v36 = vmul.f32 %v1049_v29, %v1306_v1  ;;  %v466_v37 = vsel %vm338_vm6, %v274_v23, %v402_v31  ;;  %v1052_v40 = vunpack.c.l.bf16 %v1247_v30 }
  0x5f   :  { %v277_v38 = vadd.f32 %v1320_v7, %v206_v32  ;;  %v278_v39 = vadd.f32 %v1320_v7, %v207_v33  ;;  %v467_v41 = vsel %vm339_vm7, %v275_v27, %v403_v34  ;;  %v1053_v51 = vunpack.c.h.bf16 %v1247_v30 }
  0x60   :  { %vm340_vm8 = vcmp.ge.f32.partialorder %v276_v35, 0.0  ;;  %v404_v42 = vmul.f32 0.2, %v276_v35  ;;  %v279_v43 = vadd.f32 %v1320_v7, %v208_v36  ;;  %v1196_v45 = vpack.c.bf16 %v467_v41, %v466_v37 }
  0x61   :  { %vm341_vm9 = vcmp.ge.f32.partialorder %v277_v38, 0.0  ;;  %v405_v46 = vmul.f32 0.2, %v277_v38  ;;  %vm342_vm10 = vcmp.ge.f32.partialorder %v278_v39, 0.0  ;;  %v406_v48 = vmul.f32 0.2, %v278_v39 }
  0x62   :  { %v468_v47 = vsel %vm340_vm8, %v276_v35, %v404_v42  ;;  %vm343_vm11 = vcmp.ge.f32.partialorder %v279_v43, 0.0  ;;  %v407_v49 = vmul.f32 0.2, %v279_v43  ;;  %1275 = vst [vmem:[%s1634_s3 + $0xd8] sm:$0xff] %v1196_v45   ;;  %v209_v52 = vmul.f32 %v1052_v40, %v1306_v1 }
  0x63   :  { %v469_v50 = vsel %vm341_vm9, %v277_v38, %v405_v46  ;;  %v1056_v53 = vunpack.c.l.bf16 %v1248_v44  ;;  %v470_v55 = vsel %vm342_vm10, %v278_v39, %v406_v48  ;;  %v1057_v57 = vunpack.c.h.bf16 %v1248_v44 }
  0x64   :  { %v1201_v54 = vpack.c.bf16 %v469_v50, %v468_v47  ;;  %v471_v56 = vsel %vm343_vm11, %v279_v43, %v407_v49  ;;  %v210_v59 = vmul.f32 %v1053_v51, %v1306_v1  ;;  %v280_v60 = vadd.f32 %v1320_v7, %v209_v52 }
  0x65   :  { %v1206_v58 = vpack.c.bf16 %v471_v56, %v470_v55  ;;  %v211_v61 = vmul.f32 %v1056_v53, %v1306_v1  ;;  %v212_v62 = vmul.f32 %v1057_v57, %v1306_v1 }
  0x66   :  { %1276 = vst [vmem:[%s1634_s3 + $0xe0] sm:$0xff] %v1201_v54   ;;  %v281_v63 = vadd.f32 %v1320_v7, %v210_v59  ;;  %vm344_vm12 = vcmp.ge.f32.partialorder %v280_v60, 0.0  ;;  %v408_v0 = vmul.f32 0.2, %v280_v60 }
  0x67   :  { %1277 = vst [vmem:[%s1634_s3 + $0xe8] sm:$0xff] %v1206_v58   ;;  %v282_v2 = vadd.f32 %v1320_v7, %v211_v61  ;;  %v283_v3 = vadd.f32 %v1320_v7, %v212_v62 }
  0x68   :  { %vm345_vm13 = vcmp.ge.f32.partialorder %v281_v63, 0.0  ;;  %v409_v4 = vmul.f32 0.2, %v281_v63  ;;  %v472_v5 = vsel %vm344_vm12, %v280_v60, %v408_v0 }
  0x69   :  { %vm346_vm14 = vcmp.ge.f32.partialorder %v282_v2, 0.0  ;;  %vm347_vm15 = vcmp.ge.f32.partialorder %v283_v3, 0.0  ;;  %v410_v6 = vmul.f32 0.2, %v282_v2  ;;  %v411_v8 = vmul.f32 0.2, %v283_v3 }
  0x6a   :  { %v473_v1 = vsel %vm345_vm13, %v281_v63, %v409_v4 }
  0x6b   :  { %v1211_v9 = vpack.c.bf16 %v473_v1, %v472_v5  ;;  %v474_v10 = vsel %vm346_vm14, %v282_v2, %v410_v6  ;;  %v475_v11 = vsel %vm347_vm15, %v283_v3, %v411_v8 }
  0x6c   :  { %v1216_v12 = vpack.c.bf16 %v475_v11, %v474_v10 }
  0x6d   :  { %1278 = vst [vmem:[%s1634_s3 + $0xf0] sm:$0xff] %v1211_v9  }
  0x6e   :  { %1279 = vst [vmem:[%s1634_s3 + $0xf8] sm:$0xff] %v1216_v12  }

// kernel: _forward_impl.11
= control target key start
LH: loop header
LB: loop body
LE: loop exit
PB: predicated region body
PF: predicated region fallthrough
CT: control target
= control target key end

     0   :  { %s455_s0 = inlined_call_operand.vmem [shape: bf16[128,128], index: 0, kind: input, shape index: {}]   ;;  %s456_s1 = inlined_call_operand.vmem [shape: f32[1,128], index: 1, kind: input, shape index: {}]   ;;  %s457_s2 = inlined_call_operand.vmem [shape: f32[1,128], index: 2, kind: input, shape index: {}]   ;;  %s458_s3 = inlined_call_operand.vmem [shape: bf16[128,128], index: 3, kind: output, shape index: {}]  }
   0x1   :  { %v259_v0 = vld [vmem:[%s455_s0] sm:$0xff]   ;;  %v330_v4 = vld [vmem:[%s455_s0 + $0x8] sm:$0xff]   ;;  %v331_v5 = vld [vmem:[%s455_s0 + $0x10] sm:$0xff]  }
   0x2   :  { %v370_v1 = vld [vmem:[%s456_s1] ss:$0 sm:$0xff]  ;;  %v260_v2 = vunpack.c.l.bf16 %v259_v0  ;;  %v261_v3 = vunpack.c.h.bf16 %v259_v0  ;;  %v332_v6 = vld [vmem:[%s455_s0 + $0x18] sm:$0xff]   ;;  %v264_v8 = vunpack.c.l.bf16 %v330_v4  ;;  %v265_v9 = vunpack.c.h.bf16 %v330_v4  ;;  %v334_v35 = vld [vmem:[%s455_s0 + $0x28] sm:$0xff]  }
   0x3   :  { %v384_v7 = vld [vmem:[%s457_s2] ss:$0 sm:$0xff]  ;;  %v268_v10 = vunpack.c.l.bf16 %v331_v5  ;;  %v269_v11 = vunpack.c.h.bf16 %v331_v5  ;;  %v272_v14 = vunpack.c.l.bf16 %v332_v6  ;;  %v273_v15 = vunpack.c.h.bf16 %v332_v6  ;;  %v335_v48 = vld [vmem:[%s455_s0 + $0x30] sm:$0xff]   ;;  %v336_v4 = vld [vmem:[%s455_s0 + $0x38] sm:$0xff]  }
   0x4   :  { %v53_v12 = vmul.f32 %v260_v2, %v370_v1  ;;  %v54_v13 = vmul.f32 %v261_v3, %v370_v1  ;;  %v55_v16 = vmul.f32 %v264_v8, %v370_v1  ;;  %v56_v17 = vmul.f32 %v265_v9, %v370_v1  ;;  %v333_v34 = vld [vmem:[%s455_s0 + $0x20] sm:$0xff]  }
   0x5   :  { %v57_v18 = vmul.f32 %v268_v10, %v370_v1  ;;  %v58_v19 = vmul.f32 %v269_v11, %v370_v1  ;;  %v59_v22 = vmul.f32 %v272_v14, %v370_v1  ;;  %v60_v23 = vmul.f32 %v273_v15, %v370_v1 }
   0x6   :  { %v76_v20 = vadd.f32 %v384_v7, %v53_v12  ;;  %v77_v21 = vadd.f32 %v384_v7, %v54_v13  ;;  %v78_v24 = vadd.f32 %v384_v7, %v55_v16  ;;  %v79_v25 = vadd.f32 %v384_v7, %v56_v17 }
   0x7   :  { %v80_v26 = vadd.f32 %v384_v7, %v57_v18  ;;  %v81_v27 = vadd.f32 %v384_v7, %v58_v19  ;;  %v82_v42 = vadd.f32 %v384_v7, %v59_v22  ;;  %v83_v43 = vadd.f32 %v384_v7, %v60_v23 }
   0x8   :  { %vm92_vm0 = vcmp.ge.f32.partialorder %v76_v20, 0.0  ;;  %vm93_vm1 = vcmp.ge.f32.partialorder %v77_v21, 0.0  ;;  %v108_v28 = vmul.f32 0.2, %v76_v20  ;;  %v109_v29 = vmul.f32 0.2, %v77_v21 }
   0x9   :  { %vm94_vm2 = vcmp.ge.f32.partialorder %v78_v24, 0.0  ;;  %vm95_vm3 = vcmp.ge.f32.partialorder %v79_v25, 0.0  ;;  %v110_v30 = vmul.f32 0.2, %v78_v24  ;;  %v111_v31 = vmul.f32 0.2, %v79_v25 }
   0xa   :  { %v124_v32 = vsel %vm92_vm0, %v76_v20, %v108_v28  ;;  %v125_v33 = vsel %vm93_vm1, %v77_v21, %v109_v29  ;;  %vm96_vm4 = vcmp.ge.f32.partialorder %v80_v26, 0.0  ;;  %vm97_vm5 = vcmp.ge.f32.partialorder %v81_v27, 0.0 }
   0xb   :  { %v293_v36 = vpack.c.bf16 %v125_v33, %v124_v32  ;;  %v126_v37 = vsel %vm94_vm2, %v78_v24, %v110_v30  ;;  %v127_v38 = vsel %vm95_vm3, %v79_v25, %v111_v31  ;;  %v112_v39 = vmul.f32 0.2, %v80_v26 }
   0xc   :  { %v298_v40 = vpack.c.bf16 %v127_v38, %v126_v37  ;;  %v113_v41 = vmul.f32 0.2, %v81_v27  ;;  %v276_v45 = vunpack.c.l.bf16 %v333_v34  ;;  %v277_v46 = vunpack.c.h.bf16 %v333_v34 }
   0xd   :  { %294 = vst [vmem:[%s458_s3] sm:$0xff] %v293_v36   ;;  %v128_v44 = vsel %vm96_vm4, %v80_v26, %v112_v39  ;;  %v280_v47 = vunpack.c.l.bf16 %v334_v35  ;;  %vm98_vm6 = vcmp.ge.f32.partialorder %v82_v42, 0.0  ;;  %vm99_vm7 = vcmp.ge.f32.partialorder %v83_v43, 0.0 }
   0xe   :  { %337 = vst [vmem:[%s458_s3 + $0x8] sm:$0xff] %v298_v40   ;;  %v129_v49 = vsel %vm97_vm5, %v81_v27, %v113_v41  ;;  %v114_v50 = vmul.f32 0.2, %v82_v42  ;;  %v115_v52 = vmul.f32 0.2, %v83_v43  ;;  %v61_v53 = vmul.f32 %v276_v45, %v370_v1 }
   0xf   :  { %v303_v51 = vpack.c.bf16 %v129_v49, %v128_v44  ;;  %v62_v54 = vmul.f32 %v277_v46, %v370_v1  ;;  %v281_v56 = vunpack.c.h.bf16 %v334_v35  ;;  %v63_v57 = vmul.f32 %v280_v47, %v370_v1 }
  0x10   :  { %v130_v55 = vsel %vm98_vm6, %v82_v42, %v114_v50  ;;  %v284_v58 = vunpack.c.l.bf16 %v335_v48  ;;  %v131_v59 = vsel %vm99_vm7, %v83_v43, %v115_v52  ;;  %v84_v60 = vadd.f32 %v384_v7, %v61_v53 }
  0x11   :  { %338 = vst [vmem:[%s458_s3 + $0x10] sm:$0xff] %v303_v51   ;;  %v85_v61 = vadd.f32 %v384_v7, %v62_v54  ;;  %v285_v62 = vunpack.c.h.bf16 %v335_v48  ;;  %v308_v63 = vpack.c.bf16 %v131_v59, %v130_v55  ;;  %v64_v0 = vmul.f32 %v281_v56, %v370_v1 }
  0x12   :  { %v86_v2 = vadd.f32 %v384_v7, %v63_v57  ;;  %v65_v3 = vmul.f32 %v284_v58, %v370_v1  ;;  %vm100_vm8 = vcmp.ge.f32.partialorder %v84_v60, 0.0  ;;  %v116_v5 = vmul.f32 0.2, %v84_v60 }
  0x13   :  { %vm101_vm9 = vcmp.ge.f32.partialorder %v85_v61, 0.0  ;;  %v117_v6 = vmul.f32 0.2, %v85_v61  ;;  %339 = vst [vmem:[%s458_s3 + $0x18] sm:$0xff] %v308_v63   ;;  %v87_v8 = vadd.f32 %v384_v7, %v64_v0  ;;  %v66_v10 = vmul.f32 %v285_v62, %v370_v1 }
  0x14   :  { %vm102_vm10 = vcmp.ge.f32.partialorder %v86_v2, 0.0  ;;  %v118_v9 = vmul.f32 0.2, %v86_v2  ;;  %v132_v11 = vsel %vm100_vm8, %v84_v60, %v116_v5  ;;  %v88_v13 = vadd.f32 %v384_v7, %v65_v3 }
  0x15   :  { %v133_v12 = vsel %vm101_vm9, %v85_v61, %v117_v6  ;;  %v288_v14 = vunpack.c.l.bf16 %v336_v4  ;;  %vm103_vm11 = vcmp.ge.f32.partialorder %v87_v8, 0.0  ;;  %v119_v16 = vmul.f32 0.2, %v87_v8 }
  0x16   :  { %v313_v15 = vpack.c.bf16 %v133_v12, %v132_v11  ;;  %v134_v17 = vsel %vm102_vm10, %v86_v2, %v118_v9  ;;  %v89_v18 = vadd.f32 %v384_v7, %v66_v10  ;;  %vm104_vm12 = vcmp.ge.f32.partialorder %v88_v13, 0.0 }
  0x17   :  { %v120_v19 = vmul.f32 0.2, %v88_v13  ;;  %v289_v20 = vunpack.c.h.bf16 %v336_v4  ;;  %v135_v21 = vsel %vm103_vm11, %v87_v8, %v119_v16  ;;  %v67_v22 = vmul.f32 %v288_v14, %v370_v1 }
  0x18   :  { %340 = vst [vmem:[%s458_s3 + $0x20] sm:$0xff] %v313_v15   ;;  %v318_v23 = vpack.c.bf16 %v135_v21, %v134_v17  ;;  %vm105_vm13 = vcmp.ge.f32.partialorder %v89_v18, 0.0  ;;  %v121_v24 = vmul.f32 0.2, %v89_v18 }
  0x19   :  { %v136_v25 = vsel %vm104_vm12, %v88_v13, %v120_v19  ;;  %v68_v26 = vmul.f32 %v289_v20, %v370_v1  ;;  %v90_v27 = vadd.f32 %v384_v7, %v67_v22 }
  0x1a   :  { %341 = vst [vmem:[%s458_s3 + $0x28] sm:$0xff] %v318_v23   ;;  %v137_v28 = vsel %vm105_vm13, %v89_v18, %v121_v24 }
  0x1b   :  { %v323_v29 = vpack.c.bf16 %v137_v28, %v136_v25  ;;  %v91_v30 = vadd.f32 %v384_v7, %v68_v26  ;;  %vm106_vm14 = vcmp.ge.f32.partialorder %v90_v27, 0.0  ;;  %v122_v31 = vmul.f32 0.2, %v90_v27 }
  0x1d   :  { %342 = vst [vmem:[%s458_s3 + $0x30] sm:$0xff] %v323_v29   ;;  %vm107_vm15 = vcmp.ge.f32.partialorder %v91_v30, 0.0  ;;  %v123_v32 = vmul.f32 0.2, %v91_v30  ;;  %v138_v33 = vsel %vm106_vm14, %v90_v27, %v122_v31 }
  0x1f   :  { %v139_v1 = vsel %vm107_vm15, %v91_v30, %v123_v32 }
  0x20   :  { %v328_v34 = vpack.c.bf16 %v139_v1, %v138_v33 }
  0x22   :  { %343 = vst [vmem:[%s458_s3 + $0x38] sm:$0xff] %v328_v34  }

// kernel: _forward_impl.10
= control target key start
LH: loop header
LB: loop body
LE: loop exit
PB: predicated region body
PF: predicated region fallthrough
CT: control target
= control target key end

     0   :  { %s894_s1 = inlined_call_operand.vmem [shape: bf16[256,128], index: 1, kind: input, shape index: {}]   ;;  %s895_s0 = inlined_call_operand.vmem [shape: bf16[128,256], index: 0, kind: input, shape index: {}]   ;;  %s896_s2 = inlined_call_operand.vmem [shape: bf16[128,128], index: 2, kind: output, shape index: {0}]   ;;  %s897_s3 = inlined_call_operand.vmem [shape: f32[8,128], index: 3, kind: output, shape index: {1}]   ;;  %s898_s4 = inlined_call_operand.vmem [shape: f32[8,128], index: 4, kind: output, shape index: {2}]  }
   0x1   :  { %v679_v0 = vld [vmem:[%s894_s1 + $0x78] sm:$0xff]   ;;  %v681_v2 = vld [vmem:[%s894_s1 + $0x70] sm:$0xff]   ;;  %v683_v4 = vld [vmem:[%s894_s1 + $0x68] sm:$0xff]  }
   0x2   :  { %v680_v1 = vld [vmem:[%s894_s1 + $0x38] sm:$0xff]   ;;  %599 = vmatprep.subr.bf16.mxu0 %v679_v0  ;;  %663 = vmatprep.subr.bf16.mxu1 %v679_v0  ;;  %v682_v3 = vld [vmem:[%s894_s1 + $0x30] sm:$0xff]   ;;  %v684_v5 = vld [vmem:[%s894_s1 + $0x28] sm:$0xff]  }
   0x3   :  { %600 = vmatpush3.bf16.msra.mxu0 %v680_v1  ;;  %671 = vmatpush3.bf16.msra.mxu1 %v680_v1  ;;  %v685_v6 = vld [vmem:[%s894_s1 + $0x60] sm:$0xff]   ;;  %v687_v8 = vld [vmem:[%s894_s1 + $0x58] sm:$0xff]   ;;  %v689_v10 = vld [vmem:[%s894_s1 + $0x50] sm:$0xff]  }
   0x4   :  { %601 = vmatprep.subr.bf16.mxu0 %v681_v2  ;;  %664 = vmatprep.subr.bf16.mxu1 %v681_v2  ;;  %v686_v7 = vld [vmem:[%s894_s1 + $0x20] sm:$0xff]   ;;  %v688_v9 = vld [vmem:[%s894_s1 + $0x18] sm:$0xff]   ;;  %v690_v12 = vld [vmem:[%s894_s1 + $0x10] sm:$0xff]  }
   0x5   :  { %v697_v11 = vld [vmem:[%s895_s0 + $0x4] ss:$8 sps:$4 sm:$0xff]   ;;  %v695_v18 = vld [vmem:[%s895_s0] ss:$8 sps:$4 sm:$0xff]   ;;  %v698_v20 = vld [vmem:[%s895_s0 + $0x14] ss:$8 sps:$4 sm:$0xff]  }
   0x6   :  { %v703_v13 = vld [vmem:[%s895_s0 + $0x44] ss:$8 sps:$4 sm:$0xff]   ;;  %271 = vmatprep.mubr.bf16.mxu0 %v697_v11  ;;  %v701_v19 = vld [vmem:[%s895_s0 + $0x40] ss:$8 sps:$4 sm:$0xff]   ;;  %v707_v21 = vld [vmem:[%s895_s0 + $0x54] ss:$8 sps:$4 sm:$0xff]  }
   0x7   :  { %602 = vmatpush3.bf16.msra.mxu0 %v682_v3  ;;  %672 = vmatpush3.bf16.msra.mxu1 %v682_v3  ;;  %v691_v14 = vld [vmem:[%s894_s1 + $0x48] sm:$0xff]   ;;  %v693_v16 = vld [vmem:[%s894_s1 + $0x40] sm:$0xff]   ;;  %v700_v22 = vld [vmem:[%s895_s0 + $0x10] ss:$8 sps:$4 sm:$0xff]  }
   0x8   :  { %603 = vmatprep.subr.bf16.mxu0 %v683_v4  ;;  %665 = vmatprep.subr.bf16.mxu1 %v683_v4  ;;  %v692_v15 = vld [vmem:[%s894_s1 + $0x8] sm:$0xff]   ;;  %v694_v17 = vld [vmem:[%s894_s1] sm:$0xff]   ;;  %v709_v23 = vld [vmem:[%s895_s0 + $0x50] ss:$8 sps:$4 sm:$0xff]  }
   0x9   :  { %303 = vmatprep.mubr.bf16.mxu1 %v703_v13  ;;  %v704_v24 = vld [vmem:[%s895_s0 + $0x24] ss:$8 sps:$4 sm:$0xff]   ;;  %v706_v26 = vld [vmem:[%s895_s0 + $0x20] ss:$8 sps:$4 sm:$0xff]   ;;  %v710_v28 = vld [vmem:[%s895_s0 + $0x34] ss:$8 sps:$4 sm:$0xff]  }
   0xa   :  { %v713_v25 = vld [vmem:[%s895_s0 + $0x64] ss:$8 sps:$4 sm:$0xff]   ;;  %v715_v27 = vld [vmem:[%s895_s0 + $0x60] ss:$8 sps:$4 sm:$0xff]   ;;  %v716_v29 = vld [vmem:[%s895_s0 + $0x74] ss:$8 sps:$4 sm:$0xff]  }
   0xb   :  { %604 = vmatpush3.bf16.msra.mxu0 %v684_v5  ;;  %673 = vmatpush3.bf16.msra.mxu1 %v684_v5  ;;  %v712_v30 = vld [vmem:[%s895_s0 + $0x30] ss:$8 sps:$4 sm:$0xff]  }
   0xc   :  { %605 = vmatprep.subr.bf16.mxu0 %v685_v6  ;;  %666 = vmatprep.subr.bf16.mxu1 %v685_v6  ;;  %v718_v31 = vld [vmem:[%s895_s0 + $0x70] ss:$8 sps:$4 sm:$0xff]  }
   0xf   :  { %606 = vmatpush3.bf16.msra.mxu0 %v686_v7  ;;  %674 = vmatpush3.bf16.msra.mxu1 %v686_v7 }
  0x10   :  { %607 = vmatprep.subr.bf16.mxu0 %v687_v8  ;;  %667 = vmatprep.subr.bf16.mxu1 %v687_v8 }
  0x13   :  { %608 = vmatpush3.bf16.msra.mxu0 %v688_v9  ;;  %675 = vmatpush3.bf16.msra.mxu1 %v688_v9 }
  0x14   :  { %609 = vmatprep.subr.bf16.mxu0 %v689_v10  ;;  %668 = vmatprep.subr.bf16.mxu1 %v689_v10 }
  0x17   :  { %610 = vmatpush3.bf16.msra.mxu0 %v690_v12  ;;  %676 = vmatpush3.bf16.msra.mxu1 %v690_v12 }
  0x18   :  { %611 = vmatprep.subr.bf16.mxu0 %v691_v14  ;;  %669 = vmatprep.subr.bf16.mxu1 %v691_v14 }
  0x1b   :  { %612 = vmatpush3.bf16.msra.mxu0 %v692_v15  ;;  %677 = vmatpush3.bf16.msra.mxu1 %v692_v15 }
  0x1c   :  { %613 = vmatprep.subr.bf16.mxu0 %v693_v16  ;;  %670 = vmatprep.subr.bf16.mxu1 %v693_v16 }
  0x1f   :  { %614 = vmatpush3.bf16.msra.mxu0 %v694_v17  ;;  %678 = vmatpush3.bf16.msra.mxu1 %v694_v17 }
  0x22   :  { %272 = vmatmul.mubr.bf16.vlgmr.msra.gmra.mxu0 %v695_v18  ;;  %304 = vmatmul.mubr.bf16.vlgmr.msra.gmra.mxu1 %v701_v19 }
  0x23   :  { %279 = vmatprep.mubr.bf16.mxu0 %v698_v20  ;;  %311 = vmatprep.mubr.bf16.mxu1 %v707_v21 }
  0x2a   :  { %280 = vmatmul.mubr.bf16.gmra.mxu0 %v700_v22  ;;  %312 = vmatmul.mubr.bf16.gmra.mxu1 %v709_v23 }
  0x2b   :  { %287 = vmatprep.mubr.bf16.mxu0 %v704_v24  ;;  %319 = vmatprep.mubr.bf16.mxu1 %v713_v25 }
  0x32   :  { %288 = vmatmul.mubr.bf16.gmra.mxu0 %v706_v26  ;;  %320 = vmatmul.mubr.bf16.gmra.mxu1 %v715_v27 }
  0x33   :  { %295 = vmatprep.mubr.bf16.mxu0 %v710_v28  ;;  %327 = vmatprep.mubr.bf16.mxu1 %v716_v29 }
  0x3a   :  { %296 = vmatmul.mubr.bf16.gmra.mxu0 %v712_v30  ;;  %328 = vmatmul.mubr.bf16.gmra.mxu1 %v718_v31 }
  0xe2   :  { %v615_v32 = vpop.f32.mrf.mxu0  ;;  %v639_v33 = vpop.f32.mrf.mxu1 }
  0xe4   :  { %v616_v34 = vpop.f32.mrf.mxu0  ;;  %v640_v35 = vpop.f32.mrf.mxu1 }
  0xe5   :  { %v840_v38 = vadd.f32 %v640_v35, %v639_v33  ;;  %v617_v41 = vadd.f32 %v616_v34, %v615_v32 }
  0xe6   :  { %v618_v36 = vpop.f32.mrf.mxu0  ;;  %v642_v37 = vpop.f32.mrf.mxu1 }
  0xe7   :  { %v437_v1 = vmul.f32 %v617_v41, %v617_v41 }
  0xe8   :  { %v619_v39 = vpop.f32.mrf.mxu0  ;;  %v643_v40 = vpop.f32.mrf.mxu1 }
  0xe9   :  { %v620_v42 = vadd.f32 %v619_v39, %v618_v36  ;;  %v842_v43 = vadd.f32 %v643_v40, %v642_v37 }
  0xea   :  { %v621_v44 = vpop.f32.mrf.mxu0  ;;  %v645_v45 = vpop.f32.mrf.mxu1 }
  0xeb   :  { %v555_v46 = vpack.c.bf16 %v620_v42, %v617_v41  ;;  %v575_v47 = vpack.c.bf16 %v842_v43, %v840_v38  ;;  %v438_v62 = vmul.f32 %v620_v42, %v620_v42  ;;  %v416_v6 = vadd.f32 %v620_v42, %v617_v41 }
  0xec   :  { %v622_v48 = vpop.f32.mrf.mxu0  ;;  %v646_v49 = vpop.f32.mrf.mxu1 }
  0xed   :  { %556 = vst [vmem:[%s896_s2] sm:$0xff] %v555_v46   ;;  %595 = vst [vmem:[%s896_s2 + $0x20] sm:$0xff] %v575_v47   ;;  %v852_v52 = vadd.f32 %v646_v49, %v645_v45  ;;  %v623_v55 = vadd.f32 %v622_v48, %v621_v44  ;;  %v453_v8 = vadd.f32 %v438_v62, %v437_v1 }
  0xee   :  { %v624_v50 = vpop.f32.mrf.mxu0  ;;  %v648_v51 = vpop.f32.mrf.mxu1  ;;  %v445_v47 = vmul.f32 %v840_v38, %v840_v38 }
  0xef   :  { %v439_v2 = vmul.f32 %v623_v55, %v623_v55  ;;  %v417_v12 = vadd.f32 %v623_v55, %v416_v6 }
  0xf0   :  { %v625_v53 = vpop.f32.mrf.mxu0  ;;  %v649_v54 = vpop.f32.mrf.mxu1 }
  0xf1   :  { %v626_v56 = vadd.f32 %v625_v53, %v624_v50  ;;  %v854_v57 = vadd.f32 %v649_v54, %v648_v51  ;;  %v454_v15 = vadd.f32 %v453_v8, %v439_v2  ;;  %v446_v50 = vmul.f32 %v842_v43, %v842_v43 }
  0xf2   :  { %v627_v58 = vpop.f32.mrf.mxu0  ;;  %v651_v59 = vpop.f32.mrf.mxu1  ;;  %v447_v54 = vmul.f32 %v852_v52, %v852_v52 }
  0xf3   :  { %v560_v60 = vpack.c.bf16 %v626_v56, %v623_v55  ;;  %v580_v61 = vpack.c.bf16 %v854_v57, %v852_v52  ;;  %v440_v9 = vmul.f32 %v626_v56, %v626_v56  ;;  %v418_v19 = vadd.f32 %v626_v56, %v417_v12 }
  0xf4   :  { %v628_v63 = vpop.f32.mrf.mxu0  ;;  %v652_v0 = vpop.f32.mrf.mxu1 }
  0xf5   :  { %592 = vst [vmem:[%s896_s2 + $0x8] sm:$0xff] %v560_v60   ;;  %596 = vst [vmem:[%s896_s2 + $0x28] sm:$0xff] %v580_v61   ;;  %v629_v3 = vadd.f32 %v628_v63, %v627_v58  ;;  %v653_v7 = vadd.f32 %v652_v0, %v651_v59  ;;  %v455_v22 = vadd.f32 %v454_v15, %v440_v9 }
  0xf6   :  { %v630_v4 = vpop.f32.mrf.mxu0  ;;  %v654_v5 = vpop.f32.mrf.mxu1 }
  0xf7   :  { %v441_v16 = vmul.f32 %v629_v3, %v629_v3  ;;  %v419_v26 = vadd.f32 %v629_v3, %v418_v19  ;;  %v449_v60 = vmul.f32 %v653_v7, %v653_v7 }
  0xf8   :  { %v631_v10 = vpop.f32.mrf.mxu0  ;;  %v655_v11 = vpop.f32.mrf.mxu1 }
  0xf9   :  { %v632_v13 = vadd.f32 %v631_v10, %v630_v4  ;;  %v656_v14 = vadd.f32 %v655_v11, %v654_v5  ;;  %v456_v28 = vadd.f32 %v455_v22, %v441_v16 }
  0xfa   :  { %v633_v17 = vpop.f32.mrf.mxu0  ;;  %v657_v18 = vpop.f32.mrf.mxu1 }
  0xfb   :  { %v565_v20 = vpack.c.bf16 %v632_v13, %v629_v3  ;;  %v585_v21 = vpack.c.bf16 %v656_v14, %v653_v7  ;;  %v442_v23 = vmul.f32 %v632_v13, %v632_v13  ;;  %v420_v31 = vadd.f32 %v632_v13, %v419_v26 }
  0xfc   :  { %v634_v24 = vpop.f32.mrf.mxu0  ;;  %v658_v25 = vpop.f32.mrf.mxu1  ;;  %v450_v0 = vmul.f32 %v656_v14, %v656_v14 }
  0xfd   :  { %593 = vst [vmem:[%s896_s2 + $0x10] sm:$0xff] %v565_v20   ;;  %v635_v27 = vadd.f32 %v634_v24, %v633_v17  ;;  %597 = vst [vmem:[%s896_s2 + $0x30] sm:$0xff] %v585_v21   ;;  %v659_v33 = vadd.f32 %v658_v25, %v657_v18  ;;  %v457_v34 = vadd.f32 %v456_v28, %v442_v23 }
  0xfe   :  { %v636_v29 = vpop.f32.mrf.mxu0  ;;  %v660_v30 = vpop.f32.mrf.mxu1 }
  0xff   :  { %v443_v32 = vmul.f32 %v635_v27, %v635_v27  ;;  %v421_v37 = vadd.f32 %v635_v27, %v420_v31  ;;  %v451_v3 = vmul.f32 %v659_v33, %v659_v33 }
 0x100   :  { %v637_v35 = vpop.f32.mrf.mxu0  ;;  %v661_v36 = vpop.f32.mrf.mxu1 }
 0x101   :  { %v638_v39 = vadd.f32 %v637_v35, %v636_v29  ;;  %v662_v40 = vadd.f32 %v661_v36, %v660_v30  ;;  %v458_v41 = vadd.f32 %v457_v34, %v443_v32 }
 0x103   :  { %v570_v42 = vpack.c.bf16 %v638_v39, %v635_v27  ;;  %v422_v44 = vadd.f32 %v638_v39, %v421_v37  ;;  %v444_v45 = vmul.f32 %v638_v39, %v638_v39  ;;  %v590_v46 = vpack.c.bf16 %v662_v40, %v659_v33 }
 0x104   :  { %v452_v6 = vmul.f32 %v662_v40, %v662_v40 }
 0x105   :  { %594 = vst [vmem:[%s896_s2 + $0x18] sm:$0xff] %v570_v42   ;;  %v423_v48 = vadd.f32 %v840_v38, %v422_v44  ;;  %v459_v49 = vadd.f32 %v458_v41, %v444_v45  ;;  %598 = vst [vmem:[%s896_s2 + $0x38] sm:$0xff] %v590_v46   ;;  %v448_v38 = vmul.f32 %v854_v57, %v854_v57 }
 0x107   :  { %v424_v51 = vadd.f32 %v842_v43, %v423_v48  ;;  %v460_v53 = vadd.f32 %v459_v49, %v445_v47 }
 0x109   :  { %v461_v55 = vadd.f32 %v460_v53, %v446_v50  ;;  %v425_v56 = vadd.f32 %v852_v52, %v424_v51 }
 0x10b   :  { %v426_v58 = vadd.f32 %v854_v57, %v425_v56  ;;  %v462_v59 = vadd.f32 %v461_v55, %v447_v54 }
 0x10d   :  { %v427_v61 = vadd.f32 %v653_v7, %v426_v58  ;;  %v463_v62 = vadd.f32 %v462_v59, %v448_v38 }
 0x10f   :  { %v428_v63 = vadd.f32 %v656_v14, %v427_v61  ;;  %v464_v1 = vadd.f32 %v463_v62, %v449_v60 }
 0x111   :  { %v465_v43 = vadd.f32 %v464_v1, %v450_v0  ;;  %v429_v2 = vadd.f32 %v659_v33, %v428_v63 }
 0x113   :  { %v466_v4 = vadd.f32 %v465_v43, %v451_v3  ;;  %v430_v5 = vadd.f32 %v662_v40, %v429_v2 }
 0x115   :  { %v431_v8 = vrot.slane %v430_v5, 4  ;;  %v467_v52 = vadd.f32 %v466_v4, %v452_v6 }
 0x117   :  { %v432_v9 = vadd.f32 %v431_v8, %v430_v5  ;;  %v468_v10 = vrot.slane %v467_v52, 4 }
 0x119   :  { %v433_v11 = vrot.slane %v432_v9, 2  ;;  %v469_v12 = vadd.f32 %v468_v10, %v467_v52 }
 0x11b   :  { %v434_v57 = vadd.f32 %v433_v11, %v432_v9  ;;  %v470_v13 = vrot.slane %v469_v12, 2 }
 0x11d   :  { %v435_v15 = vrot.slane %v434_v57, 1  ;;  %v471_v7 = vadd.f32 %v470_v13, %v469_v12 }
 0x11f   :  { %v436_v16 = vadd.f32 %v435_v15, %v434_v57  ;;  %v472_v17 = vrot.slane %v471_v7, 1 }
 0x121   :  { %v473_v14 = vadd.f32 %v472_v17, %v471_v7  ;;  %474 = vst [vmem:[%s897_s3] sm:$0xff] %v436_v16 }
 0x123   :  { %475 = vst [vmem:[%s898_s4] sm:$0xff] %v473_v14 }

// kernel: _forward_impl.13
= control target key start
LH: loop header
LB: loop body
LE: loop exit
PB: predicated region body
PF: predicated region fallthrough
CT: control target
= control target key end

     0   :  { %s148_s0 = inlined_call_operand.vmem [shape: bf16[32,128], index: 0, kind: input, shape index: {}]   ;;  %s149_s1 = inlined_call_operand.vmem [shape: f32[1,128], index: 1, kind: input, shape index: {}]   ;;  %s150_s2 = inlined_call_operand.vmem [shape: f32[1,128], index: 2, kind: input, shape index: {}]   ;;  %s151_s3 = inlined_call_operand.vmem [shape: bf16[32,128], index: 3, kind: output, shape index: {}]  }
   0x1   :  { %v91_v0 = vld [vmem:[%s148_s0] sm:$0xff]   ;;  %v108_v4 = vld [vmem:[%s148_s0 + $0x8] sm:$0xff]  }
   0x2   :  { %v80_v1 = vld [vmem:[%s149_s1] ss:$0 sm:$0xff]  ;;  %v92_v2 = vunpack.c.l.bf16 %v91_v0  ;;  %v93_v3 = vunpack.c.h.bf16 %v91_v0  ;;  %v96_v6 = vunpack.c.l.bf16 %v108_v4  ;;  %v97_v7 = vunpack.c.h.bf16 %v108_v4 }
   0x3   :  { %v81_v5 = vld [vmem:[%s150_s2] ss:$0 sm:$0xff] }
   0x4   :  { %v29_v8 = vmul.f32 %v92_v2, %v80_v1  ;;  %v30_v9 = vmul.f32 %v93_v3, %v80_v1  ;;  %v31_v10 = vmul.f32 %v96_v6, %v80_v1  ;;  %v32_v11 = vmul.f32 %v97_v7, %v80_v1 }
   0x6   :  { %v40_v12 = vadd.f32 %v81_v5, %v29_v8  ;;  %v41_v13 = vadd.f32 %v81_v5, %v30_v9  ;;  %v42_v14 = vadd.f32 %v81_v5, %v31_v10  ;;  %v43_v15 = vadd.f32 %v81_v5, %v32_v11 }
   0x8   :  { %vm44_vm0 = vcmp.ge.f32.partialorder %v40_v12, 0.0  ;;  %vm45_vm1 = vcmp.ge.f32.partialorder %v41_v13, 0.0  ;;  %v48_v16 = vmul.f32 0.2, %v40_v12  ;;  %v49_v17 = vmul.f32 0.2, %v41_v13 }
   0x9   :  { %vm46_vm2 = vcmp.ge.f32.partialorder %v42_v14, 0.0  ;;  %vm47_vm3 = vcmp.ge.f32.partialorder %v43_v15, 0.0  ;;  %v50_v18 = vmul.f32 0.2, %v42_v14  ;;  %v51_v19 = vmul.f32 0.2, %v43_v15 }
   0xa   :  { %v52_v20 = vsel %vm44_vm0, %v40_v12, %v48_v16  ;;  %v53_v21 = vsel %vm45_vm1, %v41_v13, %v49_v17 }
   0xb   :  { %v101_v22 = vpack.c.bf16 %v53_v21, %v52_v20  ;;  %v54_v23 = vsel %vm46_vm2, %v42_v14, %v50_v18  ;;  %v55_v24 = vsel %vm47_vm3, %v43_v15, %v51_v19 }
   0xc   :  { %v106_v25 = vpack.c.bf16 %v55_v24, %v54_v23 }
   0xd   :  { %102 = vst [vmem:[%s151_s3] sm:$0xff] %v101_v22  }
   0xe   :  { %109 = vst [vmem:[%s151_s3 + $0x8] sm:$0xff] %v106_v25  }

// kernel: _forward_impl.12
= control target key start
LH: loop header
LB: loop body
LE: loop exit
PB: predicated region body
PF: predicated region fallthrough
CT: control target
= control target key end

     0   :  { %s789_s1 = inlined_call_operand.vmem [shape: bf16[512,128], index: 1, kind: input, shape index: {}]   ;;  %s790_s0 = inlined_call_operand.vmem [shape: bf16[32,512], index: 0, kind: input, shape index: {}]   ;;  %s791_s2 = inlined_call_operand.vmem [shape: bf16[32,128], index: 2, kind: output, shape index: {0}]   ;;  %s792_s3 = inlined_call_operand.vmem [shape: f32[8,128], index: 3, kind: output, shape index: {1}]   ;;  %s793_s4 = inlined_call_operand.vmem [shape: f32[8,128], index: 4, kind: output, shape index: {2}]  }
   0x1   :  { %v588_v0 = vld [vmem:[%s789_s1 + $0x78] sm:$0xff]   ;;  %v592_v4 = vld [vmem:[%s789_s1 + $0x70] sm:$0xff]   ;;  %v596_v8 = vld [vmem:[%s789_s1 + $0x68] sm:$0xff]  }
   0x2   :  { %v589_v1 = vld [vmem:[%s789_s1 + $0xf8] sm:$0xff]   ;;  %532 = vmatprep.subr.bf16.mxu0 %v588_v0  ;;  %v593_v5 = vld [vmem:[%s789_s1 + $0xf0] sm:$0xff]   ;;  %v597_v9 = vld [vmem:[%s789_s1 + $0xe8] sm:$0xff]  }
   0x3   :  { %v590_v2 = vld [vmem:[%s789_s1 + $0x38] sm:$0xff]   ;;  %560 = vmatprep.subr.bf16.mxu1 %v589_v1  ;;  %v594_v6 = vld [vmem:[%s789_s1 + $0x30] sm:$0xff]   ;;  %v598_v10 = vld [vmem:[%s789_s1 + $0x28] sm:$0xff]  }
   0x4   :  { %v591_v3 = vld [vmem:[%s789_s1 + $0xb8] sm:$0xff]   ;;  %533 = vmatpush3.bf16.msra.mxu0 %v590_v2  ;;  %v595_v7 = vld [vmem:[%s789_s1 + $0xb0] sm:$0xff]   ;;  %v599_v11 = vld [vmem:[%s789_s1 + $0xa8] sm:$0xff]  }
   0x5   :  { %561 = vmatpush3.bf16.msra.mxu1 %v591_v3  ;;  %534 = vmatprep.subr.bf16.mxu0 %v592_v4  ;;  %v600_v12 = vld [vmem:[%s789_s1 + $0x60] sm:$0xff]   ;;  %v604_v16 = vld [vmem:[%s789_s1 + $0x58] sm:$0xff]   ;;  %v608_v20 = vld [vmem:[%s789_s1 + $0x50] sm:$0xff]  }
   0x6   :  { %562 = vmatprep.subr.bf16.mxu1 %v593_v5  ;;  %v601_v13 = vld [vmem:[%s789_s1 + $0xe0] sm:$0xff]   ;;  %v605_v17 = vld [vmem:[%s789_s1 + $0xd8] sm:$0xff]   ;;  %v609_v21 = vld [vmem:[%s789_s1 + $0xd0] sm:$0xff]  }
   0x7   :  { %v602_v14 = vld [vmem:[%s789_s1 + $0x20] sm:$0xff]   ;;  %v606_v18 = vld [vmem:[%s789_s1 + $0x18] sm:$0xff]   ;;  %v610_v22 = vld [vmem:[%s789_s1 + $0x10] sm:$0xff]  }
   0x8   :  { %535 = vmatpush3.bf16.msra.mxu0 %v594_v6  ;;  %v603_v15 = vld [vmem:[%s789_s1 + $0xa0] sm:$0xff]   ;;  %v607_v19 = vld [vmem:[%s789_s1 + $0x98] sm:$0xff]   ;;  %v611_v23 = vld [vmem:[%s789_s1 + $0x90] sm:$0xff]  }
   0x9   :  { %563 = vmatpush3.bf16.msra.mxu1 %v595_v7  ;;  %536 = vmatprep.subr.bf16.mxu0 %v596_v8  ;;  %v612_v24 = vld [vmem:[%s789_s1 + $0x48] sm:$0xff]   ;;  %v616_v28 = vld [vmem:[%s789_s1 + $0x40] sm:$0xff]  }
   0xa   :  { %564 = vmatprep.subr.bf16.mxu1 %v597_v9  ;;  %v613_v25 = vld [vmem:[%s789_s1 + $0xc8] sm:$0xff]   ;;  %v617_v29 = vld [vmem:[%s789_s1 + $0xc0] sm:$0xff]  }
   0xb   :  { %v614_v26 = vld [vmem:[%s789_s1 + $0x8] sm:$0xff]   ;;  %v618_v30 = vld [vmem:[%s789_s1] sm:$0xff]  }
   0xc   :  { %537 = vmatpush3.bf16.msra.mxu0 %v598_v10  ;;  %v615_v27 = vld [vmem:[%s789_s1 + $0x88] sm:$0xff]   ;;  %v619_v31 = vld [vmem:[%s789_s1 + $0x80] sm:$0xff]  }
   0xd   :  { %565 = vmatpush3.bf16.msra.mxu1 %v599_v11  ;;  %538 = vmatprep.subr.bf16.mxu0 %v600_v12  ;;  %v620_v32 = vld [vmem:[%s790_s0] ss:$16 sps:$4 sm:$0xff]   ;;  %v622_v33 = vld [vmem:[%s790_s0 + $0x4] ss:$16 sps:$4 sm:$0xff]   ;;  %v623_v34 = vld [vmem:[%s790_s0 + $0x8] ss:$16 sps:$4 sm:$0xff]  }
   0xe   :  { %566 = vmatprep.subr.bf16.mxu1 %v601_v13  ;;  %v625_v35 = vld [vmem:[%s790_s0 + $0xc] ss:$16 sps:$4 sm:$0xff]   ;;  %351 = vmatprep.mubr.bf16.mxu0 %v622_v33  ;;  %v626_v36 = vld [vmem:[%s790_s0 + $0x24] ss:$16 sps:$4 sm:$0xff]   ;;  %v630_v38 = vld [vmem:[%s790_s0 + $0x20] ss:$16 sps:$4 sm:$0xff]  }
   0xf   :  { %400 = vmatprep.mubr.bf16.mxu1 %v625_v35  ;;  %v628_v37 = vld [vmem:[%s790_s0 + $0x2c] ss:$16 sps:$4 sm:$0xff]   ;;  %v631_v39 = vld [vmem:[%s790_s0 + $0x28] ss:$16 sps:$4 sm:$0xff]  }
  0x10   :  { %539 = vmatpush3.bf16.msra.mxu0 %v602_v14 }
  0x11   :  { %567 = vmatpush3.bf16.msra.mxu1 %v603_v15  ;;  %540 = vmatprep.subr.bf16.mxu0 %v604_v16 }
  0x12   :  { %568 = vmatprep.subr.bf16.mxu1 %v605_v17 }
  0x14   :  { %541 = vmatpush3.bf16.msra.mxu0 %v606_v18 }
  0x15   :  { %569 = vmatpush3.bf16.msra.mxu1 %v607_v19  ;;  %542 = vmatprep.subr.bf16.mxu0 %v608_v20 }
  0x16   :  { %570 = vmatprep.subr.bf16.mxu1 %v609_v21 }
  0x18   :  { %543 = vmatpush3.bf16.msra.mxu0 %v610_v22 }
  0x19   :  { %571 = vmatpush3.bf16.msra.mxu1 %v611_v23  ;;  %544 = vmatprep.subr.bf16.mxu0 %v612_v24 }
  0x1a   :  { %572 = vmatprep.subr.bf16.mxu1 %v613_v25 }
  0x1c   :  { %545 = vmatpush3.bf16.msra.mxu0 %v614_v26 }
  0x1d   :  { %573 = vmatpush3.bf16.msra.mxu1 %v615_v27  ;;  %546 = vmatprep.subr.bf16.mxu0 %v616_v28 }
  0x1e   :  { %574 = vmatprep.subr.bf16.mxu1 %v617_v29 }
  0x20   :  { %547 = vmatpush3.bf16.msra.mxu0 %v618_v30 }
  0x21   :  { %575 = vmatpush3.bf16.msra.mxu1 %v619_v31 }
  0x23   :  { %352 = vmatmul.mubr.bf16.vlgmr.msra.gmra.mxu0 %v620_v32 }
  0x24   :  { %401 = vmatmul.mubr.bf16.vlgmr.msra.gmra.mxu1 %v623_v34  ;;  %359 = vmatprep.mubr.bf16.mxu0 %v626_v36 }
  0x25   :  { %408 = vmatprep.mubr.bf16.mxu1 %v628_v37 }
  0x2b   :  { %360 = vmatmul.mubr.bf16.gmra.mxu0 %v630_v38 }
  0x2c   :  { %409 = vmatmul.mubr.bf16.gmra.mxu1 %v631_v39 }
  0xe3   :  { %v548_v40 = vpop.f32.mrf.mxu0 }
  0xe4   :  { %v576_v41 = vpop.f32.mrf.mxu1 }
  0xe5   :  { %v549_v42 = vpop.f32.mrf.mxu0 }
  0xe6   :  { %v577_v43 = vpop.f32.mrf.mxu1  ;;  %v550_v46 = vadd.f32 %v549_v42, %v548_v40 }
  0xe7   :  { %v551_v44 = vpop.f32.mrf.mxu0  ;;  %v578_v47 = vadd.f32 %v577_v43, %v576_v41 }
  0xe8   :  { %v579_v45 = vpop.f32.mrf.mxu1 }
  0xe9   :  { %v552_v48 = vpop.f32.mrf.mxu0  ;;  %v403_v54 = vadd.f32 %v578_v47, %v550_v46 }
  0xea   :  { %v553_v49 = vadd.f32 %v552_v48, %v551_v44  ;;  %v580_v50 = vpop.f32.mrf.mxu1 }
  0xeb   :  { %v581_v51 = vadd.f32 %v580_v50, %v579_v45  ;;  %v554_v52 = vpop.f32.mrf.mxu0  ;;  %v446_v4 = vmul.f32 %v403_v54, %v403_v54 }
  0xec   :  { %v582_v53 = vpop.f32.mrf.mxu1 }
  0xed   :  { %v406_v55 = vadd.f32 %v581_v51, %v553_v49  ;;  %v555_v56 = vpop.f32.mrf.mxu0 }
  0xee   :  { %v556_v57 = vadd.f32 %v555_v56, %v554_v52  ;;  %v583_v58 = vpop.f32.mrf.mxu1 }
  0xef   :  { %v524_v59 = vpack.c.bf16 %v406_v55, %v403_v54  ;;  %v584_v60 = vadd.f32 %v583_v58, %v582_v53  ;;  %v557_v61 = vpop.f32.mrf.mxu0  ;;  %v447_v63 = vmul.f32 %v406_v55, %v406_v55  ;;  %v437_v5 = vadd.f32 %v406_v55, %v403_v54 }
  0xf0   :  { %v585_v62 = vpop.f32.mrf.mxu1 }
  0xf1   :  { %525 = vst [vmem:[%s791_s2] sm:$0xff] %v524_v59   ;;  %v411_v0 = vadd.f32 %v584_v60, %v556_v57  ;;  %v558_v1 = vpop.f32.mrf.mxu0  ;;  %v450_v8 = vadd.f32 %v447_v63, %v446_v4 }
  0xf2   :  { %v559_v2 = vadd.f32 %v558_v1, %v557_v61  ;;  %v586_v3 = vpop.f32.mrf.mxu1 }
  0xf3   :  { %v448_v6 = vmul.f32 %v411_v0, %v411_v0  ;;  %v587_v7 = vadd.f32 %v586_v3, %v585_v62  ;;  %v438_v9 = vadd.f32 %v437_v5, %v411_v0 }
  0xf5   :  { %v414_v10 = vadd.f32 %v587_v7, %v559_v2  ;;  %v451_v11 = vadd.f32 %v450_v8, %v448_v6 }
  0xf7   :  { %v529_v12 = vpack.c.bf16 %v414_v10, %v411_v0  ;;  %v439_v13 = vadd.f32 %v438_v9, %v414_v10  ;;  %v449_v14 = vmul.f32 %v414_v10, %v414_v10 }
  0xf9   :  { %531 = vst [vmem:[%s791_s2 + $0x8] sm:$0xff] %v529_v12   ;;  %v440_v15 = vrot.slane %v439_v13, 4  ;;  %v452_v16 = vadd.f32 %v451_v11, %v449_v14 }
  0xfb   :  { %v441_v17 = vadd.f32 %v440_v15, %v439_v13  ;;  %v453_v18 = vrot.slane %v452_v16, 4 }
  0xfd   :  { %v442_v19 = vrot.slane %v441_v17, 2  ;;  %v454_v20 = vadd.f32 %v453_v18, %v452_v16 }
  0xff   :  { %v443_v21 = vadd.f32 %v442_v19, %v441_v17  ;;  %v455_v22 = vrot.slane %v454_v20, 2 }
 0x101   :  { %v444_v23 = vrot.slane %v443_v21, 1  ;;  %v456_v24 = vadd.f32 %v455_v22, %v454_v20 }
 0x103   :  { %v445_v25 = vadd.f32 %v444_v23, %v443_v21  ;;  %v457_v26 = vrot.slane %v456_v24, 1 }
 0x105   :  { %v458_v27 = vadd.f32 %v457_v26, %v456_v24  ;;  %459 = vst [vmem:[%s792_s3] sm:$0xff] %v445_v25 }
 0x107   :  { %460 = vst [vmem:[%s793_s4] sm:$0xff] %v458_v27 }

</bundles_post_ra>
